<compile_context>
chip_gen: v7x
topology: tpu7x:2x2x1
jax: 0.10.0
libtpu: 0.0.40
codegen_flags: <defaults>
</compile_context>

<pallas_src>
import numpy as np
import jax
import jax.numpy as jnp
from jax.experimental import pallas as pl
from jax.experimental.pallas import tpu as pltpu


def _pos_embedding_kernel(x_ref, meta_ref, o_ref):
    x = x_ref[...]                       # (3, tile)       f32, batch on the lane axis
    meta = meta_ref[...]                 # (C_pad, 8)      resident per-channel constants
    m0 = meta[:, 0:1]                    # 1.0 where channel reads x[0]
    m1 = meta[:, 1:2]                    # 1.0 where channel reads x[1]
    m2 = meta[:, 2:3]                    # 1.0 where channel reads x[2]
    scale = meta[:, 3:4]                 # frequency multiplier
    phase = meta[:, 4:5]                 # 0 for sin channels, pi/2 for cos channels
    is_id = meta[:, 5:6]                 # 1.0 for the 3 identity channels
    not_id = meta[:, 6:7]                # 1.0 for trig channels (0 on the pad channel)

    x0 = x[0:1, :]
    x1 = x[1:2, :]
    x2 = x[2:3, :]
    # Channel-major replication of x: rows = output channels, lanes = batch rows.
    # Pre-baked 0/1 masks -> pure mul/add, no compares/selects to lower.
    xt = m0 * x0 + m1 * x1 + m2 * x2                  # (C_pad, tile)
    # One lane-dense trig sweep covers both sin and cos via the +pi/2 phase trick.
    trig = jnp.sin(xt * scale + phase)                # (C_pad, tile)
    o_ref[...] = (is_id * xt + not_id * trig).astype(o_ref.dtype)


def _pick_tile(n, tile_max, min_steps=2):
    """Lane tile: multiple of 128, <= tile_max, and >= min_steps grid steps if possible."""
    per_step = pl.cdiv(n, min_steps)
    t = 128 * pl.cdiv(per_step, 128)
    return max(128, min(tile_max, t))


def make_pos_embedding(max_logscale, N_freqs, logscale=True, *,
                       tile_max=4096, channel_major_out=False):
    """Returns a jitted forward: x (B, 3) -> (B, 6*N_freqs + 3).

    If channel_major_out=True the raw lane-dense kernel output (C_pad, B) is returned
    instead (channels on the sublane axis, batch on the lane axis) for consumers that
    can take the transposed layout (e.g. a fused first-layer matmul).
    """
    if logscale:
        freqs = 2.0 ** np.linspace(0.0, max_logscale, N_freqs)
    else:
        freqs = np.linspace(1.0, 2.0 ** max_logscale, N_freqs)
    out_dim = 3 + 6 * N_freqs
    c_pad = ((out_dim + 7) // 8) * 8          # sublane padding only (63 -> 64)
    tile_max = max(128, 128 * (tile_max // 128))

    # Per-channel constants, channel-major: [m0, m1, m2, scale, phase, is_id, not_id, 0].
    meta = np.zeros((c_pad, 8), np.float32)
    ch = np.arange(out_dim)
    coord = ch % 3                                         # layout repeats (x0, x1, x2)
    meta[ch, coord] = 1.0                                  # coordinate-select masks
    meta[:out_dim, 3] = 1.0                                # identity channels: scale 1
    meta[0:3, 5] = 1.0                                     # is_identity
    meta[3:out_dim, 6] = 1.0                               # not_identity (pad rows -> 0)
    for k, f in enumerate(freqs):
        base = 3 + 6 * k
        meta[base:base + 6, 3] = f
        meta[base + 3:base + 6, 4] = np.pi / 2.0           # cos(t) = sin(t + pi/2)
    meta = jnp.asarray(meta)

    @jax.jit
    def forward(x):
        n = x.shape[0]
        tile = _pick_tile(n, tile_max)
        xt_in = x.T                                        # (3, n) — tiny (12 B/row)
        out_cm = pl.pallas_call(
            _pos_embedding_kernel,
            out_shape=jax.ShapeDtypeStruct((c_pad, n), x.dtype),
            grid_spec=pltpu.PrefetchScalarGridSpec(
                num_scalar_prefetch=0,
                grid=(pl.cdiv(n, tile),),                  # partial last block is masked
                in_specs=[
                    pl.BlockSpec((3, tile), lambda i: (0, i)),
                    pl.BlockSpec((c_pad, 8), lambda i: (0, 0)),   # resident constants
                ],
                out_specs=pl.BlockSpec((c_pad, tile), lambda i: (0, i)),
            ),
            compiler_params=pltpu.CompilerParams(
                dimension_semantics=("parallel",)),
        )(xt_in, meta)
        if channel_major_out:
            return out_cm                                  # (C_pad, n) lane-dense
        # Module-compatible layout: one fused XLA slice+transpose (~0.1x of the
        # kernel's VALU cost; far cheaper than running the kernel lane-sparse).
        return out_cm[:out_dim].T                          # (n, 6*N_freqs + 3)

    return forward


def pos_embedding_reference(x, max_logscale, N_freqs, logscale=True):
    """Pure-JAX mirror of the torch forward."""
    if logscale:
        freqs = 2.0 ** np.linspace(0.0, max_logscale, N_freqs)
    else:
        freqs = np.linspace(1.0, 2.0 ** max_logscale, N_freqs)
    out = [x]
    for f in freqs:
        f = jnp.float32(f)
        out.append(jnp.sin(f * x))
        out.append(jnp.cos(f * x))
    return jnp.concatenate(out, axis=-1)


if __name__ == "__main__":
    MAX_LOGSCALE, N_FREQS = 9, 10       # standard NeRF xyz embedding -> 63 channels
    B = 1000                            # not a multiple of 128/tile: exercises masking
    key = jax.random.PRNGKey(0)
    x = jax.random.uniform(key, (B, 3), jnp.float32, minval=-1.0, maxval=1.0)

    embed = make_pos_embedding(MAX_LOGSCALE, N_FREQS, logscale=True, tile_max=4096)
    out = jax.block_until_ready(embed(x))

    ref = pos_embedding_reference(x, MAX_LOGSCALE, N_FREQS, logscale=True)
    assert out.shape == (B, 6 * N_FREQS + 3), out.shape
    max_err = float(jnp.max(jnp.abs(out - ref)))
    assert max_err < 2e-3, max_err
    print("KERNEL_OK")
</pallas_src>

<mosaic_0001>
module attributes {stable_mosaic.version = 11 : i64} {
  func.func @_pos_embedding_kernel(%arg0: i32, %arg1: memref<3x512xf32, #tpu.memory_space<vmem>>, %arg2: memref<64x8xf32, #tpu.memory_space<vmem>>, %arg3: memref<64x512xf32, #tpu.memory_space<vmem>>) attributes {dimension_semantics = [#tpu.dimension_semantics<parallel>], iteration_bounds = array<i64: 2>, scalar_prefetch = 0 : i64, scratch_operands = 0 : i64, tpu.core_type = #tpu.core_type<tc>, window_params = [{transform_indices = @transform_0, window_bounds = array<i64: 3, 512>}, {pipeline_mode = #tpu.pipeline_mode<synchronous>, transform_indices = @transform_1, window_bounds = array<i64: 64, 8>}, {transform_indices = @transform_2, window_bounds = array<i64: 64, 512>}]} {
    %c0 = arith.constant 0 : index
    %c0_0 = arith.constant 0 : index
    %0 = vector.load %arg1[%c0, %c0_0] : memref<3x512xf32, #tpu.memory_space<vmem>>, vector<3x512xf32>
    %c0_1 = arith.constant 0 : index
    %c0_2 = arith.constant 0 : index
    %1 = vector.load %arg2[%c0_1, %c0_2] : memref<64x8xf32, #tpu.memory_space<vmem>>, vector<64x8xf32>
    %2 = vector.extract_strided_slice %1 {offsets = [0, 0], sizes = [64, 1], strides = [1, 1]} : vector<64x8xf32> to vector<64x1xf32>
    %3 = vector.extract_strided_slice %1 {offsets = [0, 1], sizes = [64, 1], strides = [1, 1]} : vector<64x8xf32> to vector<64x1xf32>
    %4 = vector.extract_strided_slice %1 {offsets = [0, 2], sizes = [64, 1], strides = [1, 1]} : vector<64x8xf32> to vector<64x1xf32>
    %5 = vector.extract_strided_slice %1 {offsets = [0, 3], sizes = [64, 1], strides = [1, 1]} : vector<64x8xf32> to vector<64x1xf32>
    %6 = vector.extract_strided_slice %1 {offsets = [0, 4], sizes = [64, 1], strides = [1, 1]} : vector<64x8xf32> to vector<64x1xf32>
    %7 = vector.extract_strided_slice %1 {offsets = [0, 5], sizes = [64, 1], strides = [1, 1]} : vector<64x8xf32> to vector<64x1xf32>
    %8 = vector.extract_strided_slice %1 {offsets = [0, 6], sizes = [64, 1], strides = [1, 1]} : vector<64x8xf32> to vector<64x1xf32>
    %9 = vector.extract_strided_slice %0 {offsets = [0, 0], sizes = [1, 512], strides = [1, 1]} : vector<3x512xf32> to vector<1x512xf32>
    %10 = vector.extract_strided_slice %0 {offsets = [1, 0], sizes = [1, 512], strides = [1, 1]} : vector<3x512xf32> to vector<1x512xf32>
    %11 = vector.extract_strided_slice %0 {offsets = [2, 0], sizes = [1, 512], strides = [1, 1]} : vector<3x512xf32> to vector<1x512xf32>
    %12 = vector.broadcast %2 : vector<64x1xf32> to vector<64x512xf32>
    %13 = vector.broadcast %9 : vector<1x512xf32> to vector<64x512xf32>
    %14 = arith.mulf %12, %13 : vector<64x512xf32>
    %15 = vector.broadcast %3 : vector<64x1xf32> to vector<64x512xf32>
    %16 = vector.broadcast %10 : vector<1x512xf32> to vector<64x512xf32>
    %17 = arith.mulf %15, %16 : vector<64x512xf32>
    %18 = arith.addf %14, %17 : vector<64x512xf32>
    %19 = vector.broadcast %4 : vector<64x1xf32> to vector<64x512xf32>
    %20 = vector.broadcast %11 : vector<1x512xf32> to vector<64x512xf32>
    %21 = arith.mulf %19, %20 : vector<64x512xf32>
    %22 = arith.addf %18, %21 : vector<64x512xf32>
    %23 = vector.broadcast %5 : vector<64x1xf32> to vector<64x512xf32>
    %24 = arith.mulf %22, %23 : vector<64x512xf32>
    %25 = vector.broadcast %6 : vector<64x1xf32> to vector<64x512xf32>
    %26 = arith.addf %24, %25 : vector<64x512xf32>
    %27 = math.sin %26 : vector<64x512xf32>
    %28 = vector.broadcast %7 : vector<64x1xf32> to vector<64x512xf32>
    %29 = arith.mulf %28, %22 : vector<64x512xf32>
    %30 = vector.broadcast %8 : vector<64x1xf32> to vector<64x512xf32>
    %31 = arith.mulf %30, %27 : vector<64x512xf32>
    %32 = arith.addf %29, %31 : vector<64x512xf32>
    %c0_3 = arith.constant 0 : index
    %c0_4 = arith.constant 0 : index
    %33 = vector.load %arg3[%c0_3, %c0_4] : memref<64x512xf32, #tpu.memory_space<vmem>>, vector<64x512xf32>
    tpu.vector_store %arg3[%c0_3, %c0_4], %32 {strides = array<i32>} : memref<64x512xf32, #tpu.memory_space<vmem>>, vector<64x512xf32>,
    return
  }
  func.func @transform_0(%arg0: i32) -> (i32, i32) {
    %c0_i32 = arith.constant 0 : i32
    %c0_i32_0 = arith.constant 0 : i32
    return %c0_i32, %arg0 : i32, i32
  }
  func.func @transform_1(%arg0: i32) -> (i32, i32) {
    %c0_i32 = arith.constant 0 : i32
    %c0_i32_0 = arith.constant 0 : i32
    %c0_i32_1 = arith.constant 0 : i32
    return %c0_i32, %c0_i32_0 : i32, i32
  }
  func.func @transform_2(%arg0: i32) -> (i32, i32) {
    %c0_i32 = arith.constant 0 : i32
    %c0_i32_0 = arith.constant 0 : i32
    return %c0_i32, %arg0 : i32, i32
  }
}

</mosaic_0001>

<bundles_post_ra>
// kernel: forward.1
= control target key start
LH: loop header
LB: loop body
LE: loop exit
PB: predicated region body
PF: predicated region fallthrough
CT: control target
= control target key end

     0   :  { %7 = vsyncpa [#allocation3], 0  ;;  %s9769_s0 = inlined_call_operand.hbm [shape: f32[3,1000], index: 0, kind: input, shape index: {}]   ;;  %s9770_s1 = inlined_call_operand.hbm [shape: f32[64,8], index: 1, kind: input, shape index: {}]   ;;  %s9771_s2 = inlined_call_operand.vmem [shape: f32[64,1000], index: 2, kind: output, shape index: {}]  }
   0x1   :  { %9 = vsyncpa [#allocation3 + $0x1], 0 }
   0x2   :  { %10 = vsyncpa [#allocation5], 0  ;;  %s4977_s9 = smov 0   ;;  %s4979_s10 = smov 0  }
   0x3   :  { %s4981_s11 = smov 0   ;;  %s4983_s12 = smov 0  }
   0x4 LB: > { %s4996_s13 = sadd.s32 4294967295, %s4943_s12   ;;  %p36_p0 = scmp.ne.s32.totalorder %s4935_s10, %s4931_s9  ;;  %s4943_s12 = sphi %s4983_s12, %s10502_s12   ;;  %s4939_s11 = sphi %s4981_s11, %s10501_s11   ;;  %s4935_s10 = sphi %s4979_s10, %s10500_s10   ;;  %s4931_s9 = sphi %s4977_s9, %s10499_s9  }
   0x5   : > { %p9772_p1 = scmp.eq.s32.totalorder %s4996_s13, 0  ;;  %p4367_p3 = scmp.ge.s32.totalorder %s4943_s12, 1 }
   0x6   : > { %p94_p4 = scmp.lt.s32.totalorder %s4943_s12, 3  ;;  %s4945_s16 = smov [#allocation4]  }
   0x7   : > { %p5005_p5 = por %p9772_p1, %p36_p0  ;;  %s106_s17 = sshll.u32 %s4945_s16, 4  ;;  %s107_s17 = int_to_ptr.vmem [resolvable:$true] %s106_s17 }
   0x8   : > { %p5009_p6 = pnand %p4367_p3, %p94_p4  ;;  %s5022_s19 = sadd.s32 1, %s4943_s12  }
   0x9   : > { %s10025_s14 = scalar_select %p5005_p5, 1, 0 }
   0xa   : > { %s10026_s15 = scalar_select %p5009_p6, 1, 0 }
   0xb   : > { %p4646_p7 = pneg %p5009_p6  ;;  %s20_s20 = ssub.s32 %s4943_s12, %s5022_s19 }
   0xc   : > { %s4847_s23 = scalar_lea.hbm %s9770_s1, 1024 }
   0xd   : > { %p5017_p8 = pnand %p4646_p7, %p9772_p1  ;;  %p4848_p9 = scmp.ne.s32.totalorder %s9770_s1, %s4847_s23 }
   0xe   : > { %p4854_p13 = scmp.lt.u32.totalorder %s4847_s23, %s9770_s1 }
   0xf   : > { %p4849_p10 = pneg %p5017_p8 }
  0x11   : > { %p4850_p11 = pnand %p4849_p10, %p4848_p9 }
  0x13   : > { %p4851_p12 = pneg %p4850_p11 }
  0x15   : > { %p4856_p0 = pnand %p4854_p13, %p4851_p12 }
  0x17   : > { %4859 = shalt.err (!%p4856_p0)
}
  0x18   : > { %s4860_s28 = scalar_lea.vmem %s107_s17, 1024  ;;  %p4868_p1 = scmp.lt.s32.totalorder %s107_s17, %s107_s17 }
  0x19   : > { %p4861_p3 = scmp.ne.s32.totalorder %s107_s17, %s4860_s28  ;;  %p4869_p2 = scmp.lt.s32.totalorder %s4860_s28, %s4860_s28 }
  0x1b   : > { %p4863_p4 = pnand %p4861_p3, %p4849_p10  ;;  %p4870_p5 = por %p4869_p2, %p4868_p1 }
  0x1d   : > { %p4864_p7 = pneg %p4863_p4 }
  0x1f   : > { %p4871_p6 = pnand %p4870_p5, %p4864_p7 }
  0x21   : > { %4874 = shalt.err (!%p4871_p6)
}
  0x22   : > { %s4946_s29 = smov 128   ;;  %s4947_s30 = smov 8  }
  0x23   : > { %4649 = dma.hbm_to_vmem [thread:$0]  (!%p5017_p8), %s9770_s1, 1024, %s107_s17, [#allocation5], %s4946_s29, %s4946_s29, %s4947_s30  }
  0x24   : > { %p21_p1 = scmp.eq.s32.totalorder %s20_s20, 0  ;;  %s23_s5 = sadd.s32 1, %s4939_s11 }
  0x25   : > { %p30_p2 = scmp.ne.s32.totalorder %s4939_s11, %s4935_s10  ;;  %p31_p5 = scmp.eq.s32.totalorder %s4943_s12, 0 }
  0x26   : > { %s5047_s6 = scalar_select %p21_p1, %s4939_s11, %s23_s5  }
  0x27   : > { %p32_p6 = por %p31_p5, %p30_p2  ;;  %p10028_p9 = scmp.eq.s32.totalorder %s4996_s13, 1 }
  0x28   : > { %p4655_p11 = scmp.lt.s32.totalorder %s4943_s12, 2  ;;  %s120_s8 = sand.u32 1, %s4939_s11  }
  0x29   : > { %p5051_p10 = por %p10028_p9, %p30_p2  ;;  %s4370_s9 = sshll.u32 %s120_s8, 4 }
  0x2a   : > { %s4510_s16 = sshll.u32 %s4943_s12, 8  ;;  %s124_s20 = scalar_lea.vmem [#allocation2], %s4370_s9 }
  0x2b   : > { %s5061_s17 = scalar_lea.hbm %s9769_s0, %s4510_s16  ;;  %s132_s22 = sshll.u32 %s124_s20, 4  ;;  %s5063_s22 = int_to_ptr.vmem [resolvable:$true] %s132_s22 }
  0x2c   : > { %p5065_p8 = pnand %p4655_p11, %p32_p6  ;;  %s121_s12 = scalar_lea.sflag [#allocation3], %s120_s8 }
  0x2d   : > { %s4875_s24 = scalar_lea.hbm %s5061_s17, 256  ;;  %s4880_s27 = scalar_lea.hbm %s9769_s0, 512 }
  0x2e   : > { %p4876_p12 = scmp.ne.s32.totalorder %s5061_s17, %s4875_s24  ;;  %p4877_p13 = pneg %p5065_p8 }
  0x2f   : > { %p4881_p4 = scmp.lt.u32.totalorder %s5061_s17, %s9769_s0  ;;  %p4882_p7 = scmp.lt.u32.totalorder %s4880_s27, %s4875_s24 }
  0x30   : > { %p4878_p0 = pnand %p4877_p13, %p4876_p12  ;;  %p4884_p2 = scmp.lt.u32.totalorder %s4875_s24, %s5061_s17 }
  0x31   : > { %p4883_p1 = por %p4882_p7, %p4881_p4 }
  0x32   : > { %p4879_p3 = pneg %p4878_p0 }
  0x33   : > { %p4885_p5 = por %p4884_p2, %p4883_p1 }
  0x35   : > { %p4886_p6 = pnand %p4885_p5, %p4879_p3 }
  0x37   : > { %4889 = shalt.err (!%p4886_p6)
}
  0x38   : > { %s4890_s30 = scalar_lea.vmem %s5063_s22, 256  ;;  %s4948_s3 = smov [#allocation2]  }
  0x39   : > { %p4891_p9 = scmp.ne.s32.totalorder %s5063_s22, %s4890_s30  ;;  %s4895_s4 = sshll.u32 %s4948_s3, 4  ;;  %s4896_s4 = int_to_ptr.vmem [resolvable:$false] %s4895_s4 }
  0x3a   : > { %s4897_s5 = scalar_lea.vmem %s4896_s4, 512  ;;  %p4898_p0 = scmp.lt.s32.totalorder %s5063_s22, %s4896_s4 }
  0x3b   : > { %p4893_p11 = pnand %p4891_p9, %p4877_p13  ;;  %p4899_p4 = scmp.lt.s32.totalorder %s4897_s5, %s4890_s30 }
  0x3d   : > { %p4894_p12 = pneg %p4893_p11  ;;  %p4900_p7 = por %p4899_p4, %p4898_p0 }
  0x3f   : > { %p4901_p1 = pnand %p4900_p7, %p4894_p12 }
  0x41   : > { %4904 = shalt.err (!%p4901_p1)
}
  0x42   : > { %4653 = dma.hbm_to_vmem [thread:$0]  (!%p5065_p8), %s5061_s17, 256, %s5063_s22, %s121_s12  }
  0x43   : > { %p10031_p3 = scmp.ne.s32.totalorder %s10026_s15, 0 }
  0x45   : > { %141 = sbr.rel (%p10031_p3) target bundleno = 1156 (0x484), region = 28 }
  0x4c   : > { %s5097_s8 = sand.u32 1, %s4935_s10   ;;  %p10032_p13 = scmp.ne.s32.totalorder %s10025_s14, 0 }
  0x4d   : > { %s4374_s9 = sshll.u32 %s5097_s8, 4  ;;  %s144_s16 = scalar_lea.sflag [#allocation3], %s5097_s8 }
  0x4e   : > { %s5101_s18 = scalar_lea.vmem [#allocation2], %s4374_s9 }
  0x4f   : > { %4922 = dma.done.wait (%p10032_p13), %s144_s16, 256  }
  0x50   : > { %4924 = vsyncadd (%p10032_p13), %s144_s16, 4294967040  ;;  %p10033_p8 = scmp.eq.s32.totalorder %s4996_s13, 0 }
  0x52   : > { %4926 = dma.done.wait (%p10033_p8), [#allocation5], 1024   ;;  %p10034_p2 = pmov %p10033_p8 }
  0x53   : > { %v4949_v0 = vmov 0   ;;  %v5111_v1 = vld [vmem:[#allocation4 + $0x10] sm:$0xff]  ;;  %v5113_v2 = vld [vmem:[#allocation4] sm:$0xff]  ;;  %v5117_v3 = vld [vmem:[#allocation4 + $0x18] sm:$0xff]  ;;  %v4950_v9 = vmov 1   ;;  %v4951_v10 = vmov 2   ;;  %v225_v15 = vlaneseq }
  0x54   : > { %4928 = vsyncadd (%p10034_p2), [#allocation5], 4294966272  ;;  %4706 = vset.pattern.permute.xlu1 %v4949_v0  ;;  %4705 = vset.pattern.permute.xlu0 %v4949_v0  ;;  %v5119_v4 = vld [vmem:[#allocation4 + $0x8] sm:$0xff]  ;;  %v5125_v6 = vld [vmem:[#allocation4 + $0x20] sm:$0xff]  ;;  %v4952_v11 = vmov 3   ;;  %v4953_v12 = vmov 4  }
  0x55   : > { %195 = vperm.xlu1 %4706, %v5111_v1   ;;  %185 = vperm.xlu0 %4705, %v5113_v2   ;;  %v5123_v5 = vld [vmem:[#allocation4 + $0x28] sm:$0xff]  ;;  %v5129_v7 = vld [vmem:[#allocation4 + $0x38] sm:$0xff]  ;;  %v181_v8 = vld [vmem:[#allocation4 + $0x30] sm:$0xff]  ;;  %v4954_v13 = vmov 5   ;;  %v4955_v14 = vmov 6   ;;  %v5170_v16 = vshrl.u32 %v225_v15, 7 }
  0x56   : > { %v5176_v19 = vld [vmem:[%s5101_s18] sm:$0x77]  ;;  %v5179_v20 = vld [vmem:[%s5101_s18 + $0x8] sm:$0x77]  ;;  %s4376_s14 = sshll.u32 %s5097_s8, 8  ;;  %s4511_s21 = sshll.u32 (%p5051_p10), %s4996_s13, 5 }
  0x57   : > { %v227_v17 = vsub.s32 0, %v5170_v16  ;;  %v231_v18 = vsub.s32 4, %v5170_v16  ;;  %v327_v35 = vsub.s32 1, %v5170_v16  ;;  %v331_v38 = vsub.s32 5, %v5170_v16  ;;  %s6723_s15 = scalar_lea.vmem [#allocation6], %s4376_s14  ;;  %s9693_s22 = scalar_lea.vmem (%p5051_p10), %s9771_s2, %s4511_s21 }
  0x58   : > { %v459_v62 = vsub.s32 2, %v5170_v16 }
  0x59   : > { %200 = vperm.xlu1 %4706, %v5117_v3   ;;  %190 = vperm.xlu0 %4705, %v5119_v4   ;;  %v228_v21 = vrot.slane %v5176_v19, %v227_v17  ;;  %v232_v22 = vrot.slane %v5176_v19, %v231_v18  ;;  %v236_v23 = vrot.slane %v5179_v20, %v227_v17 }
  0x5a   : > { %v240_v24 = vrot.slane %v5179_v20, %v231_v18  ;;  %v328_v47 = vrot.slane %v5176_v19, %v327_v35  ;;  %v332_v50 = vrot.slane %v5176_v19, %v331_v38  ;;  %v336_v51 = vrot.slane %v5179_v20, %v327_v35 }
  0x5b   : > { %v5187_v25 = vrot.slane %v228_v21, %v227_v17  ;;  %v5189_v26 = vrot.slane %v232_v22, %v227_v17  ;;  %v5191_v27 = vrot.slane %v236_v23, %v227_v17  ;;  %v340_v52 = vrot.slane %v5179_v20, %v331_v38 }
  0x5c   : > { %v260_v28 = vrot.slane %v240_v24, %v227_v17  ;;  %v5249_v61 = vrot.slane %v328_v47, %v327_v35  ;;  %v468_v18 = vrot.slane %v5179_v20, %v459_v62 }
  0x5d   : > { %210 = vperm.xlu1 %4706, %v5123_v5   ;;  %205 = vperm.xlu0 %4705, %v5125_v6  }
  0x61   : > { %220 = vperm.xlu1 %4706, %v5129_v7   ;;  %215 = vperm.xlu0 %4705, %v181_v8  }
  0x65   : > { %4708 = vset.pattern.permute.xlu1 %v4950_v9  ;;  %4707 = vset.pattern.permute.xlu0 %v4950_v9 }
  0x66   : > { %298 = vperm.xlu1 %4708, %v5119_v4   ;;  %294 = vperm.xlu0 %4707, %v5113_v2  }
  0x6a   : > { %302 = vperm.xlu1 %4708, %v5111_v1   ;;  %306 = vperm.xlu0 %4707, %v5117_v3  }
  0x6e   : > { %310 = vperm.xlu1 %4708, %v5125_v6   ;;  %314 = vperm.xlu0 %4707, %v5123_v5  }
  0x72   : > { %318 = vperm.xlu1 %4708, %v181_v8   ;;  %322 = vperm.xlu0 %4707, %v5129_v7  }
  0x76   : > { %4709 = vset.pattern.permute.xlu1 %v4951_v10  ;;  %4710 = vset.pattern.permute.xlu0 %v4951_v10 }
  0x77   : > { %426 = vperm.xlu1 %4709, %v5113_v2   ;;  %430 = vperm.xlu0 %4710, %v5119_v4  }
  0x7b   : > { %434 = vperm.xlu1 %4709, %v5111_v1   ;;  %442 = vperm.xlu0 %4710, %v5125_v6  }
  0x7f   : > { %438 = vperm.xlu1 %4709, %v5117_v3   ;;  %450 = vperm.xlu0 %4710, %v181_v8  }
  0x83   : > { %446 = vperm.xlu1 %4709, %v5123_v5   ;;  %4711 = vset.pattern.permute.xlu0 %v4952_v11 }
  0x84   : > { %558 = vperm.xlu0 %4711, %v5113_v2  }
  0x87   : > { %454 = vperm.xlu1 %4709, %v5129_v7  }
  0x88   : > { %570 = vperm.xlu0 %4711, %v5117_v3  }
  0x8b   : > { %4712 = vset.pattern.permute.xlu1 %v4952_v11 }
  0x8c   : > { %562 = vperm.xlu1 %4712, %v5119_v4   ;;  %578 = vperm.xlu0 %4711, %v5123_v5  }
  0x90   : > { %566 = vperm.xlu1 %4712, %v5111_v1   ;;  %586 = vperm.xlu0 %4711, %v5129_v7  }
  0x94   : > { %574 = vperm.xlu1 %4712, %v5125_v6   ;;  %4714 = vset.pattern.permute.xlu0 %v4953_v12 }
  0x95   : > { %626 = vperm.xlu0 %4714, %v5119_v4  }
  0x98   : > { %582 = vperm.xlu1 %4712, %v181_v8  }
  0x99   : > { %638 = vperm.xlu0 %4714, %v5125_v6  }
  0x9c   : > { %4713 = vset.pattern.permute.xlu1 %v4953_v12 }
  0x9d   : > { %622 = vperm.xlu1 %4713, %v5113_v2   ;;  %646 = vperm.xlu0 %4714, %v181_v8  }
  0xa1   : > { %630 = vperm.xlu1 %4713, %v5111_v1   ;;  %4715 = vset.pattern.permute.xlu0 %v4954_v13 }
  0xa2   : > { %4014 = vperm.xlu0 %4715, %v5113_v2  }
  0xa5   : > { %634 = vperm.xlu1 %4713, %v5117_v3  }
  0xa6   : > { %4026 = vperm.xlu0 %4715, %v5117_v3  }
  0xa9   : > { %642 = vperm.xlu1 %4713, %v5123_v5  }
  0xaa   : > { %4034 = vperm.xlu0 %4715, %v5123_v5  }
  0xad   : > { %650 = vperm.xlu1 %4713, %v5129_v7  }
  0xae   : > { %4042 = vperm.xlu0 %4715, %v5129_v7  }
  0xb1   : > { %4716 = vset.pattern.permute.xlu1 %v4954_v13  ;;  %v460_v13 = vrot.slane %v5176_v19, %v459_v62 }
  0xb2   : > { %4018 = vperm.xlu1 %4716, %v5119_v4   ;;  %4718 = vset.pattern.permute.xlu0 %v4955_v14 }
  0xb3   : > { %4082 = vperm.xlu0 %4718, %v5119_v4   ;;  %v463_v4 = vsub.s32 6, %v5170_v16 }
  0xb5   : > { %v464_v17 = vrot.slane %v5176_v19, %v463_v4  ;;  %v472_v21 = vrot.slane %v5179_v20, %v463_v4 }
  0xb6   : > { %4022 = vperm.xlu1 %4716, %v5111_v1  }
  0xb7   : > { %4094 = vperm.xlu0 %4718, %v5125_v6  }
  0xba   : > { %4030 = vperm.xlu1 %4716, %v5125_v6  }
  0xbb   : > { %4102 = vperm.xlu0 %4718, %v181_v8  }
  0xbe   : > { %4038 = vperm.xlu1 %4716, %v181_v8  }
  0xc2   : > { %4717 = vset.pattern.permute.xlu1 %v4955_v14 }
  0xc3   : > { %4078 = vperm.xlu1 %4717, %v5113_v2   ;;  %v5254_v2 = vrot.slane %v336_v51, %v327_v35  ;;  %v5310_v51 = vrot.slane %v472_v21, %v459_v62 }
  0xc7   : > { %4086 = vperm.xlu1 %4717, %v5111_v1   ;;  %v5252_v1 = vrot.slane %v332_v50, %v327_v35  ;;  %v5308_v50 = vrot.slane %v468_v18, %v459_v62 }
  0xcb   : > { %4090 = vperm.xlu1 %4717, %v5117_v3   ;;  %v5256_v3 = vrot.slane %v340_v52, %v327_v35  ;;  %v5294_v35 = vrot.slane %v460_v13, %v459_v62 }
  0xcf   : > { %4098 = vperm.xlu1 %4717, %v5123_v5  }
  0xd3   : > { %4106 = vperm.xlu1 %4717, %v5129_v7  }
  0xd4   : > { %v196_v29 = vpop.permute.xlu1 %195  ;;  %v5194_v30 = vpop.permute.xlu0 %185 }
  0xd5   : > { %v5197_v31 = vmul.f32 %v5187_v25, %v196_v29  ;;  %v5200_v32 = vmul.f32 %v5189_v26, %v196_v29  ;;  %v5203_v33 = vmul.f32 %v5191_v27, %v196_v29  ;;  %v5205_v34 = vmul.f32 %v260_v28, %v196_v29 }
  0xd6   : > { %v264_v14 = vmul.f32 %v260_v28, %v5194_v30 }
  0xd8   : > { %v201_v36 = vpop.permute.xlu1 %200  ;;  %v191_v37 = vpop.permute.xlu0 %190 }
  0xd9   : > { %v5210_v39 = vmul.f32 %v5187_v25, %v201_v36  ;;  %v5213_v40 = vmul.f32 %v5189_v26, %v201_v36  ;;  %v5216_v41 = vmul.f32 %v5191_v27, %v201_v36  ;;  %v5218_v42 = vmul.f32 %v260_v28, %v201_v36 }
  0xda   : > { %v265_v43 = vmul.f32 %v5187_v25, %v191_v37  ;;  %v266_v44 = vmul.f32 %v5189_v26, %v191_v37  ;;  %v267_v45 = vmul.f32 %v5191_v27, %v191_v37  ;;  %v268_v46 = vmul.f32 %v260_v28, %v191_v37 }
  0xdc   : > { %v211_v48 = vpop.permute.xlu1 %210  ;;  %v206_v49 = vpop.permute.xlu0 %205 }
  0xdd   : > { %v5228_v53 = vmul.f32 %v5187_v25, %v211_v48  ;;  %v5231_v54 = vmul.f32 %v5189_v26, %v211_v48  ;;  %v5234_v55 = vmul.f32 %v5191_v27, %v211_v48  ;;  %v5236_v56 = vmul.f32 %v260_v28, %v211_v48 }
  0xde   : > { %v5239_v57 = vmul.f32 %v5187_v25, %v206_v49  ;;  %v5242_v58 = vmul.f32 %v5189_v26, %v206_v49  ;;  %v5245_v59 = vmul.f32 %v5191_v27, %v206_v49  ;;  %v5247_v60 = vmul.f32 %v260_v28, %v206_v49 }
  0xdf   : > { %v5306_v49 = vrot.slane %v464_v17, %v459_v62 }
  0xe0   : > { %v221_v63 = vpop.permute.xlu1 %220  ;;  %v216_v0 = vpop.permute.xlu0 %215 }
  0xe1   : > { %v5260_v5 = vmul.f32 %v5187_v25, %v221_v63  ;;  %v5263_v6 = vmul.f32 %v5189_v26, %v221_v63  ;;  %v5266_v7 = vmul.f32 %v5191_v27, %v221_v63  ;;  %v5268_v8 = vmul.f32 %v260_v28, %v221_v63 }
  0xe2   : > { %v5271_v9 = vmul.f32 %v5187_v25, %v216_v0  ;;  %v5274_v10 = vmul.f32 %v5189_v26, %v216_v0  ;;  %v5277_v11 = vmul.f32 %v5191_v27, %v216_v0  ;;  %v5279_v12 = vmul.f32 %v260_v28, %v216_v0 }
  0xe5   : > { %v299_v15 = vpop.permute.xlu1 %298  ;;  %v5283_v16 = vpop.permute.xlu0 %294 }
  0xe6   : > { %v365_v22 = vmul.f32 %v5249_v61, %v299_v15  ;;  %v366_v23 = vmul.f32 %v5252_v1, %v299_v15  ;;  %v367_v24 = vmul.f32 %v5254_v2, %v299_v15  ;;  %v368_v29 = vmul.f32 %v5256_v3, %v299_v15 }
  0xe7   : > { %v364_v28 = vmul.f32 %v5256_v3, %v5283_v16 }
  0xe8   : > { %v5296_v36 = vadd.f32 %v365_v22, %v265_v43  ;;  %v5298_v19 = vadd.f32 %v366_v23, %v266_v44  ;;  %v5300_v37 = vadd.f32 %v367_v24, %v267_v45  ;;  %v5302_v20 = vadd.f32 %v368_v29, %v268_v46 }
  0xe9   : > { %v5304_v38 = vadd.f32 %v364_v28, %v264_v14  ;;  %v303_v47 = vpop.permute.xlu1 %302  ;;  %v307_v48 = vpop.permute.xlu0 %306 }
  0xea   : > { %v369_v52 = vmul.f32 %v5249_v61, %v303_v47  ;;  %v370_v43 = vmul.f32 %v5252_v1, %v303_v47  ;;  %v371_v44 = vmul.f32 %v5254_v2, %v303_v47  ;;  %v372_v45 = vmul.f32 %v5256_v3, %v303_v47 }
  0xeb   : > { %v373_v46 = vmul.f32 %v5249_v61, %v307_v48  ;;  %v374_v63 = vmul.f32 %v5252_v1, %v307_v48  ;;  %v375_v0 = vmul.f32 %v5254_v2, %v307_v48  ;;  %v376_v4 = vmul.f32 %v5256_v3, %v307_v48 }
  0xec   : > { %v5321_v13 = vadd.f32 %v369_v52, %v5197_v31  ;;  %v5324_v62 = vadd.f32 %v370_v43, %v5200_v32  ;;  %v5327_v14 = vadd.f32 %v371_v44, %v5203_v33  ;;  %v5330_v15 = vadd.f32 %v372_v45, %v5205_v34 }
  0xed   : > { %v5333_v17 = vadd.f32 %v373_v46, %v5210_v39  ;;  %v5336_v18 = vadd.f32 %v374_v63, %v5213_v40  ;;  %v5339_v21 = vadd.f32 %v375_v0, %v5216_v41  ;;  %v5342_v31 = vadd.f32 %v376_v4, %v5218_v42  ;;  %v311_v32 = vpop.permute.xlu1 %310  ;;  %v315_v22 = vpop.permute.xlu0 %314 }
  0xee   : > { %v377_v33 = vmul.f32 %v5249_v61, %v311_v32  ;;  %v378_v23 = vmul.f32 %v5252_v1, %v311_v32  ;;  %v379_v34 = vmul.f32 %v5254_v2, %v311_v32  ;;  %v380_v39 = vmul.f32 %v5256_v3, %v311_v32 }
  0xef   : > { %v381_v24 = vmul.f32 %v5249_v61, %v315_v22  ;;  %v382_v40 = vmul.f32 %v5252_v1, %v315_v22  ;;  %v383_v41 = vmul.f32 %v5254_v2, %v315_v22  ;;  %v384_v29 = vmul.f32 %v5256_v3, %v315_v22 }
  0xf0   : > { %v409_v42 = vadd.f32 %v377_v33, %v5239_v57  ;;  %v410_v28 = vadd.f32 %v378_v23, %v5242_v58  ;;  %v411_v47 = vadd.f32 %v379_v34, %v5245_v59  ;;  %v412_v48 = vadd.f32 %v380_v39, %v5247_v60 }
  0xf1   : > { %v5357_v52 = vadd.f32 %v381_v24, %v5228_v53  ;;  %v5360_v43 = vadd.f32 %v382_v40, %v5231_v54  ;;  %v5363_v44 = vadd.f32 %v383_v41, %v5234_v55  ;;  %v5366_v45 = vadd.f32 %v384_v29, %v5236_v56  ;;  %v319_v46 = vpop.permute.xlu1 %318  ;;  %v323_v57 = vpop.permute.xlu0 %322 }
  0xf2   : > { %v385_v58 = vmul.f32 %v5249_v61, %v319_v46  ;;  %v386_v59 = vmul.f32 %v5252_v1, %v319_v46  ;;  %v387_v60 = vmul.f32 %v5254_v2, %v319_v46  ;;  %v388_v53 = vmul.f32 %v5256_v3, %v319_v46 }
  0xf3   : > { %v389_v63 = vmul.f32 %v5249_v61, %v323_v57  ;;  %v390_v54 = vmul.f32 %v5252_v1, %v323_v57  ;;  %v391_v55 = vmul.f32 %v5254_v2, %v323_v57  ;;  %v392_v0 = vmul.f32 %v5256_v3, %v323_v57 }
  0xf4   : > { %v417_v56 = vadd.f32 %v385_v58, %v5271_v9  ;;  %v418_v4 = vadd.f32 %v386_v59, %v5274_v10  ;;  %v419_v32 = vadd.f32 %v387_v60, %v5277_v11  ;;  %v420_v22 = vadd.f32 %v388_v53, %v5279_v12 }
  0xf5   : > { %v5381_v33 = vadd.f32 %v389_v63, %v5260_v5  ;;  %v5384_v23 = vadd.f32 %v390_v54, %v5263_v6  ;;  %v5387_v34 = vadd.f32 %v391_v55, %v5266_v7  ;;  %v5390_v39 = vadd.f32 %v392_v0, %v5268_v8 }
  0xf6   : > { %v5392_v3 = vpop.permute.xlu1 %426  ;;  %v431_v9 = vpop.permute.xlu0 %430 }
  0xf7   : > { %v496_v10 = vmul.f32 %v5310_v51, %v5392_v3  ;;  %v497_v11 = vmul.f32 %v5294_v35, %v431_v9  ;;  %v498_v5 = vmul.f32 %v5306_v49, %v431_v9  ;;  %v499_v12 = vmul.f32 %v5308_v50, %v431_v9 }
  0xf8   : > { %v500_v6 = vmul.f32 %v5310_v51, %v431_v9 }
  0xf9   : > { %v5401_v7 = vadd.f32 %v496_v10, %v5304_v38  ;;  %v5404_v40 = vadd.f32 %v497_v11, %v5296_v36  ;;  %v5407_v41 = vadd.f32 %v498_v5, %v5298_v19  ;;  %v5410_v29 = vadd.f32 %v499_v12, %v5300_v37 }
  0xfa   : > { %v435_v24 = vpop.permute.xlu1 %434  ;;  %v443_v8 = vpop.permute.xlu0 %442  ;;  %v5413_v46 = vadd.f32 %v500_v6, %v5302_v20 }
  0xfb   : > { %10035 = vst [vmem:[#allocation9_spill] sm:$0xff] %v5404_v40  ;;  %10036 = vst [vmem:[#allocation10_spill] sm:$0xff] %v5407_v41  ;;  %v501_v57 = vmul.f32 %v5294_v35, %v435_v24  ;;  %v502_v58 = vmul.f32 %v5306_v49, %v435_v24  ;;  %v503_v38 = vmul.f32 %v5308_v50, %v435_v24 }
  0xfc   : > { %10037 = vst [vmem:[#allocation11_spill] sm:$0xff] %v5410_v29  ;;  %10038 = vst [vmem:[#allocation12_spill] sm:$0xff] %v5413_v46  ;;  %v504_v59 = vmul.f32 %v5310_v51, %v435_v24  ;;  %v509_v36 = vmul.f32 %v5294_v35, %v443_v8  ;;  %v510_v60 = vmul.f32 %v5306_v49, %v443_v8 }
  0xfd   : > { %v511_v19 = vmul.f32 %v5308_v50, %v443_v8  ;;  %v512_v37 = vmul.f32 %v5310_v51, %v443_v8  ;;  %v5424_v53 = vadd.f32 %v501_v57, %v5321_v13  ;;  %v5427_v20 = vadd.f32 %v502_v58, %v5324_v62 }
  0xfe   : > { %v5430_v63 = vadd.f32 %v503_v38, %v5327_v14  ;;  %v5433_v54 = vadd.f32 %v504_v59, %v5330_v15  ;;  %v439_v55 = vpop.permute.xlu1 %438  ;;  %v451_v0 = vpop.permute.xlu0 %450  ;;  %v5435_v9 = vadd.f32 %v509_v36, %v409_v42  ;;  %v5437_v10 = vadd.f32 %v510_v60, %v410_v28 }
  0xff   : > { %10039 = vst [vmem:[#allocation13_spill] sm:$0xff] %v5424_v53  ;;  %10040 = vst [vmem:[#allocation14_spill] sm:$0xff] %v5427_v20  ;;  %v5439_v11 = vadd.f32 %v511_v19, %v411_v47  ;;  %v5441_v5 = vadd.f32 %v512_v37, %v412_v48  ;;  %v505_v13 = vmul.f32 %v5294_v35, %v439_v55 }
 0x100   : > { %10041 = vst [vmem:[#allocation15_spill] sm:$0xff] %v5430_v63  ;;  %10042 = vst [vmem:[#allocation16_spill] sm:$0xff] %v5433_v54  ;;  %v506_v62 = vmul.f32 %v5306_v49, %v439_v55  ;;  %v507_v14 = vmul.f32 %v5308_v50, %v439_v55  ;;  %v508_v12 = vmul.f32 %v5310_v51, %v439_v55 }
 0x101   : > { %10043 = vst [vmem:[#allocation17_spill] sm:$0xff] %v5435_v9  ;;  %10044 = vst [vmem:[#allocation18_spill] sm:$0xff] %v5437_v10  ;;  %v517_v15 = vmul.f32 %v5294_v35, %v451_v0  ;;  %v518_v6 = vmul.f32 %v5306_v49, %v451_v0  ;;  %v519_v42 = vmul.f32 %v5308_v50, %v451_v0 }
 0x102   : > { %10045 = vst [vmem:[#allocation19_spill] sm:$0xff] %v5439_v11  ;;  %10046 = vst [vmem:[#allocation20_spill] sm:$0xff] %v5441_v5  ;;  %v520_v28 = vmul.f32 %v5310_v51, %v451_v0  ;;  %v5452_v47 = vadd.f32 %v505_v13, %v5333_v17  ;;  %v5455_v48 = vadd.f32 %v506_v62, %v5336_v18  ;;  %v447_v57 = vpop.permute.xlu1 %446 }
 0x103   : > { %v5458_v24 = vadd.f32 %v507_v14, %v5339_v21  ;;  %v5461_v8 = vadd.f32 %v508_v12, %v5342_v31  ;;  %v5463_v58 = vadd.f32 %v517_v15, %v417_v56  ;;  %v5465_v38 = vadd.f32 %v518_v6, %v418_v4  ;;  %v5475_v19 = vpop.permute.xlu0 %558 }
 0x104   : > { %v5467_v59 = vadd.f32 %v519_v42, %v419_v32  ;;  %v5469_v36 = vadd.f32 %v520_v28, %v420_v22  ;;  %v513_v17 = vmul.f32 %v5294_v35, %v447_v57  ;;  %v514_v18 = vmul.f32 %v5306_v49, %v447_v57 }
 0x105   : > { %10047 = vst [vmem:[#allocation21_spill] sm:$0xff] %v5463_v58  ;;  %10048 = vst [vmem:[#allocation22_spill] sm:$0xff] %v5465_v38  ;;  %v515_v60 = vmul.f32 %v5308_v50, %v447_v57  ;;  %v516_v21 = vmul.f32 %v5310_v51, %v447_v57 }
 0x106   : > { %10049 = vst [vmem:[#allocation23_spill] sm:$0xff] %v5467_v59  ;;  %10050 = vst [vmem:[#allocation24_spill] sm:$0xff] %v5469_v36  ;;  %v5478_v31 = vadd.f32 %v513_v17, %v5357_v52  ;;  %v5481_v56 = vadd.f32 %v514_v18, %v5360_v43  ;;  %v455_v22 = vpop.permute.xlu1 %454 }
 0x107   : > { %v5484_v4 = vadd.f32 %v515_v60, %v5363_v44  ;;  %v5487_v32 = vadd.f32 %v516_v21, %v5366_v45  ;;  %v521_v37 = vmul.f32 %v5294_v35, %v455_v22  ;;  %v522_v55 = vmul.f32 %v5306_v49, %v455_v22  ;;  %v5493_v52 = vpop.permute.xlu0 %570 }
 0x108   : > { %10051 = vst [vmem:[#allocation25_spill] sm:$0xff] %v5481_v56  ;;  %v523_v0 = vmul.f32 %v5308_v50, %v455_v22  ;;  %v524_v13 = vmul.f32 %v5310_v51, %v455_v22 }
 0x109   : > { %10052 = vst [vmem:[#allocation26_spill] sm:$0xff] %v5484_v4  ;;  %10053 = vst [vmem:[#allocation27_spill] sm:$0xff] %v5487_v32  ;;  %v5496_v43 = vadd.f32 %v521_v37, %v5381_v33  ;;  %v5499_v44 = vadd.f32 %v522_v55, %v5384_v23 }
 0x10a   : > { %v5502_v45 = vadd.f32 %v523_v0, %v5387_v34  ;;  %v5505_v62 = vadd.f32 %v524_v13, %v5390_v39 }
 0x10b   : > { %10054 = vst [vmem:[#allocation28_spill] sm:$0xff] %v5496_v43  ;;  %10055 = vst [vmem:[#allocation29_spill] sm:$0xff] %v5499_v44  ;;  %v563_v14 = vpop.permute.xlu1 %562  ;;  %v5507_v12 = vpop.permute.xlu0 %578 }
 0x10c   : > { %10056 = vst [vmem:[#allocation30_spill] sm:$0xff] %v5502_v45  ;;  %10057 = vst [vmem:[#allocation31_spill] sm:$0xff] %v5505_v62  ;;  %v593_v6 = vmul.f32 %v563_v14, %v5404_v40  ;;  %v594_v33 = vmul.f32 %v563_v14, %v5407_v41  ;;  %v595_v23 = vmul.f32 %v563_v14, %v5410_v29 }
 0x10d   : > { %v596_v42 = vmul.f32 %v563_v14, %v5413_v46 }
 0x10f   : > { %v5509_v15 = vpop.permute.xlu0 %586  ;;  %v5511_v51 = vpop.permute.xlu1 %566 }
 0x113   : > { %v575_v18 = vpop.permute.xlu1 %574 }
 0x114   : > { %v627_v34 = vpop.permute.xlu0 %626  ;;  %v605_v21 = vmul.f32 %v575_v18, %v5435_v9  ;;  %v606_v22 = vmul.f32 %v575_v18, %v5437_v10  ;;  %v607_v37 = vmul.f32 %v575_v18, %v5439_v11  ;;  %v608_v55 = vmul.f32 %v575_v18, %v5441_v5 }
 0x115   : > { %v5517_v28 = vadd.f32 %v627_v34, %v593_v6  ;;  %v5519_v39 = vadd.f32 %v627_v34, %v594_v33  ;;  %v5521_v57 = vadd.f32 %v627_v34, %v595_v23  ;;  %v5523_v17 = vadd.f32 %v627_v34, %v596_v42 }
 0x116   : > { %v261_v11 = vmul.f32 %v5187_v25, %v5194_v30  ;;  %v262_v18 = vmul.f32 %v5189_v26, %v5194_v30  ;;  %v493_v25 = vmul.f32 %v5294_v35, %v5392_v3  ;;  %v494_v26 = vmul.f32 %v5306_v49, %v5392_v3 }
 0x117   : > { %10058 = vst [vmem:[#allocation32_spill] sm:$0xff] %v5517_v28  ;;  %10059 = vst [vmem:[#allocation33_spill] sm:$0xff] %v5519_v39  ;;  %v1104_v33 = vand.u32 2139095040, %v5517_v28  ;;  %v1208_v23 = vand.u32 2139095040, %v5519_v39  ;;  %v1312_v10 = vand.u32 2139095040, %v5521_v57 }
 0x118   : > { %10060 = vst [vmem:[#allocation34_spill] sm:$0xff] %v5521_v57  ;;  %10061 = vst [vmem:[#allocation35_spill] sm:$0xff] %v5523_v17  ;;  %v639_v60 = vpop.permute.xlu0 %638 }
 0x119   : > { %v5529_v0 = vadd.f32 %v639_v60, %v605_v21  ;;  %v5531_v13 = vadd.f32 %v639_v60, %v606_v22  ;;  %v5533_v14 = vadd.f32 %v639_v60, %v607_v37  ;;  %v5535_v6 = vadd.f32 %v639_v60, %v608_v55 }
 0x11a   : > { %v1105_v42 = vshrl.u32 %v1104_v33, 23  ;;  %v1209_v34 = vshrl.u32 %v1208_v23, 23  ;;  %v361_v21 = vmul.f32 %v5249_v61, %v5283_v16  ;;  %v362_v60 = vmul.f32 %v5252_v1, %v5283_v16 }
 0x11b   : > { %10062 = vst [vmem:[#allocation36_spill] sm:$0xff] %v5529_v0  ;;  %10063 = vst [vmem:[#allocation37_spill] sm:$0xff] %v5531_v13  ;;  %v263_v22 = vmul.f32 %v5191_v27, %v5194_v30  ;;  %v363_v37 = vmul.f32 %v5254_v2, %v5283_v16  ;;  %v1416_v55 = vand.u32 2139095040, %v5523_v17  ;;  %v495_v61 = vmul.f32 %v5308_v50, %v5392_v3 }
 0x11c   : > { %10064 = vst [vmem:[#allocation38_spill] sm:$0xff] %v5533_v14  ;;  %10065 = vst [vmem:[#allocation39_spill] sm:$0xff] %v5535_v6  ;;  %v4393_v33 = vadd.s32 4294967169, %v1105_v42  ;;  %v4397_v23 = vadd.s32 4294967169, %v1209_v34  ;;  %v1313_v1 = vshrl.u32 %v1312_v10, 23  ;;  %v393_v5 = vadd.f32 %v361_v21, %v261_v11 }
 0x11d   : > { %v394_v9 = vadd.f32 %v362_v60, %v262_v18  ;;  %v395_v27 = vadd.f32 %v363_v37, %v263_v22  ;;  %v1417_v30 = vshrl.u32 %v1416_v55, 23  ;;  %v2352_v3 = vand.u32 2139095040, %v5529_v0  ;;  %v583_v55 = vpop.permute.xlu1 %582 }
 0x11e   : > { %v5559_v46 = vadd.f32 %v493_v25, %v393_v5  ;;  %v1111_v16 = vadd.s32 1, %v4393_v33  ;;  %v1215_v35 = vadd.s32 1, %v4397_v23  ;;  %v4401_v41 = vadd.s32 4294967169, %v1313_v1 }
 0x11f   : > { %v5561_v2 = vadd.f32 %v494_v26, %v394_v9  ;;  %v5563_v29 = vadd.f32 %v495_v61, %v395_v27  ;;  %v5580_v9 = vmul.f32 %v5475_v19, %v5401_v7  ;;  %v5584_v11 = vmul.f32 %v5493_v52, %v5452_v47 }
 0x120   : > { %v5567_v49 = vmul.f32 %v5475_v19, %v5559_v46  ;;  %v4405_v5 = vadd.s32 4294967169, %v1417_v30  ;;  %v5588_v42 = vmul.f32 %v5493_v52, %v5455_v48  ;;  %v5592_v34 = vmul.f32 %v5493_v52, %v5458_v24 }
 0x121   : > { %v5571_v50 = vmul.f32 %v5475_v19, %v5561_v2  ;;  %v5576_v10 = vmul.f32 %v5475_v19, %v5563_v29  ;;  %v5596_v18 = vmul.f32 %v5493_v52, %v5461_v8  ;;  %vm1112_vm0 = vcmp.gt.s32.totalorder %v1111_v16, 0 }
 0x122   : > { %v5600_v19 = vmul.f32 %v5507_v12, %v5478_v31  ;;  %v5604_v21 = vmul.f32 %v5507_v12, %v5481_v56  ;;  %vm1216_vm1 = vcmp.gt.s32.totalorder %v1215_v35, 0  ;;  %v1319_v60 = vadd.s32 1, %v4401_v41 }
 0x123   : > { %v5608_v22 = vmul.f32 %v5507_v12, %v5484_v4  ;;  %v5612_v37 = vmul.f32 %v5507_v12, %v5487_v32  ;;  %v5616_v52 = vmul.f32 %v5511_v51, %v5424_v53  ;;  %v2353_v25 = vshrl.u32 %v2352_v3, 23 }
 0x124   : > { %v5620_v26 = vmul.f32 %v5511_v51, %v5427_v20  ;;  %v5624_v41 = vmul.f32 %v5511_v51, %v5430_v63  ;;  %v1113_v33 = vsel %vm1112_vm0, %v1111_v16, 0  ;;  %v1423_v61 = vadd.s32 1, %v4405_v5 }
 0x125   : > { %v5628_v12 = vmul.f32 %v5511_v51, %v5433_v54  ;;  %v5632_v23 = vmul.f32 %v5509_v15, %v5496_v43  ;;  %v1217_v1 = vsel %vm1216_vm1, %v1215_v35, 0  ;;  %v2456_v27 = vand.u32 2139095040, %v5531_v13  ;;  %v647_v51 = vpop.permute.xlu0 %646 }
 0x126   : > { %v5637_v30 = vmul.f32 %v5509_v15, %v5499_v44  ;;  %v5641_v3 = vmul.f32 %v5509_v15, %v5502_v45  ;;  %vm1320_vm2 = vcmp.gt.s32.totalorder %v1319_v60, 0  ;;  %v613_v16 = vmul.f32 %v583_v55, %v5463_v58 }
 0x127   : > { %10066 = vst [vmem:[#allocation40_spill] sm:$0xff] %v5632_v23  ;;  %v5644_v5 = vand.u32 31, %v1113_v33  ;;  %v614_v43 = vmul.f32 %v583_v55, %v5465_v38  ;;  %v615_v35 = vmul.f32 %v583_v55, %v5467_v59  ;;  %v4441_v0 = vadd.s32 4294967169, %v2353_v25 }
 0x128   : > { %10067 = vst [vmem:[#allocation41_spill] sm:$0xff] %v5637_v30  ;;  %10068 = vst [vmem:[#allocation42_spill] sm:$0xff] %v5641_v3  ;;  %v5648_v13 = vand.u32 31, %v1217_v1  ;;  %vm1424_vm3 = vcmp.gt.s32.totalorder %v1423_v61, 0  ;;  %v616_v44 = vmul.f32 %v583_v55, %v5469_v36  ;;  %v2560_v40 = vand.u32 2139095040, %v5533_v14  ;;  %v5666_v36 = vpop.permute.xlu1 %622 }
 0x129   : > { %10069 = vst [vmem:[#allocation43_spill] sm:$0xff] %v5644_v5  ;;  %v1321_v45 = vsel %vm1320_vm2, %v1319_v60, 0  ;;  %v2457_v17 = vshrl.u32 %v2456_v27, 23  ;;  %v5652_v57 = vadd.f32 %v647_v51, %v613_v16  ;;  %v5654_v58 = vadd.f32 %v647_v51, %v614_v43 }
 0x12a   : > { %10070 = vst [vmem:[#allocation44_spill] sm:$0xff] %v5648_v13  ;;  %v5656_v39 = vshrl.u32 %v1113_v33, 5  ;;  %v2664_v38 = vand.u32 2139095040, %v5535_v6  ;;  %v5659_v28 = vadd.f32 %v647_v51, %v615_v35  ;;  %v5661_v25 = vadd.f32 %v647_v51, %v616_v44 }
 0x12b   : > { %10071 = vst [vmem:[#allocation45_spill] sm:$0xff] %v5652_v57  ;;  %10072 = vst [vmem:[#allocation46_spill] sm:$0xff] %v5654_v58  ;;  %v5664_v59 = vsub.s32 32, %v5644_v5  ;;  %v2359_v55 = vadd.s32 1, %v4441_v0  ;;  %v5669_v60 = vsub.s32 32, %v5648_v13  ;;  %v5671_v27 = vand.u32 31, %v1321_v45 }
 0x12c   : > { %10073 = vst [vmem:[#allocation47_spill] sm:$0xff] %v5656_v39  ;;  %10074 = vst [vmem:[#allocation48_spill] sm:$0xff] %v5659_v28  ;;  %v2561_v43 = vshrl.u32 %v2560_v40, 23  ;;  %v9807_v33 = vmov 2102212464   ;;  %v5675_v35 = vshrl.u32 %v1217_v1, 5  ;;  %v5683_v54 = vadd.f32 %v5666_v36, %v5567_v49 }
 0x12d   : > { %10075 = vst [vmem:[#allocation49_spill] sm:$0xff] %v5661_v25  ;;  %10076 = vst [vmem:[#allocation50_spill] sm:$0xff] %v5664_v59  ;;  %v1127_v16 = vshll.u32 %v9807_v33, %v5644_v5  ;;  %v1425_v44 = vsel %vm1424_vm3, %v1423_v61, 0  ;;  %v4445_v51 = vadd.s32 4294967169, %v2457_v17  ;;  %v9816_v6 = vmov 920167782  }
 0x12e   : > { %10077 = vst [vmem:[#allocation51_spill] sm:$0xff] %v5669_v60  ;;  %10078 = vst [vmem:[#allocation52_spill] sm:$0xff] %v5671_v27  ;;  %v1130_v0 = vshll.u32 %v9816_v6, %v5644_v5  ;;  %vm9984_vm4 = vcmp.lt.s32.totalorder %v5656_v39, 4  ;;  %v2665_v14 = vshrl.u32 %v2664_v38, 23  ;;  %v1128_v40 = vshrl.u32 %v9816_v6, %v5664_v59 }
 0x12f   : > { %10079 = vst [vmem:[#allocation53_spill] sm:$0xff] %v5675_v35  ;;  %v9822_v33 = vmov 1326507024   ;;  %v10080_v17 = vmov 2102212464   ;;  %vm2360_vm5 = vcmp.gt.s32.totalorder %v2359_v55, 0  ;;  %v1232_v5 = vshrl.u32 %v9816_v6, %v5669_v60 }
 0x130   : > { %v1131_v1 = vshrl.u32 %v9822_v33, %v5664_v59  ;;  %v1231_v61 = vshll.u32 %v10080_v17, %v5648_v13  ;;  %v1234_v38 = vshll.u32 %v9816_v6, %v5648_v13  ;;  %v5696_v49 = vsub.s32 32, %v5671_v27 }
 0x131   : > { %v4449_v63 = vadd.s32 4294967169, %v2561_v43  ;;  %v1235_v20 = vshrl.u32 %v9822_v33, %v5669_v60  ;;  %vm9975_vm6 = vcmp.lt.s32.totalorder %v5675_v35, 4  ;;  %v5701_v59 = vand.u32 31, %v1425_v44 }
 0x132   : > { %10081 = vst [vmem:[#allocation54_spill] sm:$0xff] %v5696_v49  ;;  %v2463_v53 = vadd.s32 1, %v4445_v51  ;;  %v2361_v3 = vsel %vm2360_vm5, %v2359_v55, 0  ;;  %v4453_v30 = vadd.s32 4294967169, %v2665_v14  ;;  %v5705_v23 = vadd.f32 %v5666_v36, %v5571_v50 }
 0x133   : > { %10082 = vst [vmem:[#allocation55_spill] sm:$0xff] %v5701_v59  ;;  %v688_v6 = vand.u32 2139095040, %v5683_v54  ;;  %v5708_v13 = vor.u32 %v1128_v40, %v1127_v16  ;;  %v1132_v32 = vor.u32 %v1131_v1, %v1130_v0  ;;  %v5710_v43 = vshrl.u32 %v1321_v45, 5 }
 0x134   : > { %v5712_v4 = vshrl.u32 %v1425_v44, 5  ;;  %v5714_v33 = vor.u32 %v1232_v5, %v1231_v61  ;;  %v1335_v51 = vshll.u32 %v10080_v17, %v5671_v27  ;;  %v10087_v14 = vmov 920167782  }
 0x135   : > { %10083 = vst [vmem:[#allocation56_spill] sm:$0xff] %v5708_v13  ;;  %10084 = vst [vmem:[#allocation57_spill] sm:$0xff] %v5710_v43  ;;  %v1336_v55 = vshrl.u32 %v10087_v14, %v5696_v49  ;;  %v2567_v60 = vadd.s32 1, %v4449_v63  ;;  %v1236_v50 = vor.u32 %v1235_v20, %v1234_v38  ;;  %v5721_v56 = vsub.s32 32, %v5701_v59 }
 0x136   : > { %10085 = vst [vmem:[#allocation58_spill] sm:$0xff] %v5712_v4  ;;  %10086 = vst [vmem:[#allocation59_spill] sm:$0xff] %v5714_v33  ;;  %v5723_v16 = vand.u32 31, %v2361_v3  ;;  %vm2464_vm7 = vcmp.gt.s32.totalorder %v2463_v53, 0  ;;  %v1338_v45 = vshll.u32 %v10087_v14, %v5671_v27  ;;  %v2671_v44 = vadd.s32 1, %v4453_v30 }
 0x137   : > { %10088 = vst [vmem:[#allocation60_spill] sm:$0xff] %v5721_v56  ;;  %v689_v5 = vshrl.u32 %v688_v6, 23  ;;  %v792_v0 = vand.u32 2139095040, %v5705_v23  ;;  %v5731_v40 = vsel %vm9984_vm4, %v5708_v13, 920167782  ;;  %vm9959_vm8 = vcmp.lt.s32.totalorder %v5710_v43, 4 }
 0x138   : > { %10089 = vst [vmem:[#allocation61_spill] sm:$0xff] %v5723_v16  ;;  %10090 = vst [vmem:[#allocation62_spill] sm:$0xff] %v5731_v40  ;;  %v5735_v20 = vsel %vm9984_vm4, %v1132_v32, 1326507024  ;;  %v10092_v63 = vmov 1326507024   ;;  %v5740_v61 = vor.u32 %v1336_v55, %v1335_v51  ;;  %v5744_v6 = vadd.f32 %v5666_v36, %v5576_v10 }
 0x139   : > { %10091 = vst [vmem:[#allocation63_spill] sm:$0xff] %v5735_v20  ;;  %v1339_v1 = vshrl.u32 %v10092_v63, %v5696_v49  ;;  %v2465_v30 = vsel %vm2464_vm7, %v2463_v53, 0  ;;  %vm2568_vm9 = vcmp.gt.s32.totalorder %v2567_v60, 0  ;;  %v5749_v38 = vsel %vm9975_vm6, %v5714_v33, 920167782 }
 0x13a   : > { %10093 = vst [vmem:[#allocation64_spill] sm:$0xff] %v5740_v61  ;;  %10094 = vst [vmem:[#allocation65_spill] sm:$0xff] %v5749_v38  ;;  %v1440_v32 = vshrl.u32 %v10087_v14, %v5721_v56  ;;  %v1443_v27 = vshrl.u32 %v10092_v63, %v5721_v56  ;;  %v5756_v51 = vsub.s32 32, %v5723_v16  ;;  %v5760_v53 = vsel %vm9975_vm6, %v1236_v50, 1326507024 }
 0x13b   : > { %10096 = vst [vmem:[#allocation67_spill] sm:$0xff] %v5760_v53  ;;  %vm2672_vm10 = vcmp.gt.s32.totalorder %v2671_v44, 0  ;;  %v4377_v10 = vadd.s32 4294967169, %v689_v5  ;;  %v793_v55 = vshrl.u32 %v792_v0, 23  ;;  %v1439_v49 = vshll.u32 %v10080_v17, %v5701_v59  ;;  %v5775_v5 = vpop.permute.xlu1 %630 }
 0x13c   : > { %10095 = vst [vmem:[#allocation66_spill] sm:$0xff] %v5756_v51  ;;  %v1442_v38 = vshll.u32 %v10087_v14, %v5701_v59  ;;  %v5766_v33 = vand.u32 31, %v2465_v30  ;;  %v2569_v13 = vsel %vm2568_vm9, %v2567_v60, 0  ;;  %v1340_v56 = vor.u32 %v1339_v1, %v1338_v45 }
 0x13d   : > { %v5771_v20 = vsel %vm9959_vm8, %v5740_v61, 920167782  ;;  %vm9958_vm11 = vcmp.lt.s32.totalorder %v5712_v4, 4  ;;  %v896_v50 = vand.u32 2139095040, %v5744_v6  ;;  %v5777_v0 = vor.u32 %v1440_v32, %v1439_v49 }
 0x13e   : > { %10097 = vst [vmem:[#allocation68_spill] sm:$0xff] %v5766_v33  ;;  %10098 = vst [vmem:[#allocation69_spill] sm:$0xff] %v5771_v20  ;;  %v1444_v53 = vor.u32 %v1443_v27, %v1442_v38  ;;  %v2376_v59 = vshrl.u32 %v10087_v14, %v5756_v51  ;;  %v2673_v35 = vsel %vm2672_vm10, %v2671_v44, 0  ;;  %v2379_v60 = vshrl.u32 %v10092_v63, %v5756_v51 }
 0x13f   : > { %10099 = vst [vmem:[#allocation70_spill] sm:$0xff] %v5777_v0  ;;  %v5783_v45 = vand.u32 31, %v2569_v13  ;;  %v695_v1 = vadd.s32 1, %v4377_v10  ;;  %v4381_v20 = vadd.s32 4294967169, %v793_v55  ;;  %v2375_v61 = vshll.u32 %v10080_v17, %v5723_v16  ;;  %v635_v43 = vpop.permute.xlu1 %634 }
 0x140   : > { %v5788_v40 = vsub.s32 32, %v5766_v33  ;;  %v5792_v27 = vadd.f32 %v5666_v36, %v5580_v9  ;;  %v5796_v49 = vadd.f32 %v5775_v5, %v5628_v12  ;;  %v5798_v44 = vshrl.u32 %v2361_v3, 5 }
 0x141   : > { %10100 = vst [vmem:[#allocation71_spill] sm:$0xff] %v5783_v45  ;;  %v2378_v38 = vshll.u32 %v10087_v14, %v5723_v16  ;;  %v5802_v32 = vand.u32 31, %v2673_v35  ;;  %v897_v10 = vshrl.u32 %v896_v50, 23  ;;  %v5806_v55 = vsel %vm9959_vm8, %v1340_v56, 1326507024 }
 0x142   : > { %10101 = vst [vmem:[#allocation72_spill] sm:$0xff] %v5788_v40  ;;  %10102 = vst [vmem:[#allocation73_spill] sm:$0xff] %v5792_v27  ;;  %v5811_v36 = vsel %vm9958_vm11, %v5777_v0, 920167782  ;;  %v5813_v9 = vor.u32 %v2376_v59, %v2375_v61  ;;  %v5815_v12 = vshrl.u32 %v2465_v30, 5  ;;  %v5818_v51 = vsub.s32 32, %v5783_v45 }
 0x143   : > { %10103 = vst [vmem:[#allocation74_spill] sm:$0xff] %v5796_v49  ;;  %10104 = vst [vmem:[#allocation75_spill] sm:$0xff] %v5798_v44  ;;  %v2380_v3 = vor.u32 %v2379_v60, %v2378_v38  ;;  %vm696_vm12 = vcmp.gt.s32.totalorder %v695_v1, 0  ;;  %v799_v16 = vadd.s32 1, %v4381_v20  ;;  %v5822_v50 = vsel %vm9958_vm11, %v1444_v53, 1326507024 }
 0x144   : > { %10105 = vst [vmem:[#allocation76_spill] sm:$0xff] %v5802_v32  ;;  %10106 = vst [vmem:[#allocation77_spill] sm:$0xff] %v5806_v55  ;;  %v2480_v56 = vshrl.u32 %v10087_v14, %v5788_v40  ;;  %v2483_v0 = vshrl.u32 %v10092_v63, %v5788_v40  ;;  %v1000_v59 = vand.u32 2139095040, %v5792_v27  ;;  %vm9953_vm13 = vcmp.lt.s32.totalorder %v5798_v44, 4 }
 0x145   : > { %10107 = vst [vmem:[#allocation78_spill] sm:$0xff] %v5811_v36  ;;  %10108 = vst [vmem:[#allocation79_spill] sm:$0xff] %v5813_v9  ;;  %v2479_v61 = vshll.u32 %v10080_v17, %v5766_v33  ;;  %v5833_v30 = vsub.s32 32, %v5802_v32  ;;  %v4385_v20 = vadd.s32 4294967169, %v897_v10  ;;  %v5838_v53 = vsel %vm9953_vm13, %v5813_v9, 920167782 }
 0x146   : > { %10109 = vst [vmem:[#allocation80_spill] sm:$0xff] %v5815_v12  ;;  %10110 = vst [vmem:[#allocation81_spill] sm:$0xff] %v5818_v51  ;;  %v2482_v60 = vshll.u32 %v10087_v14, %v5766_v33  ;;  %vm9952_vm14 = vcmp.lt.s32.totalorder %v5815_v12, 4  ;;  %v697_v38 = vsel %vm696_vm12, %v695_v1, 0  ;;  %v5845_v40 = vsel %vm9953_vm13, %v2380_v3, 1326507024 }
 0x147   : > { %10111 = vst [vmem:[#allocation82_spill] sm:$0xff] %v5822_v50  ;;  %10112 = vst [vmem:[#allocation83_spill] sm:$0xff] %v5833_v30  ;;  %v5847_v50 = vshrl.u32 %v2569_v13, 5  ;;  %v2584_v10 = vshrl.u32 %v10087_v14, %v5818_v51  ;;  %vm800_vm15 = vcmp.gt.s32.totalorder %v799_v16, 0  ;;  %v5851_v36 = vor.u32 %v2480_v56, %v2479_v61 }
 0x148   : > { %10113 = vst [vmem:[#allocation84_spill] sm:$0xff] %v5838_v53  ;;  %10114 = vst [vmem:[#allocation85_spill] sm:$0xff] %v5845_v40  ;;  %v2484_v9 = vor.u32 %v2483_v0, %v2482_v60  ;;  %v2587_v53 = vshrl.u32 %v10092_v63, %v5818_v51  ;;  %v1001_v33 = vshrl.u32 %v1000_v59, 23  ;;  %v2583_v1 = vshll.u32 %v10080_v17, %v5783_v45 }
 0x149   : > { %10115 = vst [vmem:[#allocation86_spill] sm:$0xff] %v5847_v50  ;;  %10116 = vst [vmem:[#allocation87_spill] sm:$0xff] %v5851_v36  ;;  %v2688_v3 = vshrl.u32 %v10087_v14, %v5833_v30  ;;  %v5859_v40 = vand.u32 31, %v697_v38  ;;  %v903_v13 = vadd.s32 1, %v4385_v20  ;;  %v2586_v44 = vshll.u32 %v10087_v14, %v5783_v45 }
 0x14a   : > { %v2691_v56 = vshrl.u32 %v10092_v63, %v5833_v30  ;;  %v801_v0 = vsel %vm800_vm15, %v799_v16, 0  ;;  %v3184_v61 = vand.u32 2139095040, %v5652_v57  ;;  %v5866_v60 = vor.u32 %v2584_v10, %v2583_v1 }
 0x14b   : > { %vm9927_vm0 = vcmp.lt.s32.totalorder %v5847_v50, 4  ;;  %v5869_v59 = vshrl.u32 %v2673_v35, 5  ;;  %v2687_v51 = vshll.u32 %v10080_v17, %v5802_v32  ;;  %v2588_v4 = vor.u32 %v2587_v53, %v2586_v44 }
 0x14c   : > { %10117 = vst [vmem:[#allocation88_spill] sm:$0xff] %v5866_v60  ;;  %v2690_v20 = vshll.u32 %v10087_v14, %v5802_v32  ;;  %v4389_v45 = vadd.s32 4294967169, %v1001_v33  ;;  %v5877_v30 = vadd.f32 %v5775_v5, %v5616_v52  ;;  %v5882_v10 = vsub.s32 32, %v5859_v40 }
 0x14d   : > { %10118 = vst [vmem:[#allocation89_spill] sm:$0xff] %v5869_v59  ;;  %v5879_v16 = vor.u32 %v2688_v3, %v2687_v51  ;;  %v5884_v1 = vand.u32 31, %v801_v0  ;;  %vm904_vm1 = vcmp.gt.s32.totalorder %v903_v13, 0  ;;  %v5889_v35 = vsel %vm9952_vm14, %v5851_v36, 920167782 }
 0x14e   : > { %10119 = vst [vmem:[#allocation90_spill] sm:$0xff] %v5877_v30  ;;  %10121 = vst [vmem:[#allocation92_spill] sm:$0xff] %v5889_v35  ;;  %v2692_v44 = vor.u32 %v2691_v56, %v2690_v20  ;;  %v3185_v53 = vshrl.u32 %v3184_v61, 23  ;;  %v5893_v33 = vadd.f32 %v5775_v5, %v5620_v26  ;;  %v5897_v52 = vmul.f32 %v5509_v15, %v5505_v62 }
 0x14f   : > { %10120 = vst [vmem:[#allocation91_spill] sm:$0xff] %v5879_v16  ;;  %v5901_v51 = vsel %vm9952_vm14, %v2484_v9, 1326507024  ;;  %v5906_v3 = vsel %vm9927_vm0, %v5866_v60, 920167782  ;;  %vm9926_vm2 = vcmp.lt.s32.totalorder %v5869_v59, 4  ;;  %v712_v62 = vshrl.u32 %v10087_v14, %v5882_v10 }
 0x150   : > { %10122 = vst [vmem:[#allocation93_spill] sm:$0xff] %v5893_v33  ;;  %10123 = vst [vmem:[#allocation94_spill] sm:$0xff] %v5897_v52  ;;  %v5911_v56 = vsel %vm9927_vm0, %v2588_v4, 1326507024  ;;  %v905_v26 = vsel %vm904_vm1, %v903_v13, 0  ;;  %v1007_v61 = vadd.s32 1, %v4389_v45  ;;  %v5932_v13 = vadd.f32 %v5775_v5, %v5624_v41 }
 0x151   : > { %10124 = vst [vmem:[#allocation95_spill] sm:$0xff] %v5901_v51  ;;  %10125 = vst [vmem:[#allocation96_spill] sm:$0xff] %v5906_v3  ;;  %v1520_v15 = vand.u32 2139095040, %v5877_v30  ;;  %v5917_v9 = vsel %vm9926_vm2, %v5879_v16, 920167782  ;;  %v5919_v20 = vshrl.u32 %v697_v38, 5  ;;  %v711_v38 = vshll.u32 %v10080_v17, %v5859_v40 }
 0x152   : > { %10126 = vst [vmem:[#allocation97_spill] sm:$0xff] %v5911_v56  ;;  %10127 = vst [vmem:[#allocation98_spill] sm:$0xff] %v5917_v9  ;;  %v5924_v57 = vsub.s32 32, %v5884_v1  ;;  %v5928_v4 = vsel %vm9926_vm2, %v2692_v44, 1326507024  ;;  %v4473_v45 = vadd.s32 4294967169, %v3185_v53  ;;  %v715_v9 = vshrl.u32 %v10092_v63, %v5882_v10 }
 0x153   : > { %10128 = vst [vmem:[#allocation99_spill] sm:$0xff] %v5928_v4  ;;  %10129 = vst [vmem:[#allocation100_spill] sm:$0xff] %v5932_v13  ;;  %v1624_v16 = vand.u32 2139095040, %v5893_v33  ;;  %v5939_v32 = vand.u32 31, %v905_v26  ;;  %v3288_v60 = vand.u32 2139095040, %v5654_v58  ;;  %v5942_v59 = vshrl.u32 %v801_v0, 5 }
 0x154   : > { %vm1008_vm3 = vcmp.gt.s32.totalorder %v1007_v61, 0  ;;  %v3392_v44 = vand.u32 2139095040, %v5659_v28  ;;  %v1521_v53 = vshrl.u32 %v1520_v15, 23  ;;  %v5945_v41 = vor.u32 %v712_v62, %v711_v38 }
 0x155   : > { %10130 = vst [vmem:[#allocation101_spill] sm:$0xff] %v5939_v32  ;;  %v714_v5 = vshll.u32 %v10087_v14, %v5859_v40  ;;  %vm720_vm5 = vcmp.lt.s32.totalorder %v5919_v20, 4  ;;  %v816_v4 = vshrl.u32 %v10087_v14, %v5924_v57  ;;  %v819_v56 = vshrl.u32 %v10092_v63, %v5924_v57 }
 0x156   : > { %v3191_v58 = vadd.s32 1, %v4473_v45  ;;  %v1625_v0 = vshrl.u32 %v1624_v16, 23  ;;  %v1728_v3 = vand.u32 2139095040, %v5932_v13  ;;  %v815_v62 = vshll.u32 %v10080_v17, %v5884_v1 }
 0x157   : > { %v716_v50 = vor.u32 %v715_v9, %v714_v5  ;;  %v5958_v15 = vsub.s32 32, %v5939_v32  ;;  %v1009_v38 = vsel %vm1008_vm3, %v1007_v61, 0  ;;  %v818_v28 = vshll.u32 %v10087_v14, %v5884_v1 }
 0x158   : > { %vm824_vm7 = vcmp.lt.s32.totalorder %v5942_v59, 4  ;;  %v3289_v35 = vshrl.u32 %v3288_v60, 23  ;;  %v4409_v36 = vadd.s32 4294967169, %v1521_v53  ;;  %v5966_v16 = vsel %vm720_vm5, %v5945_v41, 920167782 }
 0x159   : > { %v5968_v9 = vor.u32 %v816_v4, %v815_v62  ;;  %v5970_v45 = vshrl.u32 %v905_v26, 5  ;;  %v1832_v5 = vand.u32 2139095040, %v5796_v49  ;;  %v820_v51 = vor.u32 %v819_v56, %v818_v28 }
 0x15a   : > { %v5973_v61 = vand.u32 31, %v1009_v38  ;;  %v4413_v12 = vadd.s32 4294967169, %v1625_v0  ;;  %v1729_v55 = vshrl.u32 %v1728_v3, 23  ;;  %v5977_v60 = vsel %vm720_vm5, %v716_v50, 1326507024 }
 0x15b   : > { %v919_v53 = vshll.u32 %v10080_v17, %v5939_v32  ;;  %v920_v4 = vshrl.u32 %v10087_v14, %v5958_v15  ;;  %vm3192_vm9 = vcmp.gt.s32.totalorder %v3191_v58, 0  ;;  %v923_v26 = vshrl.u32 %v10092_v63, %v5958_v15 }
 0x15c   : > { %10131 = vst [vmem:[#allocation102_spill] sm:$0xff] %v5973_v61  ;;  %v4477_v62 = vadd.s32 4294967169, %v3289_v35  ;;  %v3393_v28 = vshrl.u32 %v3392_v44, 23  ;;  %v1527_v56 = vadd.s32 1, %v4409_v36  ;;  %v5988_v3 = vsel %vm824_vm7, %v5968_v9, 920167782 }
 0x15d   : > { %v922_v50 = vshll.u32 %v10087_v14, %v5939_v32  ;;  %v5992_v0 = vshrl.u32 %v1009_v38, 5  ;;  %v1833_v39 = vshrl.u32 %v1832_v5, 23  ;;  %v5996_v49 = vsel %vm824_vm7, %v820_v51, 1326507024 }
 0x15e   : > { %vm928_vm10 = vcmp.lt.s32.totalorder %v5970_v45, 4  ;;  %v6000_v36 = vsub.s32 32, %v5973_v61  ;;  %v1631_v35 = vadd.s32 1, %v4413_v12  ;;  %v4417_v44 = vadd.s32 4294967169, %v1729_v55 }
 0x15f   : > { %v6002_v13 = vor.u32 %v920_v4, %v919_v53  ;;  %v3193_v33 = vsel %vm3192_vm9, %v3191_v58, 0  ;;  %v3496_v30 = vand.u32 2139095040, %v5661_v25  ;;  %v6007_v38 = vadd.f32 %v635_v43, %v5584_v11 }
 0x160   : > { %10132 = vst [vmem:[#allocation103_spill] sm:$0xff] %v6000_v36  ;;  %v924_v5 = vor.u32 %v923_v26, %v922_v50  ;;  %v3295_v27 = vadd.s32 1, %v4477_v62  ;;  %v4481_v51 = vadd.s32 4294967169, %v3393_v28  ;;  %vm1528_vm12 = vcmp.gt.s32.totalorder %v1527_v56, 0 }
 0x161   : > { %10133 = vst [vmem:[#allocation104_spill] sm:$0xff] %v6007_v38  ;;  %v1023_v52 = vshll.u32 %v10080_v17, %v5973_v61  ;;  %v1026_v12 = vshll.u32 %v10087_v14, %v5973_v61  ;;  %v4421_v55 = vadd.s32 4294967169, %v1833_v39  ;;  %v6014_v53 = vadd.f32 %v635_v43, %v5588_v42 }
 0x162   : > { %v1024_v58 = vshrl.u32 %v10087_v14, %v6000_v36  ;;  %v1027_v11 = vshrl.u32 %v10092_v63, %v6000_v36  ;;  %vm1632_vm15 = vcmp.gt.s32.totalorder %v1631_v35, 0  ;;  %v1735_v4 = vadd.s32 1, %v4417_v44 }
 0x163   : > { %10134 = vst [vmem:[#allocation105_spill] sm:$0xff] %v6014_v53  ;;  %vm1032_vm1 = vcmp.lt.s32.totalorder %v5992_v0, 4  ;;  %v3497_v26 = vshrl.u32 %v3496_v30, 23  ;;  %v1529_v62 = vsel %vm1528_vm12, %v1527_v56, 0  ;;  %v1936_v28 = vand.u32 2139095040, %v6007_v38 }
 0x164   : > { %v6022_v50 = vshrl.u32 %v3193_v33, 5  ;;  %vm3296_vm3 = vcmp.gt.s32.totalorder %v3295_v27, 0  ;;  %v3399_v39 = vadd.s32 1, %v4481_v51  ;;  %v6025_v42 = vadd.f32 %v635_v43, %v5592_v34 }
 0x165   : > { %v1633_v25 = vsel %vm1632_vm15, %v1631_v35, 0  ;;  %v1839_v61 = vadd.s32 1, %v4421_v55  ;;  %v6028_v32 = vadd.f32 %v635_v43, %v5596_v18  ;;  %v2040_v44 = vand.u32 2139095040, %v6014_v53 }
 0x166   : > { %10135 = vst [vmem:[#allocation106_spill] sm:$0xff] %v6022_v50  ;;  %10136 = vst [vmem:[#allocation107_spill] sm:$0xff] %v6025_v42  ;;  %v6031_v36 = vor.u32 %v1024_v58, %v1023_v52  ;;  %v1028_v30 = vor.u32 %v1027_v11, %v1026_v12  ;;  %v6033_v56 = vand.u32 31, %v1529_v62  ;;  %vm1736_vm9 = vcmp.gt.s32.totalorder %v1735_v4, 0 }
 0x167   : > { %10137 = vst [vmem:[#allocation108_spill] sm:$0xff] %v6028_v32  ;;  %v6038_v51 = vsel %vm928_vm10, %v6002_v13, 920167782  ;;  %v6042_v34 = vsel %vm928_vm10, %v924_v5, 1326507024  ;;  %v4485_v35 = vadd.s32 4294967169, %v3497_v26 }
 0x168   : > { %10138 = vst [vmem:[#allocation109_spill] sm:$0xff] %v6031_v36  ;;  %10139 = vst [vmem:[#allocation110_spill] sm:$0xff] %v6033_v56  ;;  %v1937_v18 = vshrl.u32 %v1936_v28, 23  ;;  %v6044_v43 = vsel %vm3296_vm3, %v3295_v27, 0  ;;  %vm3400_vm12 = vcmp.gt.s32.totalorder %v3399_v39, 0  ;;  %v6046_v52 = vand.u32 31, %v1633_v25  ;;  %v4015_v28 = vpop.permute.xlu0 %4014 }
 0x169   : > { %10140 = vst [vmem:[#allocation111_spill] sm:$0xff] %v6044_v43  ;;  %v2144_v12 = vand.u32 2139095040, %v6025_v42  ;;  %v1737_v55 = vsel %vm1736_vm9, %v1735_v4, 0  ;;  %vm1840_vm15 = vcmp.gt.s32.totalorder %v1839_v61, 0  ;;  %v2041_v58 = vshrl.u32 %v2040_v44, 23 }
 0x16a   : > { %10141 = vst [vmem:[#allocation112_spill] sm:$0xff] %v6046_v52  ;;  %v2248_v11 = vand.u32 2139095040, %v6028_v32  ;;  %v6053_v50 = vsel %vm1032_vm1, %v6031_v36, 920167782  ;;  %v6057_v5 = vsel %vm1032_vm1, %v1028_v30, 1326507024  ;;  %v6080_v36 = vmul.f32 %v4015_v28, %v5561_v2 }
 0x16b   : > { %v6059_v27 = vand.u32 31, %v3193_v33  ;;  %v6062_v26 = vsub.s32 32, %v6033_v56  ;;  %v6065_v4 = vand.u32 31, %v6044_v43  ;;  %v6067_v44 = vsel %vm3400_vm12, %v3399_v39, 0 }
 0x16c   : > { %10144 = vst [vmem:[#allocation115_spill] sm:$0xff] %v6067_v44  ;;  %v6069_v32 = vadd.s32 1, %v4485_v35  ;;  %v4425_v42 = vadd.s32 4294967169, %v1937_v18  ;;  %v6072_v53 = vsub.s32 32, %v6046_v52  ;;  %v6074_v38 = vand.u32 31, %v1737_v55  ;;  %10149 = vst [vmem:[#allocation120_spill] sm:$0xff] %v6080_v36 }
 0x16d   : > { %10142 = vst [vmem:[#allocation113_spill] sm:$0xff] %v6059_v27  ;;  %10143 = vst [vmem:[#allocation114_spill] sm:$0xff] %v6065_v4  ;;  %v1841_v30 = vsel %vm1840_vm15, %v1839_v61, 0  ;;  %v2145_v33 = vshrl.u32 %v2144_v12, 23  ;;  %v6077_v27 = vmul.f32 %v4015_v28, %v5559_v46  ;;  %v4429_v43 = vadd.s32 4294967169, %v2041_v58 }
 0x16e   : > { %10145 = vst [vmem:[#allocation116_spill] sm:$0xff] %v6069_v32  ;;  %10146 = vst [vmem:[#allocation117_spill] sm:$0xff] %v6072_v53  ;;  %v2249_v4 = vshrl.u32 %v2248_v11, 23  ;;  %v6082_v39 = vshrl.u32 %v1529_v62, 5  ;;  %v1544_v35 = vshrl.u32 %v10087_v14, %v6062_v26  ;;  %v6087_v18 = vmul.f32 %v4015_v28, %v5563_v29 }
 0x16f   : > { %10147 = vst [vmem:[#allocation118_spill] sm:$0xff] %v6074_v38  ;;  %10148 = vst [vmem:[#allocation119_spill] sm:$0xff] %v6077_v27  ;;  %v6090_v44 = vmul.f32 %v4015_v28, %v5401_v7  ;;  %v1543_v46 = vshll.u32 %v10080_v17, %v6033_v56  ;;  %v6094_v61 = vshrl.u32 %v1633_v25, 5  ;;  %v6096_v2 = vand.u32 31, %v1841_v30 }
 0x170   : > { %10150 = vst [vmem:[#allocation121_spill] sm:$0xff] %v6087_v18  ;;  %v1943_v12 = vadd.s32 1, %v4425_v42  ;;  %v1547_v62 = vshrl.u32 %v10092_v63, %v6062_v26  ;;  %v1648_v58 = vshrl.u32 %v10087_v14, %v6072_v53  ;;  %v6103_v29 = vsub.s32 32, %v6074_v38 }
 0x171   : > { %10151 = vst [vmem:[#allocation122_spill] sm:$0xff] %v6090_v44  ;;  %10152 = vst [vmem:[#allocation123_spill] sm:$0xff] %v6096_v2  ;;  %v4433_v11 = vadd.s32 4294967169, %v2145_v33  ;;  %v1546_v7 = vshll.u32 %v10087_v14, %v6033_v56  ;;  %v1651_v25 = vshrl.u32 %v10092_v63, %v6072_v53  ;;  %v2047_v28 = vadd.s32 1, %v4429_v43  ;;  %v643_v43 = vpop.permute.xlu1 %642 }
 0x172   : > { %10153 = vst [vmem:[#allocation124_spill] sm:$0xff] %v6103_v29  ;;  %v4437_v32 = vadd.s32 4294967169, %v2249_v4  ;;  %v6109_v44 = vor.u32 %v1544_v35, %v1543_v46  ;;  %vm1552_vm3 = vcmp.lt.s32.totalorder %v6082_v39, 4  ;;  %v1647_v42 = vshll.u32 %v10080_v17, %v6046_v52 }
 0x173   : > { %v1650_v18 = vshll.u32 %v10087_v14, %v6046_v52  ;;  %vm1656_vm9 = vcmp.lt.s32.totalorder %v6094_v61, 4  ;;  %v6117_v33 = vshrl.u32 %v1737_v55, 5  ;;  %v6120_v36 = vsub.s32 32, %v6096_v2 }
 0x174   : > { %10154 = vst [vmem:[#allocation125_spill] sm:$0xff] %v6109_v44  ;;  %vm1944_vm12 = vcmp.gt.s32.totalorder %v1943_v12, 0  ;;  %v1548_v4 = vor.u32 %v1547_v62, %v1546_v7  ;;  %v6122_v35 = vor.u32 %v1648_v58, %v1647_v42  ;;  %v1752_v46 = vshrl.u32 %v10087_v14, %v6103_v29 }
 0x175   : > { %10155 = vst [vmem:[#allocation126_spill] sm:$0xff] %v6120_v36  ;;  %v2151_v53 = vadd.s32 1, %v4433_v11  ;;  %v1652_v27 = vor.u32 %v1651_v25, %v1650_v18  ;;  %v1755_v52 = vshrl.u32 %v10092_v63, %v6103_v29  ;;  %vm2048_vm15 = vcmp.gt.s32.totalorder %v2047_v28, 0 }
 0x176   : > { %v2255_v56 = vadd.s32 1, %v4437_v32  ;;  %v6131_v55 = vsel %vm1552_vm3, %v6109_v44, 920167782  ;;  %v1751_v62 = vshll.u32 %v10080_v17, %v6074_v38  ;;  %v1945_v58 = vsel %vm1944_vm12, %v1943_v12, 0 }
 0x177   : > { %10156 = vst [vmem:[#allocation127_spill] sm:$0xff] %v6131_v55  ;;  %v6136_v7 = vadd.f32 %v643_v43, %v5600_v19  ;;  %v1754_v18 = vshll.u32 %v10087_v14, %v6074_v38  ;;  %v6140_v11 = vshrl.u32 %v1841_v30, 5  ;;  %v1856_v32 = vshrl.u32 %v10087_v14, %v6120_v36 }
 0x178   : > { %v6145_v25 = vadd.f32 %v643_v43, %v5604_v21  ;;  %v6147_v42 = vor.u32 %v1752_v46, %v1751_v62  ;;  %v1859_v29 = vshrl.u32 %v10092_v63, %v6120_v36  ;;  %v2049_v12 = vsel %vm2048_vm15, %v2047_v28, 0 }
 0x179   : > { %10157 = vst [vmem:[#allocation128_spill] sm:$0xff] %v6136_v7  ;;  %10158 = vst [vmem:[#allocation129_spill] sm:$0xff] %v6140_v11  ;;  %vm2152_vm12 = vcmp.gt.s32.totalorder %v2151_v53, 0  ;;  %v1756_v19 = vor.u32 %v1755_v52, %v1754_v18  ;;  %v1855_v44 = vshll.u32 %v10080_v17, %v6096_v2  ;;  %v6153_v38 = vand.u32 31, %v1945_v58  ;;  %v4027_v18 = vpop.permute.xlu0 %4026 }
 0x17a   : > { %10159 = vst [vmem:[#allocation130_spill] sm:$0xff] %v6145_v25  ;;  %10160 = vst [vmem:[#allocation131_spill] sm:$0xff] %v6147_v42  ;;  %vm2256_vm2 = vcmp.gt.s32.totalorder %v2255_v56, 0  ;;  %v6157_v30 = vsel %vm1552_vm3, %v1548_v4, 1326507024  ;;  %vm1760_vm0 = vcmp.lt.s32.totalorder %v6117_v33, 4  ;;  %v1858_v21 = vshll.u32 %v10087_v14, %v6096_v2 }
 0x17b   : > { %10161 = vst [vmem:[#allocation132_spill] sm:$0xff] %v6153_v38  ;;  %10162 = vst [vmem:[#allocation133_spill] sm:$0xff] %v6157_v30  ;;  %v2768_v46 = vand.u32 2139095040, %v6136_v7  ;;  %v6163_v28 = vor.u32 %v1856_v32, %v1855_v44  ;;  %v6165_v52 = vand.u32 31, %v2049_v12  ;;  %v2153_v62 = vsel %vm2152_vm12, %v2151_v53, 0 }
 0x17c   : > { %v2872_v36 = vand.u32 2139095040, %v6145_v25  ;;  %v6171_v4 = vsel %vm1656_vm9, %v6122_v35, 920167782  ;;  %v6175_v30 = vsel %vm1656_vm9, %v1652_v27, 1326507024  ;;  %v1860_v2 = vor.u32 %v1859_v29, %v1858_v21 }
 0x17d   : > { %10163 = vst [vmem:[#allocation134_spill] sm:$0xff] %v6163_v28  ;;  %10164 = vst [vmem:[#allocation135_spill] sm:$0xff] %v6165_v52  ;;  %v2257_v55 = vsel %vm2256_vm2, %v2255_v56, 0  ;;  %v6180_v44 = vsel %vm1760_vm0, %v6147_v42, 920167782  ;;  %vm1864_vm15 = vcmp.lt.s32.totalorder %v6140_v11, 4  ;;  %v6193_v27 = vmul.f32 %v4027_v18, %v5452_v47 }
 0x17e   : > { %10165 = vst [vmem:[#allocation136_spill] sm:$0xff] %v6180_v44  ;;  %v6184_v53 = vsel %vm1760_vm0, %v1756_v19, 1326507024  ;;  %v6188_v32 = vsub.s32 32, %v6153_v38  ;;  %v6190_v25 = vand.u32 31, %v2153_v62  ;;  %v6196_v56 = vmul.f32 %v4027_v18, %v5455_v48 }
 0x17f   : > { %10166 = vst [vmem:[#allocation137_spill] sm:$0xff] %v6184_v53  ;;  %10169 = vst [vmem:[#allocation140_spill] sm:$0xff] %v6193_v27  ;;  %v2769_v29 = vshrl.u32 %v2768_v46, 23  ;;  %v6201_v21 = vsel %vm1864_vm15, %v6163_v28, 920167782  ;;  %v6204_v19 = vsub.s32 32, %v6165_v52  ;;  %v6215_v48 = vmul.f32 %v4027_v18, %v5458_v24 }
 0x180   : > { %10167 = vst [vmem:[#allocation138_spill] sm:$0xff] %v6188_v32  ;;  %10168 = vst [vmem:[#allocation139_spill] sm:$0xff] %v6190_v25  ;;  %v6206_v7 = vand.u32 31, %v2257_v55  ;;  %v2873_v44 = vshrl.u32 %v2872_v36, 23  ;;  %v6210_v42 = vsel %vm1864_vm15, %v1860_v2, 1326507024  ;;  %v6218_v46 = vadd.f32 %v643_v43, %v5608_v22 }
 0x181   : > { %10170 = vst [vmem:[#allocation141_spill] sm:$0xff] %v6196_v56  ;;  %10171 = vst [vmem:[#allocation142_spill] sm:$0xff] %v6201_v21  ;;  %v6212_v47 = vshrl.u32 %v1945_v58, 5  ;;  %v1960_v56 = vshrl.u32 %v10087_v14, %v6188_v32  ;;  %v6222_v27 = vshrl.u32 %v2049_v12, 5  ;;  %v6225_v28 = vmul.f32 %v4027_v18, %v5461_v8 }
 0x182   : > { %10172 = vst [vmem:[#allocation143_spill] sm:$0xff] %v6204_v19  ;;  %10173 = vst [vmem:[#allocation144_spill] sm:$0xff] %v6206_v7  ;;  %v6228_v36 = vadd.f32 %v643_v43, %v5612_v37  ;;  %v1959_v2 = vshll.u32 %v10080_v17, %v6153_v38  ;;  %v1963_v24 = vshrl.u32 %v10092_v63, %v6188_v32  ;;  %v6235_v22 = vsub.s32 32, %v6190_v25 }
 0x183   : > { %10174 = vst [vmem:[#allocation145_spill] sm:$0xff] %v6210_v42  ;;  %10175 = vst [vmem:[#allocation146_spill] sm:$0xff] %v6212_v47  ;;  %v4457_v58 = vadd.s32 4294967169, %v2769_v29  ;;  %v1962_v12 = vshll.u32 %v10087_v14, %v6153_v38  ;;  %v2064_v8 = vshrl.u32 %v10087_v14, %v6204_v19  ;;  %v6242_v18 = vsub.s32 32, %v6206_v7 }
 0x184   : > { %10176 = vst [vmem:[#allocation147_spill] sm:$0xff] %v6215_v48  ;;  %10177 = vst [vmem:[#allocation148_spill] sm:$0xff] %v6218_v46  ;;  %v4461_v37 = vadd.s32 4294967169, %v2873_v44  ;;  %vm1968_vm2 = vcmp.lt.s32.totalorder %v6212_v47, 4  ;;  %v2063_v43 = vshll.u32 %v10080_v17, %v6165_v52  ;;  %v2976_v29 = vand.u32 2139095040, %v6218_v46 }
 0x185   : > { %10178 = vst [vmem:[#allocation149_spill] sm:$0xff] %v6222_v27  ;;  %10179 = vst [vmem:[#allocation150_spill] sm:$0xff] %v6225_v28  ;;  %v2067_v28 = vshrl.u32 %v10092_v63, %v6204_v19  ;;  %v6250_v48 = vor.u32 %v1960_v56, %v1959_v2  ;;  %v2066_v38 = vshll.u32 %v10087_v14, %v6165_v52  ;;  %v6254_v32 = vshrl.u32 %v2153_v62, 5 }
 0x186   : > { %10180 = vst [vmem:[#allocation151_spill] sm:$0xff] %v6228_v36  ;;  %10181 = vst [vmem:[#allocation152_spill] sm:$0xff] %v6235_v22  ;;  %v3080_v42 = vand.u32 2139095040, %v6228_v36  ;;  %v1964_v44 = vor.u32 %v1963_v24, %v1962_v12  ;;  %v2168_v21 = vshrl.u32 %v10087_v14, %v6235_v22  ;;  %v2171_v11 = vshrl.u32 %v10092_v63, %v6235_v22 }
 0x187   : > { %10182 = vst [vmem:[#allocation153_spill] sm:$0xff] %v6242_v18  ;;  %10183 = vst [vmem:[#allocation154_spill] sm:$0xff] %v6250_v48  ;;  %v2775_v53 = vadd.s32 1, %v4457_v58  ;;  %v6261_v19 = vor.u32 %v2064_v8, %v2063_v43  ;;  %v2272_v56 = vshrl.u32 %v10087_v14, %v6242_v18  ;;  %v2275_v2 = vshrl.u32 %v10092_v63, %v6242_v18  ;;  %v4035_v18 = vpop.permute.xlu0 %4034 }
 0x188   : > { %10184 = vst [vmem:[#allocation155_spill] sm:$0xff] %v6254_v32  ;;  %v2879_v62 = vadd.s32 1, %v4461_v37  ;;  %v2068_v46 = vor.u32 %v2067_v28, %v2066_v38  ;;  %v2167_v24 = vshll.u32 %v10080_v17, %v6190_v25  ;;  %v2170_v12 = vshll.u32 %v10087_v14, %v6190_v25 }
 0x189   : > { %10185 = vst [vmem:[#allocation156_spill] sm:$0xff] %v6261_v19  ;;  %v2977_v36 = vshrl.u32 %v2976_v29, 23  ;;  %v6271_v52 = vshrl.u32 %v2257_v55, 5  ;;  %v2271_v58 = vshll.u32 %v10080_v17, %v6206_v7  ;;  %v2274_v8 = vshll.u32 %v10087_v14, %v6206_v7 }
 0x18a   : > { %v3081_v43 = vshrl.u32 %v3080_v42, 23  ;;  %vm10001_vm12 = vcmp.lt.s32.totalorder %v6222_v27, 4  ;;  %v6278_v37 = vor.u32 %v2168_v21, %v2167_v24  ;;  %v2172_v38 = vor.u32 %v2171_v11, %v2170_v12  ;;  %v6302_v24 = vpop.permute.xlu1 %650 }
 0x18b   : > { %10186 = vst [vmem:[#allocation157_spill] sm:$0xff] %v6271_v52  ;;  %vm2776_vm14 = vcmp.gt.s32.totalorder %v2775_v53, 0  ;;  %v6283_v28 = vsel %vm1968_vm2, %v6250_v48, 920167782  ;;  %v6285_v55 = vor.u32 %v2272_v56, %v2271_v58  ;;  %v2276_v29 = vor.u32 %v2275_v2, %v2274_v8  ;;  %v10198_v8 = vld [vmem:[#allocation25_spill] sm:$0xff] }
 0x18c   : > { %10187 = vst [vmem:[#allocation158_spill] sm:$0xff] %v6278_v37  ;;  %10188 = vst [vmem:[#allocation159_spill] sm:$0xff] %v6283_v28  ;;  %vm2880_vm13 = vcmp.gt.s32.totalorder %v2879_v62, 0  ;;  %v6289_v7 = vsel %vm1968_vm2, %v1964_v44, 1326507024  ;;  %vm10000_vm11 = vcmp.lt.s32.totalorder %v6254_v32, 4  ;;  %v6314_v58 = vmul.f32 %v4035_v18, %v5478_v31 }
 0x18d   : > { %10189 = vst [vmem:[#allocation160_spill] sm:$0xff] %v6285_v55  ;;  %10190 = vst [vmem:[#allocation161_spill] sm:$0xff] %v6289_v7  ;;  %v6294_v42 = vsel %vm10001_vm12, %v6261_v19, 920167782  ;;  %v4465_v11 = vadd.s32 4294967169, %v2977_v36  ;;  %vm9999_vm8 = vcmp.lt.s32.totalorder %v6271_v52, 4  ;;  %v917_v48 = vshrl.u32 %v10080_v17, %v5958_v15 }
 0x18e   : > { %10191 = vst [vmem:[#allocation162_spill] sm:$0xff] %v6294_v42  ;;  %v6299_v21 = vsel %vm10001_vm12, %v2068_v46, 1326507024  ;;  %v2777_v56 = vsel %vm2776_vm14, %v2775_v53, 0  ;;  %v4469_v2 = vadd.s32 4294967169, %v3081_v43  ;;  %v2881_v36 = vsel %vm2880_vm13, %v2879_v62, 0 }
 0x18f   : > { %10192 = vst [vmem:[#allocation163_spill] sm:$0xff] %v6299_v21  ;;  %v6307_v44 = vsel %vm10000_vm11, %v6278_v37, 920167782  ;;  %v6311_v12 = vsel %vm10000_vm11, %v2172_v38, 1326507024  ;;  %10195 = vst [vmem:[#allocation166_spill] sm:$0xff] %v6314_v58  ;;  %v6326_v43 = vmul.f32 %v4035_v18, %v10198_v8 }
 0x190   : > { %10193 = vst [vmem:[#allocation164_spill] sm:$0xff] %v6307_v44  ;;  %10194 = vst [vmem:[#allocation165_spill] sm:$0xff] %v6311_v12  ;;  %v6319_v53 = vsel %vm9999_vm8, %v6285_v55, 920167782  ;;  %v6323_v46 = vsel %vm9999_vm8, %v2276_v29, 1326507024 }
 0x191   : > { %10196 = vst [vmem:[#allocation167_spill] sm:$0xff] %v6319_v53  ;;  %10197 = vst [vmem:[#allocation168_spill] sm:$0xff] %v6323_v46  ;;  %v10200_v44 = vld [vmem:[#allocation26_spill] sm:$0xff]  ;;  %v6331_v38 = vshrl.u32 %v2777_v56, 5  ;;  %v6333_v62 = vadd.s32 1, %v4465_v11  ;;  %v10202_v31 = vld [vmem:[#allocation27_spill] sm:$0xff]  ;;  %v709_v11 = vshrl.u32 %v10080_v17, %v5882_v10 }
 0x192   : > { %10199 = vst [vmem:[#allocation25_spill] sm:$0xff] %v6326_v43  ;;  %v6329_v37 = vmul.f32 %v4035_v18, %v10200_v44  ;;  %v6336_v58 = vmul.f32 %v4035_v18, %v10202_v31  ;;  %v10204_v12 = vld [vmem:[#allocation40_spill] sm:$0xff]  ;;  %v6342_v53 = vand.u32 31, %v2777_v56  ;;  %v6344_v29 = vshrl.u32 %v2881_v36, 5  ;;  %v10208_v44 = vld [vmem:[#allocation41_spill] sm:$0xff]  ;;  %v10210_v46 = vld [vmem:[#allocation42_spill] sm:$0xff] }
 0x193   : > { %v6340_v55 = vadd.f32 %v6302_v24, %v10204_v12  ;;  %v6346_v8 = vand.u32 31, %v2881_v36  ;;  %v6348_v43 = vadd.s32 1, %v4469_v2  ;;  %v9962_v18 = vmov 683565275  }
 0x194   : > { %10201 = vst [vmem:[#allocation26_spill] sm:$0xff] %v6329_v37  ;;  %10203 = vst [vmem:[#allocation27_spill] sm:$0xff] %v6336_v58  ;;  %v6352_v37 = vadd.f32 %v6302_v24, %v10208_v44  ;;  %v702_v31 = vshll.u32 %v9962_v18, %v5859_v40  ;;  %v9970_v12 = vmov 2475754826   ;;  %v9976_v58 = vmov 2131351028  }
 0x195   : > { %10205 = vst [vmem:[#allocation40_spill] sm:$0xff] %v6340_v55  ;;  %10206 = vst [vmem:[#allocation169_spill] sm:$0xff] %v6342_v53  ;;  %v703_v56 = vshrl.u32 %v9970_v12, %v5882_v10  ;;  %v705_v36 = vshll.u32 %v9970_v12, %v5859_v40  ;;  %v706_v2 = vshrl.u32 %v9976_v58, %v5882_v10  ;;  %v10212_v52 = vand.u32 2147483647, %v5683_v54 }
 0x196   : > { %10207 = vst [vmem:[#allocation170_spill] sm:$0xff] %v6346_v8  ;;  %10209 = vst [vmem:[#allocation41_spill] sm:$0xff] %v6352_v37  ;;  %v708_v44 = vshll.u32 %v9976_v58, %v5859_v40  ;;  %v6369_v18 = vadd.f32 %v6302_v24, %v10210_v46  ;;  %v10213_v25 = vmov 683565275   ;;  %vm717_vm13 = vcmp.lt.s32.totalorder %v5919_v20, 1 }
 0x197   : > { %v692_v32 = vand.u32 8388607, %v10212_v52  ;;  %v701_v12 = vshrl.u32 %v10213_v25, %v5882_v10  ;;  %v704_v22 = vor.u32 %v703_v56, %v702_v31  ;;  %v707_v42 = vor.u32 %v706_v2, %v705_v36 }
 0x198   : > { %10211 = vst [vmem:[#allocation42_spill] sm:$0xff] %v6369_v18  ;;  %v710_v19 = vor.u32 %v709_v11, %v708_v44  ;;  %vm719_vm14 = vcmp.lt.s32.totalorder %v5919_v20, 3  ;;  %vm718_vm6 = vcmp.lt.s32.totalorder %v5919_v20, 2  ;;  %v6384_v44 = vsub.s32 32, %v6342_v53 }
 0x199   : > { %v693_v40 = vor.u32 8388608, %v692_v32  ;;  %v721_v58 = vsel %vm717_vm13, %v701_v12, %v704_v22  ;;  %v731_v46 = vsel %vm719_vm14, %v5945_v41, %v5977_v60  ;;  %v725_v18 = vsel %vm717_vm13, %v704_v22, %v707_v42 }
 0x19a   : > { %v722_v52 = vsel %vm720_vm5, %v710_v19, 2102212464  ;;  %v727_v10 = vsel %vm719_vm14, %v710_v19, %v5966_v16  ;;  %v729_v31 = vsel %vm717_vm13, %v707_v42, %v710_v19  ;;  %10214 = vst [vmem:[#allocation171_spill] sm:$0xff] %v6384_v44  ;;  %v6388_v32 = vshll.u32 %v10080_v17, %v6342_v53 }
 0x19b   : > { %v723_v56 = vsel %vm719_vm14, %v707_v42, %v722_v52  ;;  %v728_v11 = vsel %vm718_vm6, %v725_v18, %v727_v10  ;;  %v732_v36 = vsel %vm718_vm6, %v729_v31, %v731_v46  ;;  %v733_v2 = vshll.u32 %v693_v40, 8 }
 0x19c   : > { %v724_v12 = vsel %vm718_vm6, %v721_v58, %v723_v56  ;;  %v9979_v41 = vand.u32 2147483647, %v5705_v23  ;;  %v6400_v19 = vshll.u32 %v10087_v14, %v6342_v53  ;;  %vm2984_vm5 = vcmp.gt.s32.totalorder %v6333_v62, 0 }
 0x19d   : > { %v6391_v20 = vmul.u32.u64.low %v733_v2, %v732_v36  ;;  %v6392_v60 = vmul.u32.u64.high %v733_v2, %v732_v36, %v6391_v20  ;;  %v6394_v22 = vmul.u32.u64.low %v733_v2, %v728_v11  ;;  %v6395_v16 = vmul.u32.u64.high %v733_v2, %v728_v11, %v6394_v22 }
 0x19e   : > { %v796_v42 = vand.u32 8388607, %v9979_v41  ;;  %v806_v58 = vshll.u32 %v10213_v25, %v5884_v1  ;;  %v10215_v18 = vmov 2475754826   ;;  %v805_v46 = vshrl.u32 %v10213_v25, %v5924_v57 }
 0x19f   : > { %v807_v40 = vshrl.u32 %v10215_v18, %v5924_v57  ;;  %v809_v52 = vshll.u32 %v10215_v18, %v5884_v1  ;;  %v10216_v10 = vmov 2131351028   ;;  %v813_v56 = vshrl.u32 %v10080_v17, %v5924_v57 }
 0x1a0   : > { %v810_v31 = vshrl.u32 %v10216_v10, %v5924_v57  ;;  %v740_v11 = vmul.u32 %v733_v2, %v724_v12  ;;  %v797_v36 = vor.u32 8388608, %v796_v42  ;;  %v812_v41 = vshll.u32 %v10216_v10, %v5884_v1 }
 0x1a1   : > { %v808_v20 = vor.u32 %v807_v40, %v806_v58  ;;  %vm742_vm6 = vc.u32 %v6392_v60, %v6394_v22  ;;  %v743_v53 = vadd.s32 1, %v6395_v16  ;;  %vm821_vm13 = vcmp.lt.s32.totalorder %v5942_v59, 1 }
 0x1a2   : > { %v811_v21 = vor.u32 %v810_v31, %v809_v52  ;;  %v814_v27 = vor.u32 %v813_v56, %v812_v41  ;;  %vm822_vm14 = vcmp.lt.s32.totalorder %v5942_v59, 2  ;;  %vm823_vm4 = vcmp.lt.s32.totalorder %v5942_v59, 3  ;;  %v10218_v59 = vld [vmem:[#allocation101_spill] sm:$0xff] }
 0x1a3   : > { %v825_v57 = vsel %vm821_vm13, %v805_v46, %v808_v20  ;;  %v744_v2 = vsel %vm742_vm6, %v743_v53, %v6395_v16  ;;  %v835_v1 = vsel %vm823_vm4, %v5968_v9, %v5996_v49  ;;  %v837_v42 = vshll.u32 %v797_v36, 8 }
 0x1a4   : > { %v829_v12 = vsel %vm821_vm13, %v808_v20, %v811_v21  ;;  %v745_v58 = vadd.s32 %v744_v2, %v740_v11  ;;  %v826_v40 = vsel %vm824_vm7, %v814_v27, 2102212464  ;;  %v831_v52 = vsel %vm823_vm4, %v814_v27, %v5988_v3 }
 0x1a5   : > { %v833_v31 = vsel %vm821_vm13, %v811_v21, %v814_v27  ;;  %v827_v41 = vsel %vm823_vm4, %v811_v21, %v826_v40  ;;  %v832_v56 = vsel %vm822_vm14, %v829_v12, %v831_v52  ;;  %v9985_v53 = vand.u32 2147483647, %v5744_v6 }
 0x1a6   : > { %v836_v46 = vsel %vm822_vm14, %v833_v31, %v835_v1  ;;  %v6437_v16 = vsub.s32 32, %v6346_v8  ;;  %v746_v49 = vadd.s32 536870912, %v745_v58  ;;  %v2895_v3 = vshll.u32 %v10080_v17, %v6346_v8 }
 0x1a7   : > { %v6439_v9 = vmul.u32.u64.low %v837_v42, %v836_v46  ;;  %v6440_v11 = vmul.u32.u64.high %v837_v42, %v836_v46, %v6439_v9  ;;  %v6446_v27 = vshll.u32 %v10087_v14, %v6346_v8  ;;  %v2792_v20 = vshrl.u32 %v10087_v14, %v6384_v44 }
 0x1a8   : > { %10217 = vst [vmem:[#allocation172_spill] sm:$0xff] %v6437_v16  ;;  %v6448_v21 = vmul.u32.u64.low %v837_v42, %v832_v56  ;;  %v6449_v36 = vmul.u32.u64.high %v837_v42, %v832_v56, %v6448_v21  ;;  %v6456_v2 = vshrl.u32 %v10092_v63, %v6384_v44  ;;  %v747_v12 = vshrl.u32 %v746_v49, 30 }
 0x1a9   : > { %v828_v1 = vsel %vm822_vm14, %v825_v57, %v827_v41  ;;  %v2985_v40 = vsel %vm2984_vm5, %v6333_v62, 0  ;;  %v900_v52 = vand.u32 8388607, %v9985_v53  ;;  %v911_v31 = vshrl.u32 %v10215_v18, %v5958_v15 }
 0x1aa   : > { %v914_v56 = vshrl.u32 %v10216_v10, %v5958_v15  ;;  %vm687_vm4 = vcmp.lt.s32.totalorder %v5683_v54, 0  ;;  %v748_v46 = vshll.u32 %v747_v12, 30  ;;  %vm846_vm7 = vc.u32 %v6440_v11, %v6448_v21 }
 0x1ab   : > { %v910_v57 = vshll.u32 %v10213_v25, %v10218_v59  ;;  %v913_v62 = vshll.u32 %v10215_v18, %v10218_v59  ;;  %v2896_v41 = vshrl.u32 %v10087_v14, %v6437_v16  ;;  %vm3088_vm5 = vcmp.gt.s32.totalorder %v6348_v43, 0 }
 0x1ac   : > { %v844_v49 = vmul.u32 %v837_v42, %v828_v1  ;;  %v847_v9 = vadd.s32 1, %v6449_v36  ;;  %v916_v53 = vshll.u32 %v10216_v10, %v10218_v59  ;;  %v6482_v8 = vsub.s32 %v745_v58, %v748_v46 }
 0x1ad   : > { %v912_v44 = vor.u32 %v911_v31, %v910_v57  ;;  %v915_v37 = vor.u32 %v914_v56, %v913_v62  ;;  %v6488_v7 = vshrl.u32 %v10092_v63, %v6437_v16  ;;  %v6490_v28 = vshrl.u32 %v2985_v40, 5 }
 0x1ae   : > { %v6492_v47 = vand.u32 31, %v2985_v40  ;;  %v848_v42 = vsel %vm846_vm7, %v847_v9, %v6449_v36  ;;  %v751_v1 = vsub.s32 0, %v6482_v8  ;;  %v901_v58 = vor.u32 8388608, %v900_v52 }
 0x1af   : > { %10219 = vst [vmem:[#allocation101_spill] sm:$0xff] %v6490_v28  ;;  %v849_v59 = vadd.s32 %v848_v42, %v844_v49  ;;  %v918_v46 = vor.u32 %v917_v48, %v916_v53  ;;  %v6497_v31 = vor.u32 %v2792_v20, %v6388_v32  ;;  %v771_v56 = vsub.s32 4, %v747_v12 }
 0x1b0   : > { %10220 = vst [vmem:[#allocation173_spill] sm:$0xff] %v6492_v47  ;;  %vm925_vm6 = vcmp.lt.s32.totalorder %v5970_v45, 1  ;;  %vm927_vm13 = vcmp.lt.s32.totalorder %v5970_v45, 3  ;;  %v4378_v57 = vmin.u32 %v751_v1, %v6482_v8  ;;  %v909_v32 = vshrl.u32 %v10213_v25, %v5958_v15 }
 0x1b1   : > { %10221 = vst [vmem:[#allocation174_spill] sm:$0xff] %v6497_v31  ;;  %v850_v62 = vadd.s32 536870912, %v849_v59  ;;  %v933_v40 = vsel %vm925_vm6, %v912_v44, %v915_v37  ;;  %v939_v36 = vsel %vm927_vm13, %v6002_v13, %v6042_v34  ;;  %v935_v53 = vsel %vm927_vm13, %v918_v46, %v6038_v51 }
 0x1b2   : > { %v937_v20 = vsel %vm925_vm6, %v915_v37, %v918_v46  ;;  %v753_v52 = vclz %v4378_v57  ;;  %vm926_vm14 = vcmp.lt.s32.totalorder %v5970_v45, 2  ;;  %v930_v49 = vsel %vm928_vm10, %v918_v46, 2102212464 }
 0x1b3   : > { %v941_v13 = vshll.u32 %v901_v58, 8  ;;  %v772_v34 = vsel %vm687_vm4, %v771_v56, %v747_v12  ;;  %v851_v9 = vshrl.u32 %v850_v62, 30  ;;  %v936_v15 = vsel %vm926_vm14, %v933_v40, %v935_v53 }
 0x1b4   : > { %v940_v51 = vsel %vm926_vm14, %v937_v20, %v939_v36  ;;  %v4379_v42 = vadd.s32 4294967294, %v753_v52  ;;  %v929_v1 = vsel %vm925_vm6, %v909_v32, %v912_v44  ;;  %vm791_vm10 = vcmp.lt.s32.totalorder %v5705_v23, 0  ;;  %v10223_v44 = vld [vmem:[#allocation94_spill] sm:$0xff] }
 0x1b5   : > { %v6528_v57 = vmul.u32.u64.low %v941_v13, %v940_v51  ;;  %v6529_v48 = vmul.u32.u64.high %v941_v13, %v940_v51, %v6528_v57  ;;  %v852_v58 = vshll.u32 %v851_v9, 30  ;;  %v931_v12 = vsel %vm927_vm13, %v915_v37, %v930_v49  ;;  %v10228_v51 = vld [vmem:[#allocation73_spill] sm:$0xff] }
 0x1b6   : > { %v6534_v46 = vmul.u32.u64.low %v941_v13, %v936_v15  ;;  %v6535_v56 = vmul.u32.u64.high %v941_v13, %v936_v15, %v6534_v46  ;;  %v6538_v62 = vor.u32 %v2896_v41, %v2895_v3  ;;  %v6543_v40 = vsel %vm3088_vm5, %v6348_v43, 0 }
 0x1b7   : > { %v6547_v36 = vadd.f32 %v6302_v24, %v10223_v44  ;;  %vm4380_vm7 = vcmp.lt.s32.totalorder %v4379_v42, 0  ;;  %v10225_v32 = vand.u32 2147483647, %v5683_v54  ;;  %v741_v3 = vadd.s32 %v6394_v22, %v6392_v60 }
 0x1b8   : > { %10222 = vst [vmem:[#allocation175_spill] sm:$0xff] %v6538_v62  ;;  %v756_v41 = vsel %vm4380_vm7, 0, %v4379_v42  ;;  %v6557_v53 = vsub.s32 %v849_v59, %v852_v58  ;;  %v932_v24 = vsel %vm926_vm14, %v929_v1, %v931_v12  ;;  %v875_v15 = vsub.s32 4, %v851_v9 }
 0x1b9   : > { %10224 = vst [vmem:[#allocation94_spill] sm:$0xff] %v6547_v36  ;;  %vm6551_vm6 = vcmp.le.f32.partialorder %v10225_v32, 0.7853982  ;;  %v757_v20 = vsub.s32 32, %v756_v41  ;;  %v761_v43 = vsub.s32 4294967266, %v756_v41  ;;  %vm950_vm5 = vc.u32 %v6529_v48, %v6534_v46 }
 0x1ba   : > { %v774_v52 = vsel %vm6551_vm6, 0, %v772_v34  ;;  %v855_v49 = vsub.s32 0, %v6557_v53  ;;  %v758_v60 = vshll.u32 %v6482_v8, %v756_v41  ;;  %v951_v42 = vadd.s32 1, %v6535_v56 }
 0x1bb   : > { %v759_v22 = vshrl.u32 %v741_v3, %v757_v20  ;;  %v762_v59 = vadd.s32 127, %v761_v43  ;;  %v6569_v58 = vadd.s32 3, %v774_v52  ;;  %v10229_v34 = vand.u32 2147483647, %v5705_v23  ;;  %v10232_v20 = vld [vmem:[#allocation103_spill] sm:$0xff]  ;;  %v10233_v52 = vld [vmem:[#allocation102_spill] sm:$0xff] }
 0x1bc   : > { %v845_v1 = vadd.s32 %v6448_v21, %v6440_v11  ;;  %v4382_v12 = vmin.u32 %v855_v49, %v6557_v53  ;;  %v948_v8 = vmul.u32 %v941_v13, %v932_v24  ;;  %v952_v3 = vsel %vm950_vm5, %v951_v42, %v6535_v56 }
 0x1bd   : > { %vm6573_vm13 = vcmp.le.f32.partialorder %v10229_v34, 0.7853982  ;;  %v760_v44 = vor.u32 %v759_v22, %v758_v60  ;;  %v763_v32 = vshll.u32 %v762_v59, 23  ;;  %v1013_v43 = vshrl.u32 %v10213_v25, %v10232_v20 }
 0x1be   : > { %v857_v41 = vclz %v4382_v12  ;;  %v1014_v34 = vshll.u32 %v10213_v25, %v10233_v52  ;;  %v1015_v57 = vshrl.u32 %v10215_v18, %v10232_v20  ;;  %v876_v11 = vsel %vm791_vm10, %v875_v15, %v851_v9 }
 0x1bf   : > { %v764_v16 = vor.u32 4788187, %v763_v32  ;;  %v953_v21 = vadd.s32 %v952_v3, %v948_v8  ;;  %v10234_v49 = vand.u32 2147483647, %v10228_v51  ;;  %v1018_v56 = vshrl.u32 %v10216_v10, %v10232_v20  ;;  %v6602_v3 = vpop.permute.xlu1 %4018 }
 0x1c0   : > { %v4383_v24 = vadd.s32 4294967294, %v857_v41  ;;  %v1020_v60 = vshll.u32 %v10216_v10, %v10233_v52  ;;  %v1021_v22 = vshrl.u32 %v10080_v17, %v10232_v20  ;;  %vm895_vm14 = vcmp.lt.s32.totalorder %v5744_v6, 0 }
 0x1c1   : > { %v1004_v13 = vand.u32 8388607, %v10234_v49  ;;  %v765_v59 = vand.u32 2147483647, %v764_v16  ;;  %v767_v42 = vcvt.s32.f32 %v760_v44  ;;  %v954_v12 = vadd.s32 536870912, %v953_v21 }
 0x1c2   : > { %v1017_v9 = vshll.u32 %v10215_v18, %v10233_v52  ;;  %vm4384_vm7 = vcmp.lt.s32.totalorder %v4383_v24, 0  ;;  %v878_v15 = vsel %vm6573_vm13, 0, %v876_v11  ;;  %v1016_v32 = vor.u32 %v1015_v57, %v1014_v34 }
 0x1c3   : > { %v1022_v8 = vor.u32 %v1021_v22, %v1020_v60  ;;  %v768_v41 = vmul.f32 %v767_v42, %v765_v59  ;;  %v860_v49 = vsel %vm4384_vm7, 0, %v4383_v24  ;;  %v955_v28 = vshrl.u32 %v954_v12, 30  ;;  %v6628_v12 = vpop.permute.xlu1 %4022 }
 0x1c4   : > { %v1019_v20 = vor.u32 %v1018_v56, %v1017_v9  ;;  %v861_v36 = vsub.s32 32, %v860_v49  ;;  %v865_v55 = vsub.s32 4294967266, %v860_v49  ;;  %v10235_v16 = vand.u32 2147483647, %v5744_v6 }
 0x1c5   : > { %v1005_v52 = vor.u32 8388608, %v1004_v13  ;;  %vm1029_vm8 = vcmp.lt.s32.totalorder %v5992_v0, 1  ;;  %v769_v11 = vxor.u32 2147483648, %v768_v41  ;;  %v862_v57 = vshll.u32 %v6557_v53, %v860_v49 }
 0x1c6   : > { %vm6606_vm5 = vcmp.le.f32.partialorder %v10235_v16, 0.7853982  ;;  %v956_v34 = vshll.u32 %v955_v28, 30  ;;  %vm1030_vm11 = vcmp.lt.s32.totalorder %v5992_v0, 2  ;;  %v863_v24 = vshrl.u32 %v845_v1, %v861_v36 }
 0x1c7   : > { %v866_v60 = vadd.s32 127, %v865_v55  ;;  %v979_v56 = vsub.s32 4, %v955_v28  ;;  %v1034_v22 = vsel %vm1032_vm1, %v1022_v8, 2102212464  ;;  %v770_v59 = vsel %vm687_vm4, %v769_v11, %v768_v41 }
 0x1c8   : > { %v6617_v42 = vsub.s32 %v953_v21, %v956_v34  ;;  %vm1031_vm7 = vcmp.lt.s32.totalorder %v5992_v0, 3  ;;  %v1037_v13 = vsel %vm1029_vm8, %v1016_v32, %v1019_v20  ;;  %v773_v53 = vsel %vm6551_vm6, %v5683_v54, %v770_v59 }
 0x1c9   : > { %v864_v36 = vor.u32 %v863_v24, %v862_v57  ;;  %v867_v55 = vshll.u32 %v866_v60, 23  ;;  %v1039_v1 = vsel %vm1031_vm7, %v1022_v8, %v6053_v50  ;;  %4719 = vcosq.f32 %v773_v53 }
 0x1ca   : > { %v959_v21 = vsub.s32 0, %v6617_v42  ;;  %v1033_v9 = vsel %vm1029_vm8, %v1013_v43, %v1016_v32  ;;  %v1035_v41 = vsel %vm1031_vm7, %v1019_v20, %v1034_v22  ;;  %4721 = vsinq.f32 %v773_v53  ;;  %v10238_v43 = vld [vmem:[#allocation109_spill] sm:$0xff]  ;;  %v10239_v53 = vld [vmem:[#allocation90_spill] sm:$0xff] }
 0x1cb   : > { %v868_v37 = vor.u32 4788187, %v867_v55  ;;  %v980_v49 = vsel %vm895_vm14, %v979_v56, %v955_v28  ;;  %v1041_v16 = vsel %vm1029_vm8, %v1019_v20, %v1022_v8  ;;  %v779_v50 = vand.u32 3, %v6569_v58  ;;  %v6657_v55 = vpop.permute.xlu1 %4030 }
 0x1cc   : > { %v4386_v11 = vmin.u32 %v959_v21, %v6617_v42  ;;  %v1040_v57 = vsel %vm1030_vm11, %v1037_v13, %v1039_v1  ;;  %v1043_v32 = vsel %vm1031_vm7, %v10238_v43, %v6057_v5  ;;  %v871_v24 = vcvt.s32.f32 %v864_v36  ;;  %10240 = vst [vmem:[#allocation73_spill] sm:$0xff] %v6657_v55 }
 0x1cd   : > { %v869_v34 = vand.u32 2147483647, %v868_v37  ;;  %v1044_v28 = vsel %vm1030_vm11, %v1041_v16, %v1043_v32  ;;  %v1045_v60 = vshll.u32 %v1005_v52, 8  ;;  %v882_v56 = vadd.s32 3, %v878_v15 }
 0x1ce   : > { %v961_v8 = vclz %v4386_v11  ;;  %v982_v58 = vsel %vm6606_vm5, 0, %v980_v49  ;;  %v1036_v20 = vsel %vm1030_vm11, %v1033_v9, %v1035_v41  ;;  %v10003_v5 = vand.u32 2147483647, %v10239_v53 }
 0x1cf   : > { %v872_v22 = vmul.f32 %v871_v24, %v869_v34  ;;  %v6653_v59 = vmul.u32.u64.low %v1045_v60, %v1044_v28  ;;  %v6654_v13 = vmul.u32.u64.high %v1045_v60, %v1044_v28, %v6653_v59  ;;  %vm780_vm8 = vcmp.lt.s32.totalorder %v779_v50, 2 }
 0x1d0   : > { %v4387_v36 = vadd.s32 4294967294, %v961_v8  ;;  %v6659_v1 = vmul.u32.u64.low %v1045_v60, %v1040_v57  ;;  %v6660_v52 = vmul.u32.u64.high %v1045_v60, %v1040_v57, %v6659_v1  ;;  %vm777_vm1 = vweird.f32 %v5683_v54  ;;  %v10242_v59 = vld [vmem:[#allocation110_spill] sm:$0xff] }
 0x1d1   : > { %vm781_vm4 = vcmp.eq.s32.totalorder %v779_v50, 0  ;;  %vm784_vm6 = vcmp.eq.s32.totalorder %v779_v50, 2  ;;  %v873_v0 = vxor.u32 2147483648, %v872_v22  ;;  %v949_v15 = vadd.s32 %v6534_v46, %v6529_v48 }
 0x1d2   : > { %v6666_v21 = vand.u32 3, %v882_v56  ;;  %vm4388_vm11 = vcmp.lt.s32.totalorder %v4387_v36, 0  ;;  %v986_v9 = vadd.s32 3, %v982_v58  ;;  %v1052_v41 = vmul.u32 %v1045_v60, %v1036_v20  ;;  %v6683_v60 = vpop.permute.xlu1 %4038 }
 0x1d3   : > { %v874_v37 = vsel %vm791_vm10, %v873_v0, %v872_v22  ;;  %v964_v49 = vsel %vm4388_vm11, 0, %v4387_v36  ;;  %v6672_v16 = vand.u32 8388607, %v10003_v5  ;;  %v1538_v11 = vshrl.u32 %v10216_v10, %v6062_v26  ;;  %v4720_v57 = vpop.eup %4719  ;;  %10241 = vst [vmem:[#allocation103_spill] sm:$0xff] %v6683_v60 }
 0x1d4   : > { %v877_v48 = vsel %vm6573_vm13, %v5705_v23, %v874_v37  ;;  %v965_v46 = vsub.s32 32, %v964_v49  ;;  %v969_v43 = vsub.s32 4294967266, %v964_v49  ;;  %vm1054_vm7 = vc.u32 %v6654_v13, %v6659_v1  ;;  %v4722_v32 = vpop.eup %4721 }
 0x1d5   : > { %v785_v34 = vxor.u32 2147483648, %v4720_v57  ;;  %4723 = vcosq.f32 %v877_v48  ;;  %v966_v24 = vshll.u32 %v6617_v42, %v964_v49  ;;  %v1055_v28 = vadd.s32 1, %v6660_v52 }
 0x1d6   : > { %v782_v56 = vxor.u32 2147483648, %v4722_v32  ;;  %4725 = vsinq.f32 %v877_v48  ;;  %v967_v8 = vshrl.u32 %v949_v15, %v965_v46  ;;  %v970_v58 = vadd.s32 127, %v969_v43  ;;  %v6699_v43 = vpop.permute.xlu1 %4078 }
 0x1d7   : > { %v786_v45 = vsel %vm784_vm6, %v785_v34, %v4722_v32  ;;  %v1056_v20 = vsel %vm1054_vm7, %v1055_v28, %v6660_v52  ;;  %v1535_v22 = vshrl.u32 %v10215_v18, %v6062_v26  ;;  %v1537_v36 = vshll.u32 %v10215_v18, %v10242_v59 }
 0x1d8   : > { %v783_v42 = vsel %vm781_vm4, %v4720_v57, %v782_v56  ;;  %v968_v0 = vor.u32 %v967_v8, %v966_v24  ;;  %v971_v37 = vshll.u32 %v970_v58, 23  ;;  %v1057_v49 = vadd.s32 %v1056_v20, %v1052_v41 }
 0x1d9   : > { %v787_v48 = vsel %vm780_vm8, %v783_v42, %v786_v45  ;;  %v1534_v15 = vshll.u32 %v10213_v25, %v10242_v59  ;;  %v1540_v52 = vshll.u32 %v10216_v10, %v10242_v59  ;;  %v1541_v46 = vshrl.u32 %v10080_v17, %v6062_v26  ;;  %v10243_v45 = vld [vmem:[#allocation119_spill] sm:$0xff] }
 0x1da   : > { %v788_v32 = vsel %vm777_vm1, nan, %v787_v48  ;;  %vm885_vm10 = vcmp.eq.s32.totalorder %v6666_v21, 0  ;;  %v972_v57 = vor.u32 4788187, %v971_v37  ;;  %v1058_v41 = vadd.s32 536870912, %v1057_v49  ;;  %v10245_v37 = vld [vmem:[#allocation133_spill] sm:$0xff] }
 0x1db   : > { %v1539_v50 = vor.u32 %v1538_v11, %v1537_v36  ;;  %vm884_vm13 = vcmp.lt.s32.totalorder %v6666_v21, 2  ;;  %vm888_vm8 = vcmp.eq.s32.totalorder %v6666_v21, 2  ;;  %v4109_v34 = vmul.f32 %v6699_v43, %v788_v32  ;;  %v10246_v48 = vld [vmem:[#allocation125_spill] sm:$0xff] }
 0x1dc   : > { %v1536_v24 = vor.u32 %v1535_v22, %v1534_v15  ;;  %v1542_v28 = vor.u32 %v1541_v46, %v1540_v52  ;;  %vm881_vm4 = vweird.f32 %v5705_v23  ;;  %v973_v56 = vand.u32 2147483647, %v972_v57 }
 0x1dd   : > { %v975_v8 = vcvt.s32.f32 %v968_v0  ;;  %v6709_v54 = vand.u32 3, %v986_v9  ;;  %v6711_v58 = vshrl.u32 %v1058_v41, 30  ;;  %v4141_v20 = vadd.f32 %v4109_v34, %v10243_v45 }
 0x1de   : > { %v1525_v11 = vor.u32 8388608, %v6672_v16  ;;  %v1533_v59 = vshrl.u32 %v10213_v25, %v6062_v26  ;;  %vm1549_vm1 = vcmp.lt.s32.totalorder %v6082_v39, 1  ;;  %vm2800_vm6 = vcmp.lt.s32.totalorder %v6331_v38, 4  ;;  %v10244_v16 = vld [vmem:[#allocation127_spill] sm:$0xff] }
 0x1df   : > { %v976_v22 = vmul.f32 %v975_v8, %v973_v56  ;;  %v1060_v36 = vshll.u32 %v6711_v58, 30  ;;  %vm1551_vm11 = vcmp.lt.s32.totalorder %v6082_v39, 3  ;;  %v1561_v9 = vsel %vm1549_vm1, %v1539_v50, %v1542_v28  ;;  %v4724_v42 = vpop.eup %4723  ;;  %4173 = vst [vmem:[%s6723_s15] sm:$0xff] %v4141_v20 }
 0x1e0   : > { %vm1550_vm7 = vcmp.lt.s32.totalorder %v6082_v39, 2  ;;  %v1557_v26 = vsel %vm1549_vm1, %v1536_v24, %v1539_v50  ;;  %v1559_v0 = vsel %vm1551_vm11, %v1542_v28, %v10244_v16  ;;  %v1563_v15 = vsel %vm1551_vm11, %v10246_v48, %v10245_v37  ;;  %v4726_v52 = vpop.eup %4725  ;;  %v10252_v39 = vld [vmem:[#allocation120_spill] sm:$0xff] }
 0x1e1   : > { %v889_v46 = vxor.u32 2147483648, %v4724_v42  ;;  %v977_v32 = vxor.u32 2147483648, %v976_v22  ;;  %v6736_v57 = vsub.s32 %v1057_v49, %v1060_v36  ;;  %v1553_v41 = vsel %vm1549_vm1, %v1533_v59, %v1536_v24 }
 0x1e2   : > { %vm999_vm12 = vcmp.lt.s32.totalorder %v10228_v51, 0  ;;  %v886_v34 = vxor.u32 2147483648, %v4726_v52  ;;  %v1554_v56 = vsel %vm1552_vm3, %v1542_v28, 2102212464  ;;  %v1564_v8 = vsel %vm1550_vm7, %v1561_v9, %v1563_v15 }
 0x1e3   : > { %v1565_v45 = vshll.u32 %v1525_v11, 8  ;;  %v890_v20 = vsel %vm888_vm8, %v889_v46, %v4726_v52  ;;  %v978_v49 = vsel %vm895_vm14, %v977_v32, %v976_v22  ;;  %v1063_v36 = vsub.s32 0, %v6736_v57 }
 0x1e4   : > { %v1560_v24 = vsel %vm1550_vm7, %v1557_v26, %v1559_v0  ;;  %v887_v59 = vsel %vm885_vm10, %v4724_v42, %v886_v34  ;;  %v981_v28 = vsel %vm6606_vm5, %v5744_v6, %v978_v49  ;;  %v1555_v37 = vsel %vm1551_vm11, %v1539_v50, %v1554_v56 }
 0x1e5   : > { %v6757_v9 = vmul.u32.u64.low %v1565_v45, %v1564_v8  ;;  %v6758_v11 = vmul.u32.u64.high %v1565_v45, %v1564_v8, %v6757_v9  ;;  %v891_v16 = vsel %vm884_vm13, %v887_v59, %v890_v20  ;;  %4727 = vcosq.f32 %v981_v28 }
 0x1e6   : > { %v4390_v22 = vmin.u32 %v1063_v36, %v6736_v57  ;;  %v892_v26 = vsel %vm881_vm4, nan, %v891_v16  ;;  %4729 = vsinq.f32 %v981_v28  ;;  %v6774_v21 = vsub.s32 32, %v6492_v47  ;;  %v10254_v16 = vld [vmem:[#allocation117_spill] sm:$0xff] }
 0x1e7   : > { %v6767_v42 = vmul.u32.u64.low %v1565_v45, %v1560_v24  ;;  %v6768_v0 = vmul.u32.u64.high %v1565_v45, %v1560_v24, %v6767_v42  ;;  %v1083_v15 = vsub.s32 4, %v6711_v58  ;;  %v6780_v50 = vsel %vm2800_vm6, %v6497_v31, 920167782 }
 0x1e8   : > { %10247 = vst [vmem:[#allocation102_spill] sm:$0xff] %v6774_v21  ;;  %v1065_v48 = vclz %v4390_v22  ;;  %v6784_v23 = vshll.u32 %v10080_v17, %v6492_v47  ;;  %v4110_v52 = vmul.f32 %v6699_v43, %v892_v26  ;;  %v1556_v46 = vsel %vm1550_vm7, %v1553_v41, %v1555_v37  ;;  %v10253_v41 = vld [vmem:[#allocation93_spill] sm:$0xff] }
 0x1e9   : > { %v10248_v32 = vor.u32 %v6456_v2, %v6400_v19  ;;  %v10249_v56 = vand.u32 2147483647, %v10228_v51  ;;  %vm1574_vm14 = vc.u32 %v6758_v11, %v6767_v42  ;;  %vm989_vm5 = vcmp.eq.s32.totalorder %v6709_v54, 0 }
 0x1ea   : > { %v4391_v20 = vadd.s32 4294967294, %v1065_v48  ;;  %vm992_vm10 = vcmp.eq.s32.totalorder %v6709_v54, 2  ;;  %v4142_v19 = vadd.f32 %v4110_v52, %v10252_v39  ;;  %v1575_v2 = vadd.s32 1, %v6768_v0  ;;  %v10255_v48 = vld [vmem:[#allocation112_spill] sm:$0xff] }
 0x1eb   : > { %v6794_v34 = vsel %vm2800_vm6, %v10248_v32, 1326507024  ;;  %vm6798_vm3 = vcmp.le.f32.partialorder %v10249_v56, 0.7853982  ;;  %v10002_v49 = vand.u32 2147483647, %v10253_v41  ;;  %v1053_v36 = vadd.s32 %v6659_v1, %v6654_v13 }
 0x1ec   : > { %vm988_vm13 = vcmp.lt.s32.totalorder %v6709_v54, 2  ;;  %vm4392_vm8 = vcmp.lt.s32.totalorder %v4391_v20, 0  ;;  %v6815_v24 = vsel %vm999_vm12, %v1083_v15, %v6711_v58  ;;  %v1572_v59 = vmul.u32 %v1565_v45, %v1556_v46  ;;  %4174 = vst [vmem:[%s6723_s15 + $0x8] sm:$0xff] %v4142_v19 }
 0x1ed   : > { %vm985_vm4 = vweird.f32 %v5744_v6  ;;  %v1068_v28 = vsel %vm4392_vm8, 0, %v4391_v20  ;;  %v1576_v9 = vsel %vm1574_vm14, %v1575_v2, %v6768_v0  ;;  %v1639_v22 = vshrl.u32 %v10215_v18, %v10254_v16 }
 0x1ee   : > { %v1642_v37 = vshrl.u32 %v10216_v10, %v10254_v16  ;;  %v1069_v13 = vsub.s32 32, %v1068_v28  ;;  %v1073_v1 = vsub.s32 4294967266, %v1068_v28  ;;  %v1577_v26 = vadd.s32 %v1576_v9, %v1572_v59 }
 0x1ef   : > { %v1638_v58 = vshll.u32 %v10213_v25, %v10255_v48  ;;  %v1628_v45 = vand.u32 8388607, %v10002_v49  ;;  %v1641_v15 = vshll.u32 %v10215_v18, %v10255_v48  ;;  %v1644_v0 = vshll.u32 %v10216_v10, %v10255_v48  ;;  %v4728_v46 = vpop.eup %4727 }
 0x1f0   : > { %v1645_v52 = vshrl.u32 %v10080_v17, %v10254_v16  ;;  %v1070_v32 = vshll.u32 %v6736_v57, %v1068_v28  ;;  %v1071_v56 = vshrl.u32 %v1053_v36, %v1069_v13  ;;  %v1074_v20 = vadd.s32 127, %v1073_v1  ;;  %v4730_v19 = vpop.eup %4729 }
 0x1f1   : > { %v1578_v39 = vadd.s32 536870912, %v1577_v26  ;;  %v993_v2 = vxor.u32 2147483648, %v4728_v46  ;;  %v1640_v59 = vor.u32 %v1639_v22, %v1638_v58  ;;  %v1643_v9 = vor.u32 %v1642_v37, %v1641_v15 }
 0x1f2   : > { %v1646_v49 = vor.u32 %v1645_v52, %v1644_v0  ;;  %v990_v5 = vxor.u32 2147483648, %v4730_v19  ;;  %v1072_v44 = vor.u32 %v1071_v56, %v1070_v32  ;;  %v1075_v60 = vshll.u32 %v1074_v20, 23 }
 0x1f3   : > { %v1579_v55 = vshrl.u32 %v1578_v39, 30  ;;  %v994_v48 = vsel %vm992_vm10, %v993_v2, %v4730_v19  ;;  %v1086_v31 = vsel %vm6798_vm3, 0, %v6815_v24  ;;  %v1629_v57 = vor.u32 8388608, %v1628_v45 }
 0x1f4   : > { %vm1653_vm1 = vcmp.lt.s32.totalorder %v6094_v61, 1  ;;  %vm2904_vm11 = vcmp.lt.s32.totalorder %v6344_v29, 4  ;;  %v991_v36 = vsel %vm989_vm5, %v4728_v46, %v990_v5  ;;  %v1076_v28 = vor.u32 4788187, %v1075_v60  ;;  %v10256_v46 = vld [vmem:[#allocation121_spill] sm:$0xff] }
 0x1f5   : > { %v1580_v22 = vshll.u32 %v1579_v55, 30  ;;  %vm1655_vm7 = vcmp.lt.s32.totalorder %v6094_v61, 3  ;;  %v995_v37 = vsel %vm988_vm13, %v991_v36, %v994_v48  ;;  %vm1654_vm14 = vcmp.lt.s32.totalorder %v6094_v61, 2 }
 0x1f6   : > { %v1661_v24 = vsel %vm1653_vm1, %v1640_v59, %v1643_v9  ;;  %v1663_v13 = vsel %vm1655_vm7, %v1646_v49, %v6171_v4  ;;  %v996_v1 = vsel %vm985_vm4, nan, %v995_v37  ;;  %v1077_v5 = vand.u32 2147483647, %v1076_v28  ;;  %v10257_v37 = vld [vmem:[#allocation100_spill] sm:$0xff] }
 0x1f7   : > { %v1079_v60 = vcvt.s32.f32 %v1072_v44  ;;  %v6855_v58 = vsub.s32 %v1577_v26, %v1580_v22  ;;  %vm1519_vm5 = vcmp.lt.s32.totalorder %v10239_v53, 0  ;;  %v4111_v54 = vmul.f32 %v6699_v43, %v996_v1 }
 0x1f8   : > { %v1658_v45 = vsel %vm1656_vm9, %v1646_v49, 2102212464  ;;  %v1665_v15 = vsel %vm1653_vm1, %v1643_v9, %v1646_v49  ;;  %v1667_v6 = vsel %vm1655_vm7, %v6122_v35, %v6175_v30  ;;  %v1637_v26 = vshrl.u32 %v10213_v25, %v10254_v16 }
 0x1f9   : > { %v1080_v4 = vmul.f32 %v1079_v60, %v1077_v5  ;;  %v1583_v44 = vsub.s32 0, %v6855_v58  ;;  %v1668_v0 = vsel %vm1654_vm14, %v1665_v15, %v1667_v6  ;;  %v6874_v52 = vshll.u32 %v10087_v14, %v6492_v47 }
 0x1fa   : > { %v4143_v49 = vadd.f32 %v4111_v54, %v10256_v46  ;;  %v1664_v32 = vsel %vm1654_vm14, %v1661_v24, %v1663_v13  ;;  %v1669_v56 = vshll.u32 %v1629_v57, 8  ;;  %v1657_v20 = vsel %vm1653_vm1, %v1637_v26, %v1640_v59  ;;  %v10263_v46 = vld [vmem:[#allocation118_spill] sm:$0xff] }
 0x1fb   : > { %v1081_v35 = vxor.u32 2147483648, %v1080_v4  ;;  %v4410_v30 = vmin.u32 %v1583_v44, %v6855_v58  ;;  %v1659_v16 = vsel %vm1655_vm7, %v1643_v9, %v1658_v45  ;;  %v1090_v39 = vadd.s32 3, %v1086_v31 }
 0x1fc   : > { %4175 = vst [vmem:[%s6723_s15 + $0x10] sm:$0xff] %v4143_v49  ;;  %v1603_v19 = vsub.s32 4, %v1579_v55  ;;  %v6885_v2 = vmul.u32.u64.low %v1669_v56, %v1668_v0  ;;  %v6886_v48 = vmul.u32.u64.high %v1669_v56, %v1668_v0, %v6885_v2  ;;  %v6897_v59 = vsel %vm2904_vm11, %v6538_v62, 920167782 }
 0x1fd   : > { %v1082_v36 = vsel %vm999_vm12, %v1081_v35, %v1080_v4  ;;  %v1585_v28 = vclz %v4410_v30  ;;  %v6890_v57 = vmul.u32.u64.low %v1669_v56, %v1664_v32  ;;  %v6891_v22 = vmul.u32.u64.high %v1669_v56, %v1664_v32, %v6890_v57  ;;  %v10262_v4 = vld [vmem:[#allocation124_spill] sm:$0xff] }
 0x1fe   : > { %v1085_v31 = vsel %vm6798_vm3, %v10228_v51, %v1082_v36  ;;  %v1660_v9 = vsel %vm1654_vm14, %v1657_v20, %v1659_v16  ;;  %v1725_v24 = vand.u32 2147483647, %v10257_v37  ;;  %v10258_v13 = vor.u32 %v6488_v7, %v6446_v27 }
 0x1ff   : > { %4731 = vcosq.f32 %v1085_v31  ;;  %v10259_v5 = vand.u32 2147483647, %v10239_v53  ;;  %v4411_v8 = vadd.s32 4294967294, %v1585_v28  ;;  %v1091_v61 = vand.u32 3, %v1090_v39 }
 0x200   : > { %v6910_v1 = vsel %vm2904_vm11, %v10258_v13, 1326507024  ;;  %4733 = vsinq.f32 %v1085_v31  ;;  %v1573_v54 = vadd.s32 %v6767_v42, %v6758_v11  ;;  %vm1678_vm12 = vc.u32 %v6886_v48, %v6890_v57 }
 0x201   : > { %vm6914_vm9 = vcmp.le.f32.partialorder %v10259_v5, 0.7853982  ;;  %vm4412_vm3 = vcmp.lt.s32.totalorder %v4411_v8, 0  ;;  %v1604_v7 = vsel %vm1519_vm5, %v1603_v19, %v1579_v55  ;;  %v1676_v27 = vmul.u32 %v1669_v56, %v1660_v9 }
 0x202   : > { %v1679_v45 = vadd.s32 1, %v6891_v22  ;;  %v1588_v15 = vsel %vm4412_vm3, 0, %v4411_v8  ;;  %v1732_v6 = vand.u32 8388607, %v1725_v24  ;;  %v1743_v44 = vshrl.u32 %v10215_v18, %v10262_v4 }
 0x203   : > { %v1746_v11 = vshrl.u32 %v10216_v10, %v10262_v4  ;;  %v1589_v42 = vsub.s32 32, %v1588_v15  ;;  %v1593_v26 = vsub.s32 4294967266, %v1588_v15  ;;  %v1745_v55 = vshll.u32 %v10215_v18, %v10263_v46 }
 0x204   : > { %v1680_v0 = vsel %vm1678_vm12, %v1679_v45, %v6891_v22  ;;  %vm1093_vm10 = vcmp.eq.s32.totalorder %v1091_v61, 0  ;;  %v1742_v32 = vshll.u32 %v10213_v25, %v10263_v46  ;;  %v1748_v56 = vshll.u32 %v10216_v10, %v10263_v46  ;;  %v10265_v45 = vld [vmem:[#allocation131_spill] sm:$0xff]  ;;  %v10266_v46 = vld [vmem:[#allocation136_spill] sm:$0xff] }
 0x205   : > { %v1681_v49 = vadd.s32 %v1680_v0, %v1676_v27  ;;  %v1749_v35 = vshrl.u32 %v10080_v17, %v10262_v4  ;;  %vm1092_vm13 = vcmp.lt.s32.totalorder %v1091_v61, 2  ;;  %v1590_v30 = vshll.u32 %v6855_v58, %v1588_v15  ;;  %v10264_v27 = vld [vmem:[#allocation137_spill] sm:$0xff] }
 0x206   : > { %v1591_v20 = vshrl.u32 %v1573_v54, %v1589_v42  ;;  %v1594_v16 = vadd.s32 127, %v1593_v26  ;;  %v1747_v39 = vor.u32 %v1746_v11, %v1745_v55  ;;  %vm1089_vm8 = vweird.f32 %v10228_v51 }
 0x207   : > { %vm1096_vm4 = vcmp.eq.s32.totalorder %v1091_v61, 2  ;;  %v1682_v19 = vadd.s32 536870912, %v1681_v49  ;;  %v1744_v2 = vor.u32 %v1743_v44, %v1742_v32  ;;  %v1750_v36 = vor.u32 %v1749_v35, %v1748_v56 }
 0x208   : > { %v1592_v28 = vor.u32 %v1591_v20, %v1590_v30  ;;  %v1595_v22 = vshll.u32 %v1594_v16, 23  ;;  %v1606_v31 = vsel %vm6914_vm9, 0, %v1604_v7  ;;  %v1741_v9 = vshrl.u32 %v10213_v25, %v10262_v4 }
 0x209   : > { %v6946_v13 = vshrl.u32 %v1682_v19, 30  ;;  %v1733_v58 = vor.u32 8388608, %v1732_v6  ;;  %vm1757_vm1 = vcmp.lt.s32.totalorder %v6117_v33, 1  ;;  %vm1759_vm7 = vcmp.lt.s32.totalorder %v6117_v33, 3  ;;  %v4732_v5 = vpop.eup %4731 }
 0x20a   : > { %v1596_v8 = vor.u32 4788187, %v1595_v22  ;;  %vm1758_vm14 = vcmp.lt.s32.totalorder %v6117_v33, 2  ;;  %v1769_v54 = vsel %vm1757_vm1, %v1747_v39, %v1750_v36  ;;  %v1771_v7 = vsel %vm1759_vm7, %v10265_v45, %v10264_v27  ;;  %v4734_v15 = vpop.eup %4733 }
 0x20b   : > { %v1097_v4 = vxor.u32 2147483648, %v4732_v5  ;;  %v1684_v6 = vshll.u32 %v6946_v13, 30  ;;  %v1762_v44 = vsel %vm1760_vm0, %v1750_v36, 2102212464  ;;  %v1765_v11 = vsel %vm1757_vm1, %v1744_v2, %v1747_v39 }
 0x20c   : > { %v1094_v42 = vxor.u32 2147483648, %v4734_v15  ;;  %v1597_v26 = vand.u32 2147483647, %v1596_v8  ;;  %v1599_v0 = vcvt.s32.f32 %v1592_v28  ;;  %v1767_v55 = vsel %vm1759_vm7, %v1750_v36, %v10266_v46 }
 0x20d   : > { %v1098_v32 = vsel %vm1096_vm4, %v1097_v4, %v4734_v15  ;;  %v6966_v56 = vsub.s32 %v1681_v49, %v1684_v6  ;;  %v1761_v35 = vsel %vm1757_vm1, %v1741_v9, %v1744_v2  ;;  %v1772_v30 = vsel %vm1758_vm14, %v1769_v54, %v1771_v7  ;;  %v10267_v7 = vld [vmem:[#allocation74_spill] sm:$0xff] }
 0x20e   : > { %v1095_v20 = vsel %vm1093_vm10, %v4732_v5, %v1094_v42  ;;  %v1600_v16 = vmul.f32 %v1599_v0, %v1597_v26  ;;  %v1763_v19 = vsel %vm1759_vm7, %v1747_v39, %v1762_v44  ;;  %v1773_v28 = vshll.u32 %v1733_v58, 8 }
 0x20f   : > { %v1099_v22 = vsel %vm1092_vm13, %v1095_v20, %v1098_v32  ;;  %v1610_v36 = vadd.s32 3, %v1606_v31  ;;  %v1687_v8 = vsub.s32 0, %v6966_v56  ;;  %v1768_v49 = vsel %vm1758_vm14, %v1765_v11, %v1767_v55  ;;  %v10269_v11 = vld [vmem:[#allocation13_spill] sm:$0xff]  ;;  %v10271_v20 = vld [vmem:[#allocation126_spill] sm:$0xff] }
 0x210   : > { %v1100_v2 = vsel %vm1089_vm8, nan, %v1099_v22  ;;  %v1601_v9 = vxor.u32 2147483648, %v1600_v16  ;;  %v6981_v54 = vmul.u32.u64.low %v1773_v28, %v1772_v30  ;;  %v6982_v27 = vmul.u32.u64.high %v1773_v28, %v1772_v30, %v6981_v54 }
 0x211   : > { %v6986_v5 = vshrl.u32 %v10087_v14, %v6774_v21  ;;  %v4112_v61 = vmul.f32 %v6699_v43, %v1100_v2  ;;  %v4414_v39 = vmin.u32 %v1687_v8, %v6966_v56  ;;  %v1764_v31 = vsel %vm1758_vm14, %v1761_v35, %v1763_v19  ;;  %v10268_v43 = vld [vmem:[#allocation122_spill] sm:$0xff]  ;;  %v10270_v35 = vld [vmem:[#allocation123_spill] sm:$0xff] }
 0x212   : > { %v1602_v51 = vsel %vm1519_vm5, %v1601_v9, %v1600_v16  ;;  %v6994_v58 = vmul.u32.u64.low %v1773_v28, %v1768_v49  ;;  %v6995_v45 = vmul.u32.u64.high %v1773_v28, %v1768_v49, %v6994_v58  ;;  %v1829_v15 = vand.u32 2147483647, %v10267_v7 }
 0x213   : > { %vm1623_vm0 = vcmp.lt.s32.totalorder %v10253_v41, 0  ;;  %v7002_v4 = vshrl.u32 %v10092_v63, %v6774_v21  ;;  %v4144_v6 = vadd.f32 %v4112_v61, %v10268_v43  ;;  %v1605_v33 = vsel %vm6914_vm9, %v10239_v53, %v1602_v51 }
 0x214   : > { %v1689_v44 = vclz %v4414_v39  ;;  %v7010_v42 = vmul.f32 %v6628_v12, %v10269_v11  ;;  %4735 = vcosq.f32 %v1605_v33  ;;  %v7012_v26 = vand.u32 3, %v1610_v36 }
 0x215   : > { %v1707_v0 = vsub.s32 4, %v6946_v13  ;;  %4176 = vst [vmem:[%s6723_s15 + $0x18] sm:$0xff] %v4144_v6  ;;  %4737 = vsinq.f32 %v1605_v33  ;;  %v1780_v55 = vmul.u32 %v1773_v28, %v1764_v31  ;;  %vm1782_vm5 = vc.u32 %v6982_v27, %v6994_v58 }
 0x216   : > { %v4415_v46 = vadd.s32 4294967294, %v1689_v44  ;;  %v1783_v60 = vadd.s32 1, %v6995_v45  ;;  %v1836_v32 = vand.u32 8388607, %v1829_v15  ;;  %v1846_v30 = vshll.u32 %v10213_v25, %v10270_v35 }
 0x217   : > { %v1847_v16 = vshrl.u32 %v10215_v18, %v10271_v20  ;;  %v1849_v19 = vshll.u32 %v10215_v18, %v10270_v35  ;;  %v1850_v28 = vshrl.u32 %v10216_v10, %v10271_v20  ;;  %v1852_v22 = vshll.u32 %v10216_v10, %v10270_v35 }
 0x218   : > { %vm4416_vm9 = vcmp.lt.s32.totalorder %v4415_v46, 0  ;;  %v1784_v8 = vsel %vm1782_vm5, %v1783_v60, %v6995_v45  ;;  %v1853_v2 = vshrl.u32 %v10080_v17, %v10271_v20  ;;  %vm1613_vm12 = vcmp.eq.s32.totalorder %v7012_v26, 0 }
 0x219   : > { %v1692_v36 = vsel %vm4416_vm9, 0, %v4415_v46  ;;  %v1848_v49 = vor.u32 %v1847_v16, %v1846_v30  ;;  %v10272_v9 = vand.u32 2147483647, %v10253_v41  ;;  %v1677_v61 = vadd.s32 %v6890_v57, %v6886_v48  ;;  %v10275_v46 = vld [vmem:[#allocation129_spill] sm:$0xff]  ;;  %v10276_v30 = vld [vmem:[#allocation142_spill] sm:$0xff] }
 0x21a   : > { %v1693_v39 = vsub.s32 32, %v1692_v36  ;;  %v1697_v31 = vsub.s32 4294967266, %v1692_v36  ;;  %v1785_v51 = vadd.s32 %v1784_v8, %v1780_v55  ;;  %vm1612_vm10 = vcmp.lt.s32.totalorder %v7012_v26, 2 }
 0x21b   : > { %vm7037_vm3 = vcmp.le.f32.partialorder %v10272_v9, 0.7853982  ;;  %vm1616_vm13 = vcmp.eq.s32.totalorder %v7012_v26, 2  ;;  %v1694_v45 = vshll.u32 %v6966_v56, %v1692_v36  ;;  %v1851_v43 = vor.u32 %v1850_v28, %v1849_v19 }
 0x21c   : > { %v1854_v6 = vor.u32 %v1853_v2, %v1852_v22  ;;  %vm1609_vm8 = vweird.f32 %v10239_v53  ;;  %v1695_v33 = vshrl.u32 %v1677_v61, %v1693_v39  ;;  %v1698_v44 = vadd.s32 127, %v1697_v31 }
 0x21d   : > { %v1786_v11 = vadd.s32 536870912, %v1785_v51  ;;  %vm1861_vm4 = vcmp.lt.s32.totalorder %v10275_v46, 1  ;;  %v1708_v48 = vsel %vm1623_vm0, %v1707_v0, %v6946_v13  ;;  %v1837_v57 = vor.u32 8388608, %v1836_v32  ;;  %v10277_v0 = vld [vmem:[#allocation145_spill] sm:$0xff]  ;;  %v10278_v32 = vld [vmem:[#allocation134_spill] sm:$0xff] }
 0x21e   : > { %vm1863_vm1 = vcmp.lt.s32.totalorder %v10275_v46, 3  ;;  %v1869_v55 = vsel %vm1861_vm4, %v1848_v49, %v1851_v43  ;;  %v1696_v56 = vor.u32 %v1695_v33, %v1694_v45  ;;  %v1699_v60 = vshll.u32 %v1698_v44, 23  ;;  %v4736_v19 = vpop.eup %4735 }
 0x21f   : > { %v1787_v35 = vshrl.u32 %v1786_v11, 30  ;;  %v1871_v16 = vsel %vm1863_vm1, %v1854_v6, %v10276_v30  ;;  %v1845_v28 = vshrl.u32 %v10213_v25, %v10271_v20  ;;  %vm1862_vm7 = vcmp.lt.s32.totalorder %v10275_v46, 2  ;;  %v4738_v36 = vpop.eup %4737 }
 0x220   : > { %v1873_v13 = vsel %vm1861_vm4, %v1851_v43, %v1854_v6  ;;  %v1875_v22 = vsel %vm1863_vm1, %v10278_v32, %v10277_v0  ;;  %v1617_v8 = vxor.u32 2147483648, %v4736_v19  ;;  %v1700_v2 = vor.u32 4788187, %v1699_v60 }
 0x221   : > { %v1788_v9 = vshll.u32 %v1787_v35, 30  ;;  %v1866_v61 = vsel %vm1864_vm15, %v1854_v6, 2102212464  ;;  %v1614_v39 = vxor.u32 2147483648, %v4738_v36  ;;  %v1872_v20 = vsel %vm1862_vm7, %v1869_v55, %v1871_v16 }
 0x222   : > { %v1876_v31 = vsel %vm1862_vm7, %v1873_v13, %v1875_v22  ;;  %v1877_v45 = vshll.u32 %v1837_v57, 8  ;;  %vm1727_vm14 = vcmp.lt.s32.totalorder %v10257_v37, 0  ;;  %v1618_v33 = vsel %vm1616_vm13, %v1617_v8, %v4738_v36 }
 0x223   : > { %v1701_v44 = vand.u32 2147483647, %v1700_v2  ;;  %v1703_v11 = vcvt.s32.f32 %v1696_v56  ;;  %v7075_v60 = vsub.s32 %v1785_v51, %v1788_v9  ;;  %v1615_v6 = vsel %vm1613_vm12, %v4736_v19, %v1614_v39  ;;  %v7089_v51 = vpop.permute.xlu1 %4086 }
 0x224   : > { %v1710_v30 = vsel %vm7037_vm3, 0, %v1708_v48  ;;  %v7081_v55 = vmul.u32.u64.low %v1877_v45, %v1876_v31  ;;  %v7082_v16 = vmul.u32.u64.high %v1877_v45, %v1876_v31, %v7081_v55  ;;  %v1619_v57 = vsel %vm1612_vm10, %v1615_v6, %v1618_v33 }
 0x225   : > { %v1704_v13 = vmul.f32 %v1703_v11, %v1701_v44  ;;  %v1791_v0 = vsub.s32 0, %v7075_v60  ;;  %v1865_v56 = vsel %vm1861_vm4, %v1845_v28, %v1848_v49  ;;  %v1620_v19 = vsel %vm1609_vm8, nan, %v1619_v57  ;;  %v10280_v28 = vld [vmem:[#allocation40_spill] sm:$0xff] }
 0x226   : > { %v1867_v48 = vsel %vm1863_vm1, %v1851_v43, %v1866_v61  ;;  %v7095_v32 = vmul.u32.u64.low %v1877_v45, %v1872_v20  ;;  %v7096_v22 = vmul.u32.u64.high %v1877_v45, %v1872_v20, %v7095_v32  ;;  %v1714_v36 = vadd.s32 3, %v1710_v30  ;;  %v10283_v44 = vld [vmem:[#allocation104_spill] sm:$0xff]  ;;  %v10284_v30 = vld [vmem:[#allocation138_spill] sm:$0xff] }
 0x227   : > { %v1705_v26 = vxor.u32 2147483648, %v1704_v13  ;;  %v4418_v8 = vmin.u32 %v1791_v0, %v7075_v60  ;;  %v4117_v2 = vmul.f32 %v7089_v51, %v1620_v19  ;;  %v7102_v49 = vshrl.u32 %v6543_v40, 5 }
 0x228   : > { %v7105_v53 = vand.u32 31, %v6543_v40  ;;  %v1811_v43 = vsub.s32 4, %v1787_v35  ;;  %v1868_v20 = vsel %vm1862_vm7, %v1865_v56, %v1867_v48  ;;  %vm7118_vm15 = vcmp.le.f32.partialorder %v1725_v24, 0.7853982 }
 0x229   : > { %10279 = vst [vmem:[#allocation109_spill] sm:$0xff] %v7102_v49  ;;  %v1706_v61 = vsel %vm1623_vm0, %v1705_v26, %v1704_v13  ;;  %v1793_v39 = vclz %v4418_v8  ;;  %v4149_v31 = vadd.f32 %v4117_v2, %v7010_v42  ;;  %vm1886_vm5 = vc.u32 %v7082_v16, %v7095_v32  ;;  %v10285_v26 = vld [vmem:[#allocation132_spill] sm:$0xff] }
 0x22a   : > { %v1709_v33 = vsel %vm7037_vm3, %v10253_v41, %v1706_v61  ;;  %v1933_v11 = vand.u32 2147483647, %v10283_v44  ;;  %v7125_v46 = vand.u32 3, %v1714_v36  ;;  %v1887_v42 = vadd.s32 1, %v7096_v22 }
 0x22b   : > { %4739 = vcosq.f32 %v1709_v33  ;;  %v4419_v6 = vadd.s32 4294967294, %v1793_v39  ;;  %4181 = vst [vmem:[%s6723_s15 + $0x40] sm:$0xff] %v4149_v31  ;;  %v1812_v54 = vsel %vm1727_vm14, %v1811_v43, %v1787_v35  ;;  %v1884_v24 = vmul.u32 %v1877_v45, %v1868_v20 }
 0x22c   : > { %4741 = vsinq.f32 %v1709_v33  ;;  %v1951_v55 = vshrl.u32 %v10215_v18, %v10284_v30  ;;  %v1781_v57 = vadd.s32 %v6994_v58, %v6982_v27  ;;  %v1888_v13 = vsel %vm1886_vm5, %v1887_v42, %v7096_v22 }
 0x22d   : > { %vm4420_vm0 = vcmp.lt.s32.totalorder %v4419_v6, 0  ;;  %v1954_v0 = vshrl.u32 %v10216_v10, %v10284_v30  ;;  %v1889_v19 = vadd.s32 %v1888_v13, %v1884_v24  ;;  %v1940_v48 = vand.u32 8388607, %v1933_v11 }
 0x22e   : > { %v1796_v56 = vsel %vm4420_vm0, 0, %v4419_v6  ;;  %v1950_v35 = vshll.u32 %v10213_v25, %v10285_v26  ;;  %v1814_v8 = vsel %vm7118_vm15, 0, %v1812_v54  ;;  %v1953_v27 = vshll.u32 %v10215_v18, %v10285_v26 }
 0x22f   : > { %v1797_v45 = vsub.s32 32, %v1796_v56  ;;  %v1801_v36 = vsub.s32 4294967266, %v1796_v56  ;;  %vm1717_vm9 = vcmp.eq.s32.totalorder %v7125_v46, 0  ;;  %v1890_v58 = vadd.s32 536870912, %v1889_v19 }
 0x230   : > { %v1952_v22 = vor.u32 %v1951_v55, %v1950_v35  ;;  %v1956_v2 = vshll.u32 %v10216_v10, %v10285_v26  ;;  %v1957_v43 = vshrl.u32 %v10080_v17, %v10284_v30  ;;  %vm1716_vm12 = vcmp.lt.s32.totalorder %v7125_v46, 2  ;;  %v10286_v35 = vld [vmem:[#allocation146_spill] sm:$0xff] }
 0x231   : > { %v1798_v61 = vshll.u32 %v7075_v60, %v1796_v56  ;;  %v1799_v39 = vshrl.u32 %v1781_v57, %v1797_v45  ;;  %v1802_v20 = vadd.s32 127, %v1801_v36  ;;  %v1955_v31 = vor.u32 %v1954_v0, %v1953_v27  ;;  %v10287_v56 = vld [vmem:[#allocation159_spill] sm:$0xff]  ;;  %v10288_v45 = vld [vmem:[#allocation161_spill] sm:$0xff]  ;;  %v10289_v36 = vld [vmem:[#allocation154_spill] sm:$0xff] }
 0x232   : > { %vm1713_vm3 = vweird.f32 %v10253_v41  ;;  %vm1720_vm10 = vcmp.eq.s32.totalorder %v7125_v46, 2  ;;  %v1891_v33 = vshrl.u32 %v1890_v58, 30  ;;  %v1941_v6 = vor.u32 8388608, %v1940_v48 }
 0x233   : > { %v1958_v42 = vor.u32 %v1957_v43, %v1956_v2  ;;  %v1800_v54 = vor.u32 %v1799_v39, %v1798_v61  ;;  %v1803_v24 = vshll.u32 %v1802_v20, 23  ;;  %v1818_v55 = vadd.s32 3, %v1814_v8 }
 0x234   : > { %v1949_v13 = vshrl.u32 %v10213_v25, %v10284_v30  ;;  %v1892_v26 = vshll.u32 %v1891_v33, 30  ;;  %vm1965_vm13 = vcmp.lt.s32.totalorder %v10286_v35, 1  ;;  %vm1966_vm8 = vcmp.lt.s32.totalorder %v10286_v35, 2 }
 0x235   : > { %vm1967_vm4 = vcmp.lt.s32.totalorder %v10286_v35, 3  ;;  %v4740_v60 = vpop.eup %4739  ;;  %v1804_v57 = vor.u32 4788187, %v1803_v24  ;;  %v1973_v0 = vsel %vm1965_vm13, %v1952_v22, %v1955_v31  ;;  %v1970_v2 = vsel %vm1968_vm2, %v1958_v42, 2102212464 }
 0x236   : > { %v1975_v48 = vsel %vm1967_vm4, %v1958_v42, %v10287_v56  ;;  %v1979_v30 = vsel %vm1967_vm4, %v10289_v36, %v10288_v45  ;;  %v4742_v8 = vpop.eup %4741  ;;  %v1721_v27 = vxor.u32 2147483648, %v4740_v60  ;;  %v7169_v58 = vsub.s32 %v1889_v19, %v1892_v26 }
 0x237   : > { %v1981_v43 = vshll.u32 %v1941_v6, 8  ;;  %vm1831_vm1 = vcmp.lt.s32.totalorder %v10267_v7, 0  ;;  %v1718_v61 = vxor.u32 2147483648, %v4742_v8  ;;  %v1805_v39 = vand.u32 2147483647, %v1804_v57 }
 0x238   : > { %v1807_v20 = vcvt.s32.f32 %v1800_v54  ;;  %v1977_v24 = vsel %vm1965_vm13, %v1955_v31, %v1958_v42  ;;  %v1722_v56 = vsel %vm1720_vm10, %v1721_v27, %v4742_v8  ;;  %v1895_v45 = vsub.s32 0, %v7169_v58 }
 0x239   : > { %v1976_v19 = vsel %vm1966_vm8, %v1973_v0, %v1975_v48  ;;  %v1980_v26 = vsel %vm1966_vm8, %v1977_v24, %v1979_v30  ;;  %v1719_v6 = vsel %vm1717_vm9, %v4740_v60, %v1718_v61  ;;  %v1969_v27 = vsel %vm1965_vm13, %v1949_v13, %v1952_v22  ;;  %v10291_v22 = vld [vmem:[#allocation14_spill] sm:$0xff] }
 0x23a   : > { %v1808_v36 = vmul.f32 %v1807_v20, %v1805_v39  ;;  %v7185_v57 = vmul.u32.u64.low %v1981_v43, %v1980_v26  ;;  %v7186_v54 = vmul.u32.u64.high %v1981_v43, %v1980_v26, %v7185_v57  ;;  %v1723_v42 = vsel %vm1716_vm12, %v1719_v6, %v1722_v56  ;;  %v10290_v39 = vld [vmem:[#allocation41_spill] sm:$0xff] }
 0x23b   : > { %v4422_v8 = vmin.u32 %v1895_v45, %v7169_v58  ;;  %v1971_v0 = vsel %vm1967_vm4, %v1955_v31, %v1970_v2  ;;  %v1724_v48 = vsel %vm1713_vm3, nan, %v1723_v42  ;;  %v7203_v46 = vor.u32 %v6986_v5, %v6784_v23  ;;  %v10292_v45 = vld [vmem:[#allocation15_spill] sm:$0xff] }
 0x23c   : > { %v1809_v30 = vxor.u32 2147483648, %v1808_v36  ;;  %v7197_v60 = vmul.u32.u64.low %v1981_v43, %v1976_v19  ;;  %v7198_v61 = vmul.u32.u64.high %v1981_v43, %v1976_v19, %v7197_v60  ;;  %v1915_v56 = vsub.s32 4, %v1891_v33 }
 0x23d   : > { %v1897_v24 = vclz %v4422_v8  ;;  %v4054_v13 = vmul.f32 %v6628_v12, %v10291_v22  ;;  %v4118_v31 = vmul.f32 %v7089_v51, %v1724_v48  ;;  %v1972_v2 = vsel %vm1966_vm8, %v1969_v27, %v1971_v0  ;;  %v10295_v8 = vld [vmem:[#allocation105_spill] sm:$0xff] }
 0x23e   : > { %v1810_v41 = vsel %vm1727_vm14, %v1809_v30, %v1808_v36  ;;  %v7215_v23 = vmul.f32 %v6628_v12, %v10292_v45  ;;  %vm1990_vm2 = vc.u32 %v7186_v54, %v7197_v60  ;;  %v7222_v26 = vand.u32 3, %v1818_v55 }
 0x23f   : > { %v1813_v5 = vsel %vm7118_vm15, %v10257_v37, %v1810_v41  ;;  %v4423_v19 = vadd.s32 4294967294, %v1897_v24  ;;  %v4150_v6 = vadd.f32 %v4118_v31, %v4054_v13  ;;  %v1991_v35 = vadd.s32 1, %v7198_v61 }
 0x240   : > { %4743 = vcosq.f32 %v1813_v5  ;;  %v1916_v36 = vsel %vm1831_vm1, %v1915_v56, %v1891_v33  ;;  %v1988_v57 = vmul.u32 %v1981_v43, %v1972_v2  ;;  %vm7229_vm14 = vcmp.le.f32.partialorder %v1829_v15, 0.7853982  ;;  %v10296_v43 = vld [vmem:[#allocation143_spill] sm:$0xff] }
 0x241   : > { %4745 = vsinq.f32 %v1813_v5  ;;  %vm4424_vm7 = vcmp.lt.s32.totalorder %v4423_v19, 0  ;;  %4182 = vst [vmem:[%s6723_s15 + $0x48] sm:$0xff] %v4150_v6  ;;  %v1992_v55 = vsel %vm1990_vm2, %v1991_v35, %v7198_v61  ;;  %v2037_v27 = vand.u32 2147483647, %v10295_v8 }
 0x242   : > { %v1900_v42 = vsel %vm4424_vm7, 0, %v4423_v19  ;;  %v1885_v0 = vadd.s32 %v7095_v32, %v7082_v16  ;;  %v1993_v24 = vadd.s32 %v1992_v55, %v1988_v57  ;;  %v1918_v15 = vsel %vm7229_vm14, 0, %v1916_v36  ;;  %v10297_v16 = vld [vmem:[#allocation135_spill] sm:$0xff] }
 0x243   : > { %v1901_v48 = vsub.s32 32, %v1900_v42  ;;  %v1905_v30 = vsub.s32 4294967266, %v1900_v42  ;;  %v1902_v33 = vshll.u32 %v7169_v58, %v1900_v42  ;;  %v2055_v56 = vshrl.u32 %v10215_v18, %v10296_v43 }
 0x244   : > { %v2058_v22 = vshrl.u32 %v10216_v10, %v10296_v43  ;;  %vm1821_vm15 = vcmp.eq.s32.totalorder %v7222_v26, 0  ;;  %v1994_v41 = vadd.s32 536870912, %v1993_v24  ;;  %v2057_v32 = vshll.u32 %v10215_v18, %v10297_v16 }
 0x245   : > { %v1903_v61 = vshrl.u32 %v1885_v0, %v1901_v48  ;;  %v1906_v13 = vadd.s32 127, %v1905_v30  ;;  %vm1820_vm5 = vcmp.lt.s32.totalorder %v7222_v26, 2  ;;  %v2044_v58 = vand.u32 8388607, %v2037_v27  ;;  %v10298_v30 = vld [vmem:[#allocation149_spill] sm:$0xff] }
 0x246   : > { %v2054_v31 = vshll.u32 %v10213_v25, %v10297_v16  ;;  %v2060_v2 = vshll.u32 %v10216_v10, %v10297_v16  ;;  %v2061_v45 = vshrl.u32 %v10080_v17, %v10296_v43  ;;  %vm1817_vm0 = vweird.f32 %v10257_v37 }
 0x247   : > { %v1904_v5 = vor.u32 %v1903_v61, %v1902_v33  ;;  %v1907_v19 = vshll.u32 %v1906_v13, 23  ;;  %v1995_v6 = vshrl.u32 %v1994_v41, 30  ;;  %v2059_v35 = vor.u32 %v2058_v22, %v2057_v32  ;;  %v10299_v33 = vld [vmem:[#allocation163_spill] sm:$0xff]  ;;  %v10300_v61 = vld [vmem:[#allocation156_spill] sm:$0xff] }
 0x248   : > { %vm1824_vm9 = vcmp.eq.s32.totalorder %v7222_v26, 2  ;;  %v1922_v36 = vadd.s32 3, %v1918_v15  ;;  %v2056_v57 = vor.u32 %v2055_v56, %v2054_v31  ;;  %v2062_v42 = vor.u32 %v2061_v45, %v2060_v2 }
 0x249   : > { %v1908_v55 = vor.u32 4788187, %v1907_v19  ;;  %v1996_v0 = vshll.u32 %v1995_v6, 30  ;;  %v2053_v48 = vshrl.u32 %v10213_v25, %v10296_v43  ;;  %vm2071_vm12 = vcmp.lt.s32.totalorder %v10298_v30, 3 }
 0x24a   : > { %v4744_v16 = vpop.eup %4743  ;;  %v1911_v20 = vcvt.s32.f32 %v1904_v5  ;;  %v2045_v9 = vor.u32 8388608, %v2044_v58  ;;  %vm2069_vm3 = vcmp.lt.s32.totalorder %v10298_v30, 1  ;;  %v2083_v22 = vsel %vm2071_vm12, %v10300_v61, %v10299_v33 }
 0x24b   : > { %v4746_v15 = vpop.eup %4745  ;;  %v1825_v56 = vxor.u32 2147483648, %v4744_v16  ;;  %v1909_v13 = vand.u32 2147483647, %v1908_v55  ;;  %v7267_v41 = vsub.s32 %v1993_v24, %v1996_v0  ;;  %v2081_v32 = vsel %vm2069_vm3, %v2059_v35, %v2062_v42  ;;  %v10302_v55 = vld [vmem:[#allocation162_spill] sm:$0xff] }
 0x24c   : > { %vm1935_vm10 = vcmp.lt.s32.totalorder %v10283_v44, 0  ;;  %v1822_v43 = vxor.u32 2147483648, %v4746_v15  ;;  %vm2070_vm13 = vcmp.lt.s32.totalorder %v10298_v30, 2  ;;  %v2073_v31 = vsel %vm2069_vm3, %v2053_v48, %v2056_v57 }
 0x24d   : > { %v2077_v58 = vsel %vm2069_vm3, %v2056_v57, %v2059_v35  ;;  %v1826_v2 = vsel %vm1824_vm9, %v1825_v56, %v4746_v15  ;;  %v1912_v45 = vmul.f32 %v1911_v20, %v1909_v13  ;;  %v1999_v5 = vsub.s32 0, %v7267_v41 }
 0x24e   : > { %vm10301_vm8 = vcmp.lt.s32.totalorder %v10298_v30, 4  ;;  %v1823_v24 = vsel %vm1821_vm15, %v4744_v16, %v1822_v43  ;;  %v2079_v0 = vsel %vm2071_vm12, %v2062_v42, %v10302_v55  ;;  %v2084_v48 = vsel %vm2070_vm13, %v2081_v32, %v2083_v22  ;;  %v10304_v55 = vld [vmem:[#allocation16_spill] sm:$0xff] }
 0x24f   : > { %v2074_v19 = vsel %vm10301_vm8, %v2062_v42, 2102212464  ;;  %v2085_v57 = vshll.u32 %v2045_v9, 8  ;;  %v1827_v33 = vsel %vm1820_vm5, %v1823_v24, %v1826_v2  ;;  %v1913_v20 = vxor.u32 2147483648, %v1912_v45  ;;  %v10303_v2 = vld [vmem:[#allocation107_spill] sm:$0xff] }
 0x250   : > { %v4426_v61 = vmin.u32 %v1999_v5, %v7267_v41  ;;  %v2019_v15 = vsub.s32 4, %v1995_v6  ;;  %v1828_v56 = vsel %vm1817_vm0, nan, %v1827_v33  ;;  %v2075_v16 = vsel %vm2071_vm12, %v2059_v35, %v2074_v19  ;;  %v10307_v33 = vld [vmem:[#allocation152_spill] sm:$0xff] }
 0x251   : > { %v7290_v13 = vmul.u32.u64.low %v2085_v57, %v2084_v48  ;;  %v7291_v43 = vmul.u32.u64.high %v2085_v57, %v2084_v48, %v7290_v13  ;;  %v1914_v9 = vsel %vm1831_vm1, %v1913_v20, %v1912_v45  ;;  %v4119_v26 = vmul.f32 %v7089_v51, %v1828_v56 }
 0x252   : > { %v2001_v42 = vclz %v4426_v61  ;;  %v2080_v22 = vsel %vm2070_vm13, %v2077_v58, %v2079_v0  ;;  %v1917_v35 = vsel %vm7229_vm14, %v10267_v7, %v1914_v9  ;;  %v7303_v32 = vand.u32 3, %v1922_v36 }
 0x253   : > { %v10007_v5 = vand.u32 2147483647, %v10303_v2  ;;  %4747 = vcosq.f32 %v1917_v35  ;;  %v4151_v45 = vadd.f32 %v4119_v26, %v7215_v23  ;;  %v2076_v24 = vsel %vm2070_vm13, %v2073_v31, %v2075_v16 }
 0x254   : > { %v4427_v19 = vadd.s32 4294967294, %v2001_v42  ;;  %v7311_v58 = vmul.f32 %v6628_v12, %v10304_v55  ;;  %4749 = vsinq.f32 %v1917_v35  ;;  %vm7320_vm4 = vcmp.le.f32.partialorder %v1933_v11, 0.7853982 }
 0x255   : > { %v7313_v0 = vmul.u32.u64.low %v2085_v57, %v2080_v22  ;;  %v7314_v48 = vmul.u32.u64.high %v2085_v57, %v2080_v22, %v7313_v0  ;;  %4183 = vst [vmem:[%s6723_s15 + $0x50] sm:$0xff] %v4151_v45  ;;  %v1989_v23 = vadd.s32 %v7197_v60, %v7186_v54  ;;  %v7328_v12 = vsel %vm1935_vm10, %v2019_v15, %v1995_v6  ;;  %v10308_v54 = vld [vmem:[#allocation139_spill] sm:$0xff] }
 0x256   : > { %vm4428_vm1 = vcmp.lt.s32.totalorder %v4427_v19, 0  ;;  %v2092_v30 = vmul.u32 %v2085_v57, %v2076_v24  ;;  %v2148_v31 = vand.u32 8388607, %v10007_v5  ;;  %v2159_v20 = vshrl.u32 %v10215_v18, %v10307_v33 }
 0x257   : > { %v2004_v36 = vsel %vm4428_vm1, 0, %v4427_v19  ;;  %vm1928_vm2 = vcmp.eq.s32.totalorder %v7303_v32, 2  ;;  %vm2094_vm7 = vc.u32 %v7291_v43, %v7313_v0  ;;  %v2158_v60 = vshll.u32 %v10213_v25, %v10308_v54 }
 0x258   : > { %v2005_v11 = vsub.s32 32, %v2004_v36  ;;  %v2009_v61 = vsub.s32 4294967266, %v2004_v36  ;;  %vm1925_vm14 = vcmp.eq.s32.totalorder %v7303_v32, 0  ;;  %v2006_v6 = vshll.u32 %v7267_v41, %v2004_v36 }
 0x259   : > { %v2095_v57 = vadd.s32 1, %v7314_v48  ;;  %v2161_v15 = vshll.u32 %v10215_v18, %v10308_v54  ;;  %v2162_v56 = vshrl.u32 %v10216_v10, %v10307_v33  ;;  %vm1924_vm15 = vcmp.lt.s32.totalorder %v7303_v32, 2 }
 0x25a   : > { %v2007_v16 = vshrl.u32 %v1989_v23, %v2005_v11  ;;  %v2010_v13 = vadd.s32 127, %v2009_v61  ;;  %v2164_v9 = vshll.u32 %v10216_v10, %v10308_v54  ;;  %v2165_v26 = vshrl.u32 %v10080_v17, %v10307_v33  ;;  %v10309_v11 = vld [vmem:[#allocation155_spill] sm:$0xff] }
 0x25b   : > { %vm1921_vm5 = vweird.f32 %v10267_v7  ;;  %v2022_v41 = vsel %vm7320_vm4, 0, %v7328_v12  ;;  %v2096_v42 = vsel %vm2094_vm7, %v2095_v57, %v7314_v48  ;;  %v2160_v22 = vor.u32 %v2159_v20, %v2158_v60  ;;  %v10310_v48 = vld [vmem:[#allocation165_spill] sm:$0xff]  ;;  %v10311_v12 = vld [vmem:[#allocation158_spill] sm:$0xff] }
 0x25c   : > { %v2163_v35 = vor.u32 %v2162_v56, %v2161_v15  ;;  %v2008_v45 = vor.u32 %v2007_v16, %v2006_v6  ;;  %v2011_v19 = vshll.u32 %v2010_v13, 23  ;;  %v2097_v24 = vadd.s32 %v2096_v42, %v2092_v30 }
 0x25d   : > { %v2166_v55 = vor.u32 %v2165_v26, %v2164_v9  ;;  %v2149_v23 = vor.u32 8388608, %v2148_v31  ;;  %v2157_v36 = vshrl.u32 %v10213_v25, %v10307_v33  ;;  %vm2173_vm0 = vcmp.lt.s32.totalorder %v10309_v11, 1  ;;  %v4748_v61 = vpop.eup %4747  ;;  %v10312_v33 = vld [vmem:[#allocation164_spill] sm:$0xff] }
 0x25e   : > { %vm2175_vm9 = vcmp.lt.s32.totalorder %v10309_v11, 3  ;;  %v2012_v54 = vor.u32 4788187, %v2011_v19  ;;  %v2098_v5 = vadd.s32 536870912, %v2097_v24  ;;  %vm2174_vm12 = vcmp.lt.s32.totalorder %v10309_v11, 2  ;;  %v4750_v30 = vpop.eup %4749 }
 0x25f   : > { %v2187_v20 = vsel %vm2175_vm9, %v10311_v12, %v10310_v48  ;;  %v1929_v60 = vxor.u32 2147483648, %v4748_v61  ;;  %v2181_v31 = vsel %vm2173_vm0, %v2160_v22, %v2163_v35  ;;  %v2183_v6 = vsel %vm2175_vm9, %v2166_v55, %v10312_v33 }
 0x260   : > { %v2185_v57 = vsel %vm2173_vm0, %v2163_v35, %v2166_v55  ;;  %v1926_v15 = vxor.u32 2147483648, %v4750_v30  ;;  %v2013_v56 = vand.u32 2147483647, %v2012_v54  ;;  %v2015_v16 = vcvt.s32.f32 %v2008_v45 }
 0x261   : > { %v2099_v13 = vshrl.u32 %v2098_v5, 30  ;;  %vm2039_vm3 = vcmp.lt.s32.totalorder %v10295_v8, 0  ;;  %v1930_v9 = vsel %vm1928_vm2, %v1929_v60, %v4750_v30  ;;  %vm10313_vm13 = vcmp.lt.s32.totalorder %v10309_v11, 4 }
 0x262   : > { %v2178_v26 = vsel %vm10313_vm13, %v2166_v55, 2102212464  ;;  %v2188_v42 = vsel %vm2174_vm12, %v2185_v57, %v2187_v20  ;;  %v2189_v19 = vshll.u32 %v2149_v23, 8  ;;  %v1927_v48 = vsel %vm1925_vm14, %v4748_v61, %v1926_v15 }
 0x263   : > { %v2016_v12 = vmul.f32 %v2015_v16, %v2013_v56  ;;  %v2100_v33 = vshll.u32 %v2099_v13, 30  ;;  %v2184_v5 = vsel %vm2174_vm12, %v2181_v31, %v2183_v6  ;;  %v1931_v45 = vsel %vm1924_vm15, %v1927_v48, %v1930_v9  ;;  %v10316_v9 = vld [vmem:[#allocation94_spill] sm:$0xff] }
 0x264   : > { %v2177_v54 = vsel %vm2173_vm0, %v2157_v36, %v2160_v22  ;;  %v7387_v30 = vmul.u32.u64.low %v2189_v19, %v2188_v42  ;;  %v7388_v55 = vmul.u32.u64.high %v2189_v19, %v2188_v42, %v7387_v30  ;;  %v1932_v23 = vsel %vm1921_vm5, nan, %v1931_v45  ;;  %v10314_v22 = vld [vmem:[#allocation42_spill] sm:$0xff] }
 0x265   : > { %v2017_v20 = vxor.u32 2147483648, %v2016_v12  ;;  %v7392_v60 = vsub.s32 %v2097_v24, %v2100_v33  ;;  %v2179_v61 = vsel %vm2175_vm9, %v2163_v35, %v2178_v26  ;;  %v4120_v31 = vmul.f32 %v7089_v51, %v1932_v23  ;;  %v10315_v35 = vld [vmem:[#allocation108_spill] sm:$0xff] }
 0x266   : > { %v2026_v32 = vadd.s32 3, %v2022_v41  ;;  %v7397_v6 = vmul.u32.u64.low %v2189_v19, %v2184_v5  ;;  %v7398_v57 = vmul.u32.u64.high %v2189_v19, %v2184_v5, %v7397_v6  ;;  %v2123_v24 = vsub.s32 4, %v2099_v13  ;;  %v10319_v30 = vld [vmem:[#allocation144_spill] sm:$0xff] }
 0x267   : > { %v2018_v7 = vsel %vm1935_vm10, %v2017_v20, %v2016_v12  ;;  %v2103_v15 = vsub.s32 0, %v7392_v60  ;;  %v4152_v56 = vadd.f32 %v4120_v31, %v7311_v58  ;;  %v2180_v41 = vsel %vm2174_vm12, %v2177_v54, %v2179_v61  ;;  %v10320_v20 = vld [vmem:[#allocation153_spill] sm:$0xff]  ;;  %v10326_v26 = vld [vmem:[#allocation160_spill] sm:$0xff] }
 0x268   : > { %v2021_v51 = vsel %vm7320_vm4, %v10283_v44, %v2018_v7  ;;  %v10008_v16 = vand.u32 2147483647, %v10315_v35  ;;  %vm2198_vm10 = vc.u32 %v7388_v55, %v7397_v6  ;;  %v7417_v48 = vsub.s32 32, %v7105_v53 }
 0x269   : > { %4751 = vcosq.f32 %v2021_v51  ;;  %v4430_v42 = vmin.u32 %v2103_v15, %v7392_v60  ;;  %4184 = vst [vmem:[%s6723_s15 + $0x58] sm:$0xff] %v4152_v56  ;;  %v2027_v58 = vand.u32 3, %v2026_v32  ;;  %v2199_v40 = vadd.s32 1, %v7398_v57 }
 0x26a   : > { %4753 = vsinq.f32 %v2021_v51  ;;  %vm7423_vm8 = vcmp.le.f32.partialorder %v2037_v27, 0.7853982  ;;  %v2124_v33 = vsel %vm2039_vm3, %v2123_v24, %v2099_v13  ;;  %v2196_v5 = vmul.u32 %v2189_v19, %v2180_v41 }
 0x26b   : > { %v2105_v12 = vclz %v4430_v42  ;;  %v2200_v45 = vsel %vm2198_vm10, %v2199_v40, %v7398_v57  ;;  %v2252_v54 = vand.u32 8388607, %v10008_v16  ;;  %v2262_v23 = vshll.u32 %v10213_v25, %v10319_v30 }
 0x26c   : > { %v2263_v61 = vshrl.u32 %v10215_v18, %v10320_v20  ;;  %v2201_v31 = vadd.s32 %v2200_v45, %v2196_v5  ;;  %v2265_v32 = vshll.u32 %v10215_v18, %v10319_v30  ;;  %v2266_v13 = vshrl.u32 %v10216_v10, %v10320_v20 }
 0x26d   : > { %v4431_v27 = vadd.s32 4294967294, %v2105_v12  ;;  %vm2029_vm4 = vcmp.eq.s32.totalorder %v2027_v58, 0  ;;  %vm2032_vm1 = vcmp.eq.s32.totalorder %v2027_v58, 2  ;;  %v2268_v57 = vshll.u32 %v10216_v10, %v10319_v30  ;;  %v10321_v30 = vld [vmem:[#allocation157_spill] sm:$0xff] }
 0x26e   : > { %v2264_v19 = vor.u32 %v2263_v61, %v2262_v23  ;;  %v2269_v7 = vshrl.u32 %v10080_v17, %v10320_v20  ;;  %vm2028_vm2 = vcmp.lt.s32.totalorder %v2027_v58, 2  ;;  %v2093_v15 = vadd.s32 %v7313_v0, %v7291_v43  ;;  %v10322_v61 = vld [vmem:[#allocation101_spill] sm:$0xff] }
 0x26f   : > { %vm4432_vm7 = vcmp.lt.s32.totalorder %v4431_v27, 0  ;;  %v2202_v24 = vadd.s32 536870912, %v2201_v31  ;;  %v2267_v56 = vor.u32 %v2266_v13, %v2265_v32  ;;  %vm2025_vm14 = vweird.f32 %v10283_v44  ;;  %v10323_v32 = vld [vmem:[#allocation167_spill] sm:$0xff] }
 0x270   : > { %v2108_v51 = vsel %vm4432_vm7, 0, %v4431_v27  ;;  %v2126_v41 = vsel %vm7423_vm8, 0, %v2124_v33  ;;  %v2253_v42 = vor.u32 8388608, %v2252_v54  ;;  %v2270_v40 = vor.u32 %v2269_v7, %v2268_v57 }
 0x271   : > { %v2109_v12 = vsub.s32 32, %v2108_v51  ;;  %v2113_v5 = vsub.s32 4294967266, %v2108_v51  ;;  %v7449_v45 = vshrl.u32 %v2202_v24, 30  ;;  %vm2277_vm15 = vcmp.lt.s32.totalorder %v10321_v30, 1 }
 0x272   : > { %v2110_v23 = vshll.u32 %v7392_v60, %v2108_v51  ;;  %vm2278_vm5 = vcmp.lt.s32.totalorder %v10321_v30, 2  ;;  %vm2279_vm0 = vcmp.lt.s32.totalorder %v10321_v30, 3  ;;  %v2285_v43 = vsel %vm2277_vm15, %v2264_v19, %v2267_v56  ;;  %v10325_v51 = vld [vmem:[#allocation168_spill] sm:$0xff] }
 0x273   : > { %v4752_v0 = vpop.eup %4751  ;;  %vm3008_vm9 = vcmp.lt.s32.totalorder %v10322_v61, 4  ;;  %v2111_v33 = vshrl.u32 %v2093_v15, %v2109_v12  ;;  %v2114_v54 = vadd.s32 127, %v2113_v5  ;;  %v2204_v27 = vshll.u32 %v7449_v45, 30 }
 0x274   : > { %v2287_v13 = vsel %vm2279_vm0, %v2270_v40, %v10323_v32  ;;  %v4754_v57 = vpop.eup %4753  ;;  %v2033_v60 = vxor.u32 2147483648, %v4752_v0  ;;  %vm10324_vm12 = vcmp.lt.s32.totalorder %v10321_v30, 4  ;;  %v2289_v24 = vsel %vm2277_vm15, %v2267_v56, %v2270_v40 }
 0x275   : > { %v2282_v7 = vsel %vm10324_vm12, %v2270_v40, 2102212464  ;;  %v2291_v15 = vsel %vm2279_vm0, %v10326_v26, %v10325_v51  ;;  %v2030_v12 = vxor.u32 2147483648, %v4754_v57  ;;  %v2112_v5 = vor.u32 %v2111_v33, %v2110_v23 }
 0x276   : > { %v2115_v36 = vshll.u32 %v2114_v54, 23  ;;  %v7470_v16 = vsub.s32 %v2201_v31, %v2204_v27  ;;  %v2034_v32 = vsel %vm2032_vm1, %v2033_v60, %v4754_v57  ;;  %v2130_v37 = vadd.s32 3, %v2126_v41 }
 0x277   : > { %v2261_v49 = vshrl.u32 %v10213_v25, %v10320_v20  ;;  %v2288_v47 = vsel %vm2278_vm5, %v2285_v43, %v2287_v13  ;;  %v2031_v40 = vsel %vm2029_vm4, %v4752_v0, %v2030_v12  ;;  %v2292_v26 = vsel %vm2278_vm5, %v2289_v24, %v2291_v15  ;;  %v10328_v15 = vld [vmem:[#allocation32_spill] sm:$0xff] }
 0x278   : > { %v2116_v21 = vor.u32 4788187, %v2115_v36  ;;  %v2207_v62 = vsub.s32 0, %v7470_v16  ;;  %v2035_v31 = vsel %vm2028_vm2, %v2031_v40, %v2034_v32  ;;  %v2283_v41 = vsel %vm2279_vm0, %v2267_v56, %v2282_v7  ;;  %v10329_v40 = vld [vmem:[#allocation140_spill] sm:$0xff] }
 0x279   : > { %v2281_v23 = vsel %vm2277_vm15, %v2261_v49, %v2264_v19  ;;  %v2293_v20 = vshll.u32 %v2253_v42, 8  ;;  %v2036_v43 = vsel %vm2025_vm14, nan, %v2035_v31  ;;  %v2119_v0 = vcvt.s32.f32 %v2112_v5  ;;  %v10330_v31 = vld [vmem:[#allocation43_spill] sm:$0xff] }
 0x27a   : > { %v2117_v33 = vand.u32 2147483647, %v2116_v21  ;;  %v4434_v36 = vmin.u32 %v2207_v62, %v7470_v16  ;;  %vm2143_vm13 = vcmp.lt.s32.totalorder %v10303_v2, 0  ;;  %v7499_v49 = vshll.u32 %v10080_v17, %v7105_v53  ;;  %v7505_v21 = vpop.permute.xlu1 %4090 }
 0x27b   : > { %v7489_v54 = vmul.u32.u64.low %v2293_v20, %v2292_v26  ;;  %v7490_v27 = vmul.u32.u64.high %v2293_v20, %v2292_v26, %v7489_v54  ;;  %v7492_v13 = vmul.u32.u64.low %v2293_v20, %v2288_v47  ;;  %v7493_v58 = vmul.u32.u64.high %v2293_v20, %v2288_v47, %v7492_v13 }
 0x27c   : > { %v7503_v44 = vshll.u32 %v10087_v14, %v7105_v53  ;;  %v2120_v62 = vmul.f32 %v2119_v0, %v2117_v33  ;;  %v2209_v19 = vclz %v4434_v36  ;;  %v7510_v47 = vsel %vm3008_vm9, %v7203_v46, 920167782  ;;  %v10331_v36 = vld [vmem:[#allocation50_spill] sm:$0xff] }
 0x27d   : > { %v10327_v56 = vor.u32 %v7002_v4, %v6874_v52  ;;  %v2284_v57 = vsel %vm2278_vm5, %v2281_v23, %v2283_v41  ;;  %v4121_v60 = vmul.f32 %v7505_v21, %v2036_v43  ;;  %v2197_v24 = vadd.s32 %v7397_v6, %v7388_v55 }
 0x27e   : > { %v2121_v7 = vxor.u32 2147483648, %v2120_v62  ;;  %v4435_v51 = vadd.s32 4294967294, %v2209_v19  ;;  %v1101_v12 = vand.u32 2147483647, %v10328_v15  ;;  %v7525_v5 = vand.u32 3, %v2130_v37 }
 0x27f   : > { %v7517_v42 = vsel %vm3008_vm9, %v10327_v56, 1326507024  ;;  %v2227_v52 = vsub.s32 4, %v7449_v45  ;;  %vm2302_vm10 = vc.u32 %v7490_v27, %v7492_v13  ;;  %v2303_v4 = vadd.s32 1, %v7493_v58 }
 0x280   : > { %v2122_v30 = vsel %vm2039_vm3, %v2121_v7, %v2120_v62  ;;  %vm4436_vm4 = vcmp.lt.s32.totalorder %v4435_v51, 0  ;;  %v2300_v32 = vmul.u32 %v2293_v20, %v2284_v57  ;;  %v4153_v55 = vadd.f32 %v4121_v60, %v10329_v40 }
 0x281   : > { %v2125_v6 = vsel %vm7423_vm8, %v10295_v8, %v2122_v30  ;;  %v2212_v37 = vsel %vm4436_vm4, 0, %v4435_v51  ;;  %v2304_v26 = vsel %vm2302_vm10, %v2303_v4, %v7493_v58  ;;  %v1118_v23 = vshll.u32 %v10213_v25, %v10330_v31 }
 0x282   : > { %4755 = vcosq.f32 %v2125_v6  ;;  %v2213_v41 = vsub.s32 32, %v2212_v37  ;;  %v2217_v43 = vsub.s32 4294967266, %v2212_v37  ;;  %4185 = vst [vmem:[%s6723_s15 + $0x60] sm:$0xff] %v4153_v55  ;;  %v1108_v33 = vand.u32 8388607, %v1101_v12 }
 0x283   : > { %4757 = vsinq.f32 %v2125_v6  ;;  %v2214_v20 = vshll.u32 %v7470_v16, %v2212_v37  ;;  %v2305_v0 = vadd.s32 %v2304_v26, %v2300_v32  ;;  %v1119_v11 = vshrl.u32 %v10215_v18, %v10331_v36 }
 0x284   : > { %v2215_v54 = vshrl.u32 %v2197_v24, %v2213_v41  ;;  %v2218_v62 = vadd.s32 127, %v2217_v43  ;;  %v1121_v58 = vshll.u32 %v10215_v18, %v10330_v31  ;;  %v1122_v19 = vshrl.u32 %v10216_v10, %v10331_v36  ;;  %v10336_v43 = vld [vmem:[#allocation62_spill] sm:$0xff] }
 0x285   : > { %v2228_v56 = vsel %vm2143_vm13, %v2227_v52, %v7449_v45  ;;  %v2306_v57 = vadd.s32 536870912, %v2305_v0  ;;  %v1124_v16 = vshll.u32 %v10216_v10, %v10330_v31  ;;  %v1125_v60 = vshrl.u32 %v10080_v17, %v10331_v36  ;;  %v10335_v31 = vld [vmem:[#allocation47_spill] sm:$0xff] }
 0x286   : > { %v2216_v7 = vor.u32 %v2215_v54, %v2214_v20  ;;  %v2219_v24 = vshll.u32 %v2218_v62, 23  ;;  %v1120_v51 = vor.u32 %v1119_v11, %v1118_v23  ;;  %v1123_v4 = vor.u32 %v1122_v19, %v1121_v58  ;;  %v10337_v62 = vld [vmem:[#allocation63_spill] sm:$0xff]  ;;  %v10338_v58 = vld [vmem:[#allocation56_spill] sm:$0xff] }
 0x287   : > { %vm2133_vm3 = vcmp.eq.s32.totalorder %v7525_v5, 0  ;;  %v10332_v30 = vand.u32 2147483647, %v10303_v2  ;;  %v2307_v45 = vshrl.u32 %v2306_v57, 30  ;;  %v1126_v52 = vor.u32 %v1125_v60, %v1124_v16 }
 0x288   : > { %vm2132_vm1 = vcmp.lt.s32.totalorder %v7525_v5, 2  ;;  %vm2136_vm2 = vcmp.eq.s32.totalorder %v7525_v5, 2  ;;  %v2220_v40 = vor.u32 4788187, %v2219_v24  ;;  %v1109_v6 = vor.u32 8388608, %v1108_v33 }
 0x289   : > { %vm7560_vm8 = vcmp.le.f32.partialorder %v10332_v30, 0.7853982  ;;  %vm2129_vm7 = vweird.f32 %v10295_v8  ;;  %v2223_v37 = vcvt.s32.f32 %v2216_v7  ;;  %v2308_v26 = vshll.u32 %v2307_v45, 30 }
 0x28a   : > { %v2230_v55 = vsel %vm7560_vm8, 0, %v2228_v56  ;;  %vm1133_vm14 = vcmp.lt.s32.totalorder %v10335_v31, 1  ;;  %vm1135_vm15 = vcmp.lt.s32.totalorder %v10335_v31, 3  ;;  %v2221_v23 = vand.u32 2147483647, %v2220_v40 }
 0x28b   : > { %v1141_v41 = vsel %vm1133_vm14, %v1120_v51, %v1123_v4  ;;  %v1143_v20 = vsel %vm1135_vm15, %v1126_v52, %v10336_v43  ;;  %v1145_v11 = vsel %vm1133_vm14, %v1123_v4, %v1126_v52  ;;  %v2234_v33 = vadd.s32 3, %v2230_v55 }
 0x28c   : > { %v7578_v54 = vsub.s32 %v2305_v0, %v2308_v26  ;;  %vm1134_vm5 = vcmp.lt.s32.totalorder %v10335_v31, 2  ;;  %v1147_v19 = vsel %vm1135_vm15, %v10338_v58, %v10337_v62  ;;  %v4756_v56 = vpop.eup %4755  ;;  %vm2247_vm0 = vcmp.lt.s32.totalorder %v10315_v35, 0 }
 0x28d   : > { %v2224_v57 = vmul.f32 %v2223_v37, %v2221_v23  ;;  %vm10339_vm12 = vcmp.lt.s32.totalorder %v10335_v31, 4  ;;  %v1148_v60 = vsel %vm1134_vm5, %v1145_v11, %v1147_v19  ;;  %v1149_v7 = vshll.u32 %v1109_v6, 8  ;;  %v4758_v0 = vpop.eup %4757  ;;  %v10344_v31 = vld [vmem:[#allocation33_spill] sm:$0xff] }
 0x28e   : > { %v1138_v16 = vsel %vm10339_vm12, %v1126_v52, 2102212464  ;;  %v2137_v24 = vxor.u32 2147483648, %v4756_v56  ;;  %v2311_v30 = vsub.s32 0, %v7578_v54  ;;  %v1117_v40 = vshrl.u32 %v10213_v25, %v10331_v36 }
 0x28f   : > { %v1144_v55 = vsel %vm1134_vm5, %v1141_v41, %v1143_v20  ;;  %v2134_v26 = vxor.u32 2147483648, %v4758_v0  ;;  %v2225_v43 = vxor.u32 2147483648, %v2224_v57  ;;  %v1139_v62 = vsel %vm1135_vm15, %v1123_v4, %v1138_v16 }
 0x290   : > { %v7595_v37 = vmul.u32.u64.low %v1149_v7, %v1148_v60  ;;  %v7596_v23 = vmul.u32.u64.high %v1149_v7, %v1148_v60, %v7595_v37  ;;  %v2138_v52 = vsel %vm2136_vm2, %v2137_v24, %v4758_v0  ;;  %v4438_v6 = vmin.u32 %v2311_v30, %v7578_v54 }
 0x291   : > { %v1137_v11 = vsel %vm1133_vm14, %v1117_v40, %v1120_v51  ;;  %v2135_v36 = vsel %vm2133_vm3, %v4756_v56, %v2134_v26  ;;  %v2226_v41 = vsel %vm2143_vm13, %v2225_v43, %v2224_v57  ;;  %v2331_v0 = vsub.s32 4, %v2307_v45  ;;  %v10345_v26 = vld [vmem:[#allocation141_spill] sm:$0xff] }
 0x292   : > { %v7609_v20 = vmul.u32.u64.low %v1149_v7, %v1144_v55  ;;  %v7610_v58 = vmul.u32.u64.high %v1149_v7, %v1144_v55, %v7609_v20  ;;  %v2139_v19 = vsel %vm2132_vm1, %v2135_v36, %v2138_v52  ;;  %v2229_v51 = vsel %vm7560_vm8, %v10303_v2, %v2226_v41 }
 0x293   : > { %v2313_v60 = vclz %v4438_v6  ;;  %v2140_v4 = vsel %vm2129_vm7, nan, %v2139_v19  ;;  %4759 = vcosq.f32 %v2229_v51  ;;  %v7620_v56 = vand.u32 3, %v2234_v33 }
 0x294   : > { %v1140_v57 = vsel %vm1134_vm5, %v1137_v11, %v1139_v62  ;;  %v10340_v16 = vand.u32 2139095040, %v10280_v28  ;;  %4761 = vsinq.f32 %v2229_v51  ;;  %v4122_v32 = vmul.f32 %v7505_v21, %v2140_v4  ;;  %v10346_v11 = vld [vmem:[#allocation51_spill] sm:$0xff]  ;;  %v10347_v51 = vld [vmem:[#allocation44_spill] sm:$0xff] }
 0x295   : > { %v4439_v5 = vadd.s32 4294967294, %v2313_v60  ;;  %v10341_v30 = vand.u32 2147483647, %v10315_v35  ;;  %vm1158_vm10 = vc.u32 %v7596_v23, %v7609_v20  ;;  %v1159_v8 = vadd.s32 1, %v7610_v58 }
 0x296   : > { %v7626_v24 = vshrl.u32 %v10340_v16, 23  ;;  %v10015_v33 = vand.u32 2147483647, %v10344_v31  ;;  %v7641_v55 = vsel %vm2247_vm0, %v2331_v0, %v2307_v45  ;;  %v4154_v43 = vadd.f32 %v4122_v32, %v10345_v26 }
 0x297   : > { %vm7631_vm13 = vcmp.le.f32.partialorder %v10341_v30, 0.7853982  ;;  %vm4440_vm4 = vcmp.lt.s32.totalorder %v4439_v5, 0  ;;  %v1156_v37 = vmul.u32 %v1149_v7, %v1140_v57  ;;  %vm2240_vm3 = vcmp.eq.s32.totalorder %v7620_v56, 2 }
 0x298   : > { %v2316_v52 = vsel %vm4440_vm4, 0, %v4439_v5  ;;  %v1160_v6 = vsel %vm1158_vm10, %v1159_v8, %v7610_v58  ;;  %v1223_v62 = vshrl.u32 %v10215_v18, %v10346_v11  ;;  %vm2237_vm8 = vcmp.eq.s32.totalorder %v7620_v56, 0  ;;  %4186 = vst [vmem:[%s6723_s15 + $0x68] sm:$0xff] %v4154_v43 }
 0x299   : > { %v2301_v36 = vadd.s32 %v7492_v13, %v7490_v27  ;;  %v2317_v41 = vsub.s32 32, %v2316_v52  ;;  %v2321_v19 = vsub.s32 4294967266, %v2316_v52  ;;  %v1161_v45 = vadd.s32 %v1160_v6, %v1156_v37 }
 0x29a   : > { %vm2236_vm1 = vcmp.lt.s32.totalorder %v7620_v56, 2  ;;  %v2334_v7 = vsel %vm7631_vm13, 0, %v7641_v55  ;;  %v1212_v58 = vand.u32 8388607, %v10015_v33  ;;  %v1222_v60 = vshll.u32 %v10213_v25, %v10347_v51 }
 0x29b   : > { %v1226_v0 = vshrl.u32 %v10216_v10, %v10346_v11  ;;  %vm2233_vm2 = vweird.f32 %v10303_v2  ;;  %v2318_v27 = vshll.u32 %v7578_v54, %v2316_v52  ;;  %v2319_v13 = vshrl.u32 %v2301_v36, %v2317_v41 }
 0x29c   : > { %v2322_v4 = vadd.s32 127, %v2321_v19  ;;  %v1162_v57 = vadd.s32 536870912, %v1161_v45  ;;  %v1224_v16 = vor.u32 %v1223_v62, %v1222_v60  ;;  %v1225_v5 = vshll.u32 %v10215_v18, %v10347_v51  ;;  %v10348_v62 = vld [vmem:[#allocation53_spill] sm:$0xff] }
 0x29d   : > { %v1228_v32 = vshll.u32 %v10216_v10, %v10347_v51  ;;  %v1229_v30 = vshrl.u32 %v10080_v17, %v10346_v11  ;;  %v2320_v8 = vor.u32 %v2319_v13, %v2318_v27  ;;  %v1221_v43 = vshrl.u32 %v10213_v25, %v10346_v11  ;;  %v4760_v54 = vpop.eup %4759 }
 0x29e   : > { %v2323_v55 = vshll.u32 %v2322_v4, 23  ;;  %v1163_v26 = vshrl.u32 %v1162_v57, 30  ;;  %v1213_v37 = vor.u32 8388608, %v1212_v58  ;;  %v1227_v52 = vor.u32 %v1226_v0, %v1225_v5  ;;  %v4762_v36 = vpop.eup %4761 }
 0x29f   : > { %v1230_v6 = vor.u32 %v1229_v30, %v1228_v32  ;;  %vm1237_vm7 = vcmp.lt.s32.totalorder %v10348_v62, 1  ;;  %vm1103_vm14 = vcmp.lt.s32.totalorder %v10328_v15, 0  ;;  %v2241_v41 = vxor.u32 2147483648, %v4760_v54  ;;  %v10350_v30 = vld [vmem:[#allocation67_spill] sm:$0xff] }
 0x2a0   : > { %v2324_v19 = vor.u32 4788187, %v2323_v55  ;;  %v1164_v51 = vshll.u32 %v1163_v26, 30  ;;  %vm1238_vm15 = vcmp.lt.s32.totalorder %v10348_v62, 2  ;;  %v2238_v60 = vxor.u32 2147483648, %v4762_v36 }
 0x2a1   : > { %v2327_v27 = vcvt.s32.f32 %v2320_v8  ;;  %vm1239_vm5 = vcmp.lt.s32.totalorder %v10348_v62, 3  ;;  %v1241_v11 = vsel %vm1237_vm7, %v1221_v43, %v1224_v16  ;;  %v2242_v58 = vsel %vm2240_vm3, %v2241_v41, %v4762_v36  ;;  %v10351_v8 = vld [vmem:[#allocation59_spill] sm:$0xff]  ;;  %v10352_v41 = vld [vmem:[#allocation65_spill] sm:$0xff] }
 0x2a2   : > { %v2325_v0 = vand.u32 2147483647, %v2324_v19  ;;  %v7680_v13 = vsub.s32 %v1161_v45, %v1164_v51  ;;  %vm10349_vm12 = vcmp.lt.s32.totalorder %v10348_v62, 4  ;;  %v2239_v57 = vsel %vm2237_vm8, %v4760_v54, %v2238_v60 }
 0x2a3   : > { %v1242_v4 = vsel %vm10349_vm12, %v1230_v6, 2102212464  ;;  %v1187_v5 = vsub.s32 4, %v1163_v26  ;;  %v1245_v32 = vsel %vm1237_vm7, %v1224_v16, %v1227_v52  ;;  %v1251_v55 = vsel %vm1239_vm5, %v10351_v8, %v10350_v30 }
 0x2a4   : > { %v2243_v43 = vsel %vm2236_vm1, %v2239_v57, %v2242_v58  ;;  %v2328_v36 = vmul.f32 %v2327_v27, %v2325_v0  ;;  %v1167_v45 = vsub.s32 0, %v7680_v13  ;;  %v1247_v19 = vsel %vm1239_vm5, %v1230_v6, %v10352_v41 }
 0x2a5   : > { %v2244_v51 = vsel %vm2233_vm2, nan, %v2243_v43  ;;  %v1243_v33 = vsel %vm1239_vm5, %v1227_v52, %v1242_v4  ;;  %v1249_v54 = vsel %vm1237_vm7, %v1227_v52, %v1230_v6  ;;  %v1253_v60 = vshll.u32 %v1213_v37, 8  ;;  %v10354_v6 = vld [vmem:[#allocation147_spill] sm:$0xff] }
 0x2a6   : > { %v2329_v16 = vxor.u32 2147483648, %v2328_v36  ;;  %v4123_v30 = vmul.f32 %v7505_v21, %v2244_v51  ;;  %v4394_v56 = vmin.u32 %v1167_v45, %v7680_v13  ;;  %v1252_v27 = vsel %vm1238_vm15, %v1249_v54, %v1251_v55 }
 0x2a7   : > { %v10353_v58 = vand.u32 2139095040, %v10290_v39  ;;  %v1248_v2 = vsel %vm1238_vm15, %v1245_v32, %v1247_v19  ;;  %v7708_v4 = vmul.u32.u64.low %v1253_v60, %v1252_v27  ;;  %v7709_v57 = vmul.u32.u64.high %v1253_v60, %v1252_v27, %v7708_v4 }
 0x2a8   : > { %v2330_v37 = vsel %vm2247_vm0, %v2329_v16, %v2328_v36  ;;  %v2338_v52 = vadd.s32 3, %v2334_v7  ;;  %v4155_v8 = vadd.f32 %v4123_v30, %v10354_v6  ;;  %v1169_v43 = vclz %v4394_v56  ;;  %v10358_v30 = vld [vmem:[#allocation54_spill] sm:$0xff] }
 0x2a9   : > { %v7704_v0 = vshrl.u32 %v10353_v58, 23  ;;  %v7716_v55 = vshrl.u32 %v10087_v14, %v7417_v48  ;;  %v2333_v45 = vsel %vm7631_vm13, %v10315_v35, %v2330_v37  ;;  %v1188_v32 = vsel %vm1103_vm14, %v1187_v5, %v1163_v26  ;;  %v10357_v26 = vld [vmem:[#allocation34_spill] sm:$0xff] }
 0x2aa   : > { %v1244_v41 = vsel %vm1238_vm15, %v1241_v11, %v1243_v33  ;;  %4763 = vcosq.f32 %v2333_v45  ;;  %4187 = vst [vmem:[%s6723_s15 + $0x70] sm:$0xff] %v4155_v8  ;;  %v4395_v7 = vadd.s32 4294967294, %v1169_v43  ;;  %v7732_v51 = vshrl.u32 %v10092_v63, %v7417_v48 }
 0x2ab   : > { %v7726_v36 = vmul.u32.u64.low %v1253_v60, %v1248_v2  ;;  %v7727_v19 = vmul.u32.u64.high %v1253_v60, %v1248_v2, %v7726_v36  ;;  %4765 = vsinq.f32 %v2333_v45  ;;  %vm7736_vm0 = vcmp.le.f32.partialorder %v1101_v12, 0.7853982 }
 0x2ac   : > { %v10016_v33 = vand.u32 2147483647, %v10357_v26  ;;  %v2339_v62 = vand.u32 3, %v2338_v52  ;;  %v1157_v11 = vadd.s32 %v7609_v20, %v7596_v23  ;;  %vm4396_vm13 = vcmp.lt.s32.totalorder %v4395_v7, 0  ;;  %v10359_v20 = vld [vmem:[#allocation52_spill] sm:$0xff] }
 0x2ad   : > { %v1190_v5 = vsel %vm7736_vm0, 0, %v1188_v32  ;;  %v1172_v54 = vsel %vm4396_vm13, 0, %v4395_v7  ;;  %v1260_v16 = vmul.u32 %v1253_v60, %v1244_v41  ;;  %vm1262_vm10 = vc.u32 %v7709_v57, %v7726_v36 }
 0x2ae   : > { %v1327_v12 = vshrl.u32 %v10215_v18, %v10358_v30  ;;  %v1173_v56 = vsub.s32 32, %v1172_v54  ;;  %v1177_v27 = vsub.s32 4294967266, %v1172_v54  ;;  %v1263_v58 = vadd.s32 1, %v7727_v19 }
 0x2af   : > { %v1316_v2 = vand.u32 8388607, %v10016_v33  ;;  %v1174_v23 = vshll.u32 %v7680_v13, %v1172_v54  ;;  %v1329_v4 = vshll.u32 %v10215_v18, %v10359_v20  ;;  %v1330_v60 = vshrl.u32 %v10216_v10, %v10358_v30 }
 0x2b0   : > { %v1332_v37 = vshll.u32 %v10216_v10, %v10359_v20  ;;  %v1175_v52 = vshrl.u32 %v1157_v11, %v1173_v56  ;;  %v1178_v6 = vadd.s32 127, %v1177_v27  ;;  %v1264_v8 = vsel %vm1262_vm10, %v1263_v58, %v7727_v19 }
 0x2b1   : > { %v1333_v43 = vshrl.u32 %v10080_v17, %v10358_v30  ;;  %vm2337_vm4 = vweird.f32 %v10315_v35  ;;  %vm2340_vm3 = vcmp.lt.s32.totalorder %v2339_v62, 2  ;;  %vm2341_vm8 = vcmp.eq.s32.totalorder %v2339_v62, 0 }
 0x2b2   : > { %v1265_v13 = vadd.s32 %v1264_v8, %v1260_v16  ;;  %v1326_v45 = vshll.u32 %v10213_v25, %v10359_v20  ;;  %v1176_v32 = vor.u32 %v1175_v52, %v1174_v23  ;;  %v1179_v41 = vshll.u32 %v1178_v6, 23  ;;  %v10360_v16 = vld [vmem:[#allocation57_spill] sm:$0xff] }
 0x2b3   : > { %v1331_v7 = vor.u32 %v1330_v60, %v1329_v4  ;;  %v1334_v54 = vor.u32 %v1333_v43, %v1332_v37  ;;  %vm2344_vm1 = vcmp.eq.s32.totalorder %v2339_v62, 2  ;;  %v1194_v11 = vadd.s32 3, %v1190_v5  ;;  %v10361_v4 = vld [vmem:[#allocation77_spill] sm:$0xff]  ;;  %v10362_v60 = vld [vmem:[#allocation64_spill] sm:$0xff] }
 0x2b4   : > { %v1266_v56 = vadd.s32 536870912, %v1265_v13  ;;  %v1328_v27 = vor.u32 %v1327_v12, %v1326_v45  ;;  %v4764_v19 = vpop.eup %4763  ;;  %vm1207_vm2 = vcmp.lt.s32.totalorder %v10344_v31, 0  ;;  %v1180_v58 = vor.u32 4788187, %v1179_v41 }
 0x2b5   : > { %v1317_v33 = vor.u32 8388608, %v1316_v2  ;;  %v1325_v39 = vshrl.u32 %v10213_v25, %v10358_v30  ;;  %vm1343_vm7 = vcmp.lt.s32.totalorder %v10360_v16, 3  ;;  %v4766_v8 = vpop.eup %4765  ;;  %v2345_v20 = vxor.u32 2147483648, %v4764_v19 }
 0x2b6   : > { %v1267_v23 = vshrl.u32 %v1266_v56, 30  ;;  %vm1341_vm15 = vcmp.lt.s32.totalorder %v10360_v16, 1  ;;  %v1355_v5 = vsel %vm1343_vm7, %v10362_v60, %v10361_v4  ;;  %v2342_v12 = vxor.u32 2147483648, %v4766_v8  ;;  %v10364_v4 = vld [vmem:[#allocation69_spill] sm:$0xff] }
 0x2b7   : > { %v1181_v37 = vand.u32 2147483647, %v1180_v58  ;;  %v1183_v52 = vcvt.s32.f32 %v1176_v32  ;;  %v1353_v2 = vsel %vm1341_vm15, %v1331_v7, %v1334_v54  ;;  %v2346_v30 = vsel %vm2344_vm1, %v2345_v20, %v4766_v8 }
 0x2b8   : > { %v1268_v6 = vshll.u32 %v1267_v23, 30  ;;  %vm1342_vm5 = vcmp.lt.s32.totalorder %v10360_v16, 2  ;;  %v1349_v43 = vsel %vm1341_vm15, %v1328_v27, %v1331_v7  ;;  %v2343_v45 = vsel %vm2341_vm8, %v4764_v19, %v2342_v12 }
 0x2b9   : > { %v1184_v41 = vmul.f32 %v1183_v52, %v1181_v37  ;;  %vm10363_vm12 = vcmp.lt.s32.totalorder %v10360_v16, 4  ;;  %v1351_v32 = vsel %vm1343_vm7, %v1334_v54, %v10364_v4  ;;  %v2347_v58 = vsel %vm2340_vm3, %v2343_v45, %v2346_v30 }
 0x2ba   : > { %v1346_v56 = vsel %vm10363_vm12, %v1334_v54, 2102212464  ;;  %v7787_v60 = vsub.s32 %v1265_v13, %v1268_v6  ;;  %v1291_v8 = vsub.s32 4, %v1267_v23  ;;  %v1356_v20 = vsel %vm1342_vm5, %v1353_v2, %v1355_v5  ;;  %v10365_v54 = vld [vmem:[#allocation35_spill] sm:$0xff] }
 0x2bb   : > { %v2348_v63 = vsel %vm2337_vm4, nan, %v2347_v58  ;;  %v1185_v19 = vxor.u32 2147483648, %v1184_v41  ;;  %v1345_v12 = vsel %vm1341_vm15, %v1325_v39, %v1328_v27  ;;  %v1357_v37 = vshll.u32 %v1317_v33, 8  ;;  %v10366_v39 = vld [vmem:[#allocation150_spill] sm:$0xff] }
 0x2bc   : > { %v4124_v52 = vmul.f32 %v7505_v21, %v2348_v63  ;;  %v1271_v62 = vsub.s32 0, %v7787_v60  ;;  %v1352_v13 = vsel %vm1342_vm5, %v1349_v43, %v1351_v32  ;;  %v10019_v30 = vand.u32 2147483647, %v10365_v54 }
 0x2bd   : > { %v1186_v5 = vsel %vm1103_vm14, %v1185_v19, %v1184_v41  ;;  %v1347_v35 = vsel %vm1343_vm7, %v1331_v7, %v1346_v56  ;;  %v7804_v2 = vmul.u32.u64.low %v1357_v37, %v1356_v20  ;;  %v7805_v6 = vmul.u32.u64.high %v1357_v37, %v1356_v20, %v7804_v2  ;;  %v10371_v19 = vld [vmem:[#allocation60_spill] sm:$0xff] }
 0x2be   : > { %v4156_v33 = vadd.f32 %v4124_v52, %v10366_v39  ;;  %v1189_v63 = vsel %vm7736_vm0, %v10328_v15, %v1186_v5  ;;  %v4398_v21 = vmin.u32 %v1271_v62, %v7787_v60  ;;  %v7814_v27 = vsel %vm1207_vm2, %v1291_v8, %v1267_v23  ;;  %v10370_v8 = vld [vmem:[#allocation55_spill] sm:$0xff] }
 0x2bf   : > { %4767 = vcosq.f32 %v1189_v63  ;;  %v7816_v43 = vand.u32 3, %v1194_v11  ;;  %v7818_v45 = vmul.u32.u64.low %v1357_v37, %v1352_v13  ;;  %v7819_v7 = vmul.u32.u64.high %v1357_v37, %v1352_v13, %v7818_v45 }
 0x2c0   : > { %4188 = vst [vmem:[%s6723_s15 + $0x78] sm:$0xff] %v4156_v33  ;;  %4769 = vsinq.f32 %v1189_v63  ;;  %v10367_v41 = vand.u32 2147483647, %v10344_v31  ;;  %v1273_v56 = vclz %v4398_v21  ;;  %v1420_v23 = vand.u32 8388607, %v10019_v30 }
 0x2c1   : > { %v1261_v11 = vadd.s32 %v7726_v36, %v7709_v57  ;;  %v1348_v32 = vsel %vm1342_vm5, %v1345_v12, %v1347_v35  ;;  %vm1366_vm0 = vc.u32 %v7805_v6, %v7818_v45  ;;  %v1430_v20 = vshll.u32 %v10213_v25, %v10370_v8 }
 0x2c2   : > { %vm7825_vm14 = vcmp.le.f32.partialorder %v10367_v41, 0.7853982  ;;  %v4399_v58 = vadd.s32 4294967294, %v1273_v56  ;;  %v1431_v52 = vshrl.u32 %v10215_v18, %v10371_v19  ;;  %v1433_v57 = vshll.u32 %v10215_v18, %v10370_v8 }
 0x2c3   : > { %vm1200_vm13 = vcmp.eq.s32.totalorder %v7816_v43, 2  ;;  %v1367_v36 = vadd.s32 1, %v7819_v7  ;;  %v1434_v16 = vshrl.u32 %v10216_v10, %v10371_v19  ;;  %v1436_v12 = vshll.u32 %v10216_v10, %v10370_v8 }
 0x2c4   : > { %v1437_v62 = vshrl.u32 %v10080_v17, %v10371_v19  ;;  %vm1197_vm10 = vcmp.eq.s32.totalorder %v7816_v43, 0  ;;  %vm4400_vm4 = vcmp.lt.s32.totalorder %v4399_v58, 0  ;;  %v1364_v13 = vmul.u32 %v1357_v37, %v1348_v32  ;;  %v10372_v32 = vld [vmem:[#allocation58_spill] sm:$0xff] }
 0x2c5   : > { %v1421_v5 = vor.u32 8388608, %v1420_v23  ;;  %v1432_v35 = vor.u32 %v1431_v52, %v1430_v20  ;;  %vm1196_vm3 = vcmp.lt.s32.totalorder %v7816_v43, 2  ;;  %v1276_v2 = vsel %vm4400_vm4, 0, %v4399_v58 }
 0x2c6   : > { %v1368_v39 = vsel %vm1366_vm0, %v1367_v36, %v7819_v7  ;;  %v1435_v33 = vor.u32 %v1434_v16, %v1433_v57  ;;  %v1438_v63 = vor.u32 %v1437_v62, %v1436_v12  ;;  %vm1193_vm8 = vweird.f32 %v10328_v15  ;;  %v10374_v36 = vld [vmem:[#allocation78_spill] sm:$0xff]  ;;  %v10380_v15 = vld [vmem:[#allocation9_spill] sm:$0xff] }
 0x2c7   : > { %v1277_v21 = vsub.s32 32, %v1276_v2  ;;  %v1281_v41 = vsub.s32 4294967266, %v1276_v2  ;;  %v1369_v56 = vadd.s32 %v1368_v39, %v1364_v13  ;;  %v1429_v37 = vshrl.u32 %v10213_v25, %v10371_v19  ;;  %v10375_v16 = vld [vmem:[#allocation82_spill] sm:$0xff]  ;;  %v7881_v13 = vpop.permute.xlu0 %4042 }
 0x2c8   : > { %v1278_v23 = vshll.u32 %v7787_v60, %v1276_v2  ;;  %vm1445_vm1 = vcmp.lt.s32.totalorder %v10372_v32, 1  ;;  %vm1446_vm7 = vcmp.lt.s32.totalorder %v10372_v32, 2  ;;  %vm1447_vm15 = vcmp.lt.s32.totalorder %v10372_v32, 3  ;;  %v10376_v12 = vld [vmem:[#allocation70_spill] sm:$0xff]  ;;  %10377 = vst [vmem:[#allocation90_spill] sm:$0xff] %v7881_v13 }
 0x2c9   : > { %v1279_v58 = vshrl.u32 %v1261_v11, %v1277_v21  ;;  %v1282_v7 = vadd.s32 127, %v1281_v41  ;;  %v1370_v8 = vadd.s32 536870912, %v1369_v56  ;;  %vm10373_vm5 = vcmp.lt.s32.totalorder %v10372_v32, 4  ;;  %v4768_v52 = vpop.eup %4767 }
 0x2ca   : > { %v1450_v20 = vsel %vm10373_vm5, %v1438_v63, 2102212464  ;;  %v1453_v57 = vsel %vm1445_vm1, %v1432_v35, %v1435_v33  ;;  %v1455_v60 = vsel %vm1447_vm15, %v1438_v63, %v10374_v36  ;;  %v1457_v19 = vsel %vm1445_vm1, %v1435_v33, %v1438_v63  ;;  %v4770_v62 = vpop.eup %4769 }
 0x2cb   : > { %v1459_v11 = vsel %vm1447_vm15, %v10376_v12, %v10375_v16  ;;  %vm1311_vm12 = vcmp.lt.s32.totalorder %v10357_v26, 0  ;;  %v1201_v2 = vxor.u32 2147483648, %v4768_v52  ;;  %v1280_v39 = vor.u32 %v1279_v58, %v1278_v23 }
 0x2cc   : > { %v1283_v21 = vshll.u32 %v1282_v7, 23  ;;  %v1371_v41 = vshrl.u32 %v1370_v8, 30  ;;  %v1198_v30 = vxor.u32 2147483648, %v4770_v62  ;;  %v1449_v36 = vsel %vm1445_vm1, %v1429_v37, %v1432_v35  ;;  %v7898_v37 = vpop.permute.xlu0 %4082 }
 0x2cd   : > { %v1460_v63 = vsel %vm1446_vm7, %v1457_v19, %v1459_v11  ;;  %v1461_v4 = vshll.u32 %v1421_v5, 8  ;;  %v1202_v16 = vsel %vm1200_vm13, %v1201_v2, %v4770_v62  ;;  %v1456_v13 = vsel %vm1446_vm7, %v1453_v57, %v1455_v60 }
 0x2ce   : > { %v1284_v12 = vor.u32 4788187, %v1283_v21  ;;  %v1372_v14 = vshll.u32 %v1371_v41, 30  ;;  %v1199_v23 = vsel %vm1197_vm10, %v4768_v52, %v1198_v30  ;;  %v1451_v58 = vsel %vm1447_vm15, %v1435_v33, %v1450_v20 }
 0x2cf   : > { %v7895_v7 = vmul.u32.u64.low %v1461_v4, %v1460_v63  ;;  %v7896_v35 = vmul.u32.u64.high %v1461_v4, %v1460_v63, %v7895_v7  ;;  %v1203_v5 = vsel %vm1196_vm3, %v1199_v23, %v1202_v16  ;;  %v1287_v19 = vcvt.s32.f32 %v1280_v39 }
 0x2d0   : > { %v1285_v8 = vand.u32 2147483647, %v1284_v12  ;;  %v7902_v11 = vsub.s32 %v1369_v56, %v1372_v14  ;;  %v1204_v57 = vsel %vm1193_vm8, nan, %v1203_v5  ;;  %v1395_v60 = vsub.s32 4, %v1371_v41 }
 0x2d1   : > { %v7906_v30 = vmul.u32.u64.low %v1461_v4, %v1456_v13  ;;  %v7907_v52 = vmul.u32.u64.high %v1461_v4, %v1456_v13, %v7906_v30  ;;  %v10378_v33 = vand.u32 2139095040, %v10314_v22  ;;  %v10379_v62 = vand.u32 2139095040, %v10316_v9 }
 0x2d2   : > { %v1288_v2 = vmul.f32 %v1287_v19, %v1285_v8  ;;  %v1375_v14 = vsub.s32 0, %v7902_v11  ;;  %v7920_v56 = vadd.s32 4294967169, %v7626_v24  ;;  %v4049_v39 = vmul.f32 %v6602_v3, %v10380_v15  ;;  %v10382_v8 = vld [vmem:[#allocation10_spill] sm:$0xff] }
 0x2d3   : > { %v7912_v20 = vshrl.u32 %v10378_v33, 23  ;;  %v7916_v43 = vshrl.u32 %v10379_v62, 23  ;;  %v10381_v13 = vsel %vm7825_vm14, 0, %v7814_v27  ;;  %v4113_v63 = vmul.f32 %v7898_v37, %v1204_v57  ;;  %v10383_v33 = vld [vmem:[#allocation128_spill] sm:$0xff] }
 0x2d4   : > { %v1298_v21 = vadd.s32 3, %v10381_v13  ;;  %v7930_v16 = vadd.s32 4294967169, %v7704_v0  ;;  %v1289_v12 = vxor.u32 2147483648, %v1288_v2  ;;  %v4402_v23 = vmin.u32 %v1375_v14, %v7902_v11 }
 0x2d5   : > { %v1452_v24 = vsel %vm1446_vm7, %v1449_v36, %v1451_v58  ;;  %v1396_v7 = vsel %vm1311_vm12, %v1395_v60, %v1371_v41  ;;  %vm1470_vm0 = vc.u32 %v7896_v35, %v7906_v30  ;;  %v1471_v27 = vadd.s32 1, %v7907_v52 }
 0x2d6   : > { %v4145_v5 = vadd.f32 %v4113_v63, %v4049_v39  ;;  %v7942_v0 = vmul.f32 %v6602_v3, %v10382_v8  ;;  %v1290_v19 = vsel %vm1207_vm2, %v1289_v12, %v1288_v2  ;;  %v1377_v57 = vclz %v4402_v23  ;;  %v10387_v39 = vld [vmem:[#allocation169_spill] sm:$0xff] }
 0x2d7   : > { %v10022_v32 = vand.u32 2147483647, %v10383_v33  ;;  %v1293_v41 = vsel %vm7825_vm14, %v10344_v31, %v1290_v19  ;;  %v7950_v36 = vand.u32 3, %v1298_v21  ;;  %v10384_v58 = vand.u32 2147483647, %v10357_v26  ;;  %v10388_v21 = vld [vmem:[#allocation171_spill] sm:$0xff] }
 0x2d8   : > { %v1468_v62 = vmul.u32 %v1461_v4, %v1452_v24  ;;  %4177 = vst [vmem:[%s6723_s15 + $0x20] sm:$0xff] %v4145_v5  ;;  %4771 = vcosq.f32 %v1293_v41  ;;  %v4403_v14 = vadd.s32 4294967294, %v1377_v57  ;;  %v1472_v15 = vsel %vm1470_vm0, %v1471_v27, %v7907_v52 }
 0x2d9   : > { %vm7954_vm13 = vcmp.le.f32.partialorder %v10384_v58, 0.7853982  ;;  %4773 = vsinq.f32 %v1293_v41  ;;  %v2782_v13 = vshll.u32 %v10213_v25, %v10387_v39  ;;  %v2783_v63 = vshrl.u32 %v10215_v18, %v10388_v21 }
 0x2da   : > { %v1398_v2 = vsel %vm7954_vm13, 0, %v1396_v7  ;;  %v1473_v40 = vadd.s32 %v1472_v15, %v1468_v62  ;;  %vm4404_vm2 = vcmp.lt.s32.totalorder %v4403_v14, 0  ;;  %v2772_v4 = vand.u32 8388607, %v10022_v32 }
 0x2db   : > { %v2786_v12 = vshrl.u32 %v10216_v10, %v10388_v21  ;;  %v2789_v23 = vshrl.u32 %v10080_v17, %v10388_v21  ;;  %v1380_v24 = vsel %vm4404_vm2, 0, %v4403_v14  ;;  %v2785_v7 = vshll.u32 %v10215_v18, %v10387_v39 }
 0x2dc   : > { %v1474_v52 = vadd.s32 536870912, %v1473_v40  ;;  %v2788_v27 = vshll.u32 %v10216_v10, %v10387_v39  ;;  %vm1304_vm14 = vcmp.eq.s32.totalorder %v7950_v36, 2  ;;  %v1365_v5 = vadd.s32 %v7818_v45, %v7805_v6 }
 0x2dd   : > { %v1381_v8 = vsub.s32 32, %v1380_v24  ;;  %v1385_v19 = vsub.s32 4294967266, %v1380_v24  ;;  %vm1301_vm10 = vcmp.eq.s32.totalorder %v7950_v36, 0  ;;  %v2784_v41 = vor.u32 %v2783_v63, %v2782_v13 }
 0x2de   : > { %v1475_v57 = vshrl.u32 %v1474_v52, 30  ;;  %v2787_v58 = vor.u32 %v2786_v12, %v2785_v7  ;;  %v2790_v62 = vor.u32 %v2789_v23, %v2788_v27  ;;  %vm1415_vm4 = vcmp.lt.s32.totalorder %v10365_v54, 0  ;;  %v10389_v52 = vld [vmem:[#allocation174_spill] sm:$0xff] }
 0x2df   : > { %vm1300_vm3 = vcmp.lt.s32.totalorder %v7950_v36, 2  ;;  %v1382_v14 = vshll.u32 %v7902_v11, %v1380_v24  ;;  %v1383_v15 = vshrl.u32 %v1365_v5, %v1381_v8  ;;  %v1386_v39 = vadd.s32 127, %v1385_v19 }
 0x2e0   : > { %v1402_v32 = vadd.s32 3, %v1398_v2  ;;  %v1476_v9 = vshll.u32 %v1475_v57, 30  ;;  %v2773_v22 = vor.u32 8388608, %v2772_v4  ;;  %v2781_v6 = vshrl.u32 %v10213_v25, %v10388_v21 }
 0x2e1   : > { %vm2797_vm8 = vcmp.lt.s32.totalorder %v6331_v38, 1  ;;  %v1384_v45 = vor.u32 %v1383_v15, %v1382_v14  ;;  %v1387_v13 = vshll.u32 %v1386_v39, 23  ;;  %vm2798_vm1 = vcmp.lt.s32.totalorder %v6331_v38, 2 }
 0x2e2   : > { %vm2799_vm7 = vcmp.lt.s32.totalorder %v6331_v38, 3  ;;  %v7988_v63 = vsub.s32 %v1473_v40, %v1476_v9  ;;  %v2801_v12 = vsel %vm2797_vm8, %v2781_v6, %v2784_v41  ;;  %v2805_v11 = vsel %vm2797_vm8, %v2784_v41, %v2787_v58  ;;  %v4772_v24 = vpop.eup %4771 }
 0x2e3   : > { %v2809_v23 = vsel %vm2797_vm8, %v2787_v58, %v2790_v62  ;;  %v1388_v2 = vor.u32 4788187, %v1387_v13  ;;  %v2802_v4 = vsel %vm2800_vm6, %v2790_v62, 2102212464  ;;  %v2807_v21 = vsel %vm2799_vm7, %v2790_v62, %v6780_v50  ;;  %v4774_v27 = vpop.eup %4773 }
 0x2e4   : > { %v2811_v7 = vsel %vm2799_vm7, %v10389_v52, %v6794_v34  ;;  %v1305_v9 = vxor.u32 2147483648, %v4772_v24  ;;  %v1479_v40 = vsub.s32 0, %v7988_v63  ;;  %v1499_v5 = vsub.s32 4, %v1475_v57 }
 0x2e5   : > { %v2812_v8 = vsel %vm2798_vm1, %v2809_v23, %v2811_v7  ;;  %v1302_v19 = vxor.u32 2147483648, %v4774_v27  ;;  %v1389_v41 = vand.u32 2147483647, %v1388_v2  ;;  %v1391_v14 = vcvt.s32.f32 %v1384_v45 }
 0x2e6   : > { %v2813_v15 = vshll.u32 %v2773_v22, 8  ;;  %v1306_v50 = vsel %vm1304_vm14, %v1305_v9, %v4774_v27  ;;  %v4406_v62 = vmin.u32 %v1479_v40, %v7988_v63  ;;  %v2803_v34 = vsel %vm2799_vm7, %v2787_v58, %v2802_v4 }
 0x2e7   : > { %v2808_v39 = vsel %vm2798_vm1, %v2805_v11, %v2807_v21  ;;  %v1303_v6 = vsel %vm1301_vm10, %v4772_v24, %v1302_v19  ;;  %v1392_v13 = vmul.f32 %v1391_v14, %v1389_v41  ;;  %vm1297_vm6 = vweird.f32 %v10344_v31  ;;  %v10390_v24 = vld [vmem:[#allocation130_spill] sm:$0xff] }
 0x2e8   : > { %v8011_v23 = vmul.u32.u64.low %v2813_v15, %v2812_v8  ;;  %v8012_v52 = vmul.u32.u64.high %v2813_v15, %v2812_v8, %v8011_v23  ;;  %v1307_v22 = vsel %vm1300_vm3, %v1303_v6, %v1306_v50  ;;  %v1481_v45 = vclz %v4406_v62  ;;  %v10394_v62 = vld [vmem:[#allocation170_spill] sm:$0xff] }
 0x2e9   : > { %v8019_v2 = vsel %vm1415_vm4, %v1499_v5, %v1475_v57  ;;  %v1308_v58 = vsel %vm1297_vm6, nan, %v1307_v22  ;;  %v1393_v4 = vxor.u32 2147483648, %v1392_v13  ;;  %v2804_v11 = vsel %vm2798_vm1, %v2801_v12, %v2803_v34  ;;  %v10395_v34 = vld [vmem:[#allocation172_spill] sm:$0xff] }
 0x2ea   : > { %v2869_v21 = vand.u32 2147483647, %v10390_v24  ;;  %v4407_v7 = vadd.s32 4294967294, %v1481_v45  ;;  %v4114_v27 = vmul.f32 %v7898_v37, %v1308_v58  ;;  %v8031_v57 = vand.u32 3, %v1402_v32 }
 0x2eb   : > { %v8025_v9 = vmul.u32.u64.low %v2813_v15, %v2808_v39  ;;  %v8026_v31 = vmul.u32.u64.high %v2813_v15, %v2808_v39, %v8025_v9  ;;  %v1394_v36 = vsel %vm1311_vm12, %v1393_v4, %v1392_v13  ;;  %v10391_v40 = vand.u32 2147483647, %v10365_v54 }
 0x2ec   : > { %v1469_v12 = vadd.s32 %v7906_v30, %v7896_v35  ;;  %v1397_v5 = vsel %vm7954_vm13, %v10357_v26, %v1394_v36  ;;  %vm4408_vm5 = vcmp.lt.s32.totalorder %v4407_v7, 0  ;;  %v4146_v32 = vadd.f32 %v4114_v27, %v7942_v0 }
 0x2ed   : > { %vm8035_vm15 = vcmp.le.f32.partialorder %v10391_v40, 0.7853982  ;;  %4775 = vcosq.f32 %v1397_v5  ;;  %v1484_v19 = vsel %vm4408_vm5, 0, %v4407_v7  ;;  %v2820_v41 = vmul.u32 %v2813_v15, %v2804_v11 }
 0x2ee   : > { %v1502_v8 = vsel %vm8035_vm15, 0, %v8019_v2  ;;  %v2876_v14 = vand.u32 8388607, %v2869_v21  ;;  %4777 = vsinq.f32 %v1397_v5  ;;  %v1485_v50 = vsub.s32 32, %v1484_v19  ;;  %4178 = vst [vmem:[%s6723_s15 + $0x28] sm:$0xff] %v4146_v32 }
 0x2ef   : > { %v1489_v35 = vsub.s32 4294967266, %v1484_v19  ;;  %vm2822_vm12 = vc.u32 %v8012_v52, %v8025_v9  ;;  %v1486_v30 = vshll.u32 %v7988_v63, %v1484_v19  ;;  %v2823_v60 = vadd.s32 1, %v8026_v31 }
 0x2f0   : > { %v2886_v0 = vshll.u32 %v10213_v25, %v10394_v62  ;;  %v2887_v15 = vshrl.u32 %v10215_v18, %v10395_v34  ;;  %v1487_v39 = vshrl.u32 %v1469_v12, %v1485_v50  ;;  %v2889_v13 = vshll.u32 %v10215_v18, %v10394_v62 }
 0x2f1   : > { %v1490_v6 = vadd.s32 127, %v1489_v35  ;;  %v2890_v23 = vshrl.u32 %v10216_v10, %v10395_v34  ;;  %vm1408_vm0 = vcmp.eq.s32.totalorder %v8031_v57, 2  ;;  %v2824_v63 = vsel %vm2822_vm12, %v2823_v60, %v8026_v31 }
 0x2f2   : > { %v2888_v22 = vor.u32 %v2887_v15, %v2886_v0  ;;  %v2892_v45 = vshll.u32 %v10216_v10, %v10394_v62  ;;  %v2893_v2 = vshrl.u32 %v10080_v17, %v10395_v34  ;;  %v1488_v58 = vor.u32 %v1487_v39, %v1486_v30 }
 0x2f3   : > { %v1491_v4 = vshll.u32 %v1490_v6, 23  ;;  %v2825_v11 = vadd.s32 %v2824_v63, %v2820_v41  ;;  %v2891_v7 = vor.u32 %v2890_v23, %v2889_v13  ;;  %vm1404_vm13 = vcmp.lt.s32.totalorder %v8031_v57, 2 }
 0x2f4   : > { %v2877_v27 = vor.u32 8388608, %v2876_v14  ;;  %v2885_v36 = vshrl.u32 %v10213_v25, %v10395_v34  ;;  %v2894_v40 = vor.u32 %v2893_v2, %v2892_v45  ;;  %vm2901_vm2 = vcmp.lt.s32.totalorder %v6344_v29, 1  ;;  %v10396_v14 = vld [vmem:[#allocation175_spill] sm:$0xff] }
 0x2f5   : > { %vm1401_vm14 = vweird.f32 %v10357_v26  ;;  %v1492_v31 = vor.u32 4788187, %v1491_v4  ;;  %v2826_v12 = vadd.s32 536870912, %v2825_v11  ;;  %vm2903_vm10 = vcmp.lt.s32.totalorder %v6344_v29, 3 }
 0x2f6   : > { %v2909_v5 = vsel %vm2901_vm2, %v2888_v22, %v2891_v7  ;;  %v2906_v32 = vsel %vm2904_vm11, %v2894_v40, 2102212464  ;;  %v2911_v19 = vsel %vm2903_vm10, %v2894_v40, %v6897_v59  ;;  %v2913_v41 = vsel %vm2901_vm2, %v2891_v7, %v2894_v40 }
 0x2f7   : > { %v2915_v50 = vsel %vm2903_vm10, %v10396_v14, %v6910_v1  ;;  %v1493_v35 = vand.u32 2147483647, %v1492_v31  ;;  %v1495_v30 = vcvt.s32.f32 %v1488_v58  ;;  %v2827_v60 = vshrl.u32 %v2826_v12, 30  ;;  %v4776_v62 = vpop.eup %4775 }
 0x2f8   : > { %vm2902_vm3 = vcmp.lt.s32.totalorder %v6344_v29, 2  ;;  %vm2767_vm8 = vcmp.lt.s32.totalorder %v10383_v33, 0  ;;  %v2905_v0 = vsel %vm2901_vm2, %v2885_v36, %v2888_v22  ;;  %v2907_v34 = vsel %vm2903_vm10, %v2891_v7, %v2906_v32  ;;  %v4778_v39 = vpop.eup %4777 }
 0x2f9   : > { %v2916_v59 = vsel %vm2902_vm3, %v2913_v41, %v2915_v50  ;;  %v2917_v15 = vshll.u32 %v2877_v27, 8  ;;  %v1409_v6 = vxor.u32 2147483648, %v4776_v62  ;;  %v1496_v13 = vmul.f32 %v1495_v30, %v1493_v35 }
 0x2fa   : > { %v2828_v1 = vshll.u32 %v2827_v60, 30  ;;  %v2912_v23 = vsel %vm2902_vm3, %v2909_v5, %v2911_v19  ;;  %v1406_v63 = vxor.u32 2147483648, %v4778_v39  ;;  %v1506_v45 = vadd.s32 3, %v1502_v8  ;;  %v10397_v19 = vld [vmem:[#allocation11_spill] sm:$0xff] }
 0x2fb   : > { %v8092_v2 = vmul.u32.u64.low %v2917_v15, %v2916_v59  ;;  %v8093_v58 = vmul.u32.u64.high %v2917_v15, %v2916_v59, %v8092_v2  ;;  %vm1405_vm11 = vcmp.eq.s32.totalorder %v8031_v57, 0  ;;  %v1410_v22 = vsel %vm1408_vm0, %v1409_v6, %v4778_v39 }
 0x2fc   : > { %v1497_v4 = vxor.u32 2147483648, %v1496_v13  ;;  %v8098_v7 = vsub.s32 %v2825_v11, %v2828_v1  ;;  %v1407_v27 = vsel %vm1405_vm11, %v4776_v62, %v1406_v63  ;;  %v2908_v36 = vsel %vm2902_vm3, %v2905_v0, %v2907_v34  ;;  %v10398_v34 = vld [vmem:[#allocation148_spill] sm:$0xff]  ;;  %v10403_v63 = vld [vmem:[#allocation102_spill] sm:$0xff] }
 0x2fd   : > { %v8102_v40 = vmul.u32.u64.low %v2917_v15, %v2912_v23  ;;  %v8103_v31 = vmul.u32.u64.high %v2917_v15, %v2912_v23, %v8102_v40  ;;  %v1411_v8 = vsel %vm1404_vm13, %v1407_v27, %v1410_v22  ;;  %v2851_v32 = vsub.s32 4, %v2827_v60 }
 0x2fe   : > { %v1498_v12 = vsel %vm1415_vm4, %v1497_v4, %v1496_v13  ;;  %v2831_v5 = vsub.s32 0, %v8098_v7  ;;  %v4051_v11 = vmul.f32 %v6602_v3, %v10397_v19  ;;  %v1412_v29 = vsel %vm1401_vm14, nan, %v1411_v8  ;;  %v10399_v13 = vld [vmem:[#allocation12_spill] sm:$0xff] }
 0x2ff   : > { %v1501_v41 = vsel %vm8035_vm15, %v10365_v54, %v1498_v12  ;;  %v8118_v14 = vand.u32 3, %v1506_v45  ;;  %v4115_v57 = vmul.f32 %v7898_v37, %v1412_v29  ;;  %vm2926_vm4 = vc.u32 %v8093_v58, %v8102_v40 }
 0x300   : > { %4779 = vcosq.f32 %v1501_v41  ;;  %v4458_v50 = vmin.u32 %v2831_v5, %v8098_v7  ;;  %v8126_v35 = vor.u32 %v7716_v55, %v7499_v49  ;;  %v2924_v26 = vmul.u32 %v2917_v15, %v2908_v36 }
 0x301   : > { %4781 = vsinq.f32 %v1501_v41  ;;  %v2927_v38 = vadd.s32 1, %v8103_v31  ;;  %v4147_v30 = vadd.f32 %v4115_v57, %v4051_v11  ;;  %v2852_v0 = vsel %vm2767_vm8, %v2851_v32, %v2827_v60 }
 0x302   : > { %v2833_v62 = vclz %v4458_v50  ;;  %v2973_v59 = vand.u32 2147483647, %v10398_v34  ;;  %v3108_v39 = vor.u32 %v7732_v51, %v7503_v44  ;;  %v8135_v6 = vadd.s32 4294967169, %v7912_v20 }
 0x303   : > { %v8139_v49 = vmul.f32 %v6602_v3, %v10399_v13  ;;  %v2928_v55 = vsel %vm2926_vm4, %v2927_v38, %v8103_v31  ;;  %vm1512_vm1 = vcmp.eq.s32.totalorder %v8118_v14, 2  ;;  %4179 = vst [vmem:[%s6723_s15 + $0x30] sm:$0xff] %v4147_v30  ;;  %v10400_v15 = vand.u32 2147483647, %v10383_v33  ;;  %v10405_v13 = vld [vmem:[#allocation109_spill] sm:$0xff] }
 0x304   : > { %v4459_v1 = vadd.s32 4294967294, %v2833_v62  ;;  %v2929_v23 = vadd.s32 %v2928_v55, %v2924_v26  ;;  %vm1509_vm6 = vcmp.eq.s32.totalorder %v8118_v14, 0  ;;  %v2821_v20 = vadd.s32 %v8025_v9, %v8012_v52  ;;  %v10404_v9 = vld [vmem:[#allocation173_spill] sm:$0xff] }
 0x305   : > { %vm8146_vm7 = vcmp.le.f32.partialorder %v10400_v15, 0.7853982  ;;  %v2991_v45 = vshrl.u32 %v10215_v18, %v10403_v63  ;;  %v2994_v2 = vshrl.u32 %v10216_v10, %v10403_v63  ;;  %vm1508_vm15 = vcmp.lt.s32.totalorder %v8118_v14, 2 }
 0x306   : > { %v2854_v3 = vsel %vm8146_vm7, 0, %v2852_v0  ;;  %vm4460_vm5 = vcmp.lt.s32.totalorder %v4459_v1, 0  ;;  %v2930_v22 = vadd.s32 536870912, %v2929_v23  ;;  %v2980_v4 = vand.u32 8388607, %v2973_v59 }
 0x307   : > { %v2997_v27 = vshrl.u32 %v10080_v17, %v10403_v63  ;;  %vm1505_vm12 = vweird.f32 %v10365_v54  ;;  %v2836_v52 = vsel %vm4460_vm5, 0, %v4459_v1  ;;  %v2990_v36 = vshll.u32 %v10213_v25, %v10404_v9 }
 0x308   : > { %v2993_v31 = vshll.u32 %v10215_v18, %v10404_v9  ;;  %v2996_v8 = vshll.u32 %v10216_v10, %v10404_v9  ;;  %v2837_v12 = vsub.s32 32, %v2836_v52  ;;  %v2841_v5 = vsub.s32 4294967266, %v2836_v52 }
 0x309   : > { %v2858_v32 = vadd.s32 3, %v2854_v3  ;;  %v2931_v19 = vshrl.u32 %v2930_v22, 30  ;;  %v2989_v11 = vshrl.u32 %v10213_v25, %v10403_v63  ;;  %v2992_v29 = vor.u32 %v2991_v45, %v2990_v36 }
 0x30a   : > { %v2995_v41 = vor.u32 %v2994_v2, %v2993_v31  ;;  %v2998_v57 = vor.u32 %v2997_v27, %v2996_v8  ;;  %v4780_v50 = vpop.eup %4779  ;;  %v2838_v26 = vshll.u32 %v8098_v7, %v2836_v52  ;;  %v2839_v38 = vshrl.u32 %v2821_v20, %v2837_v12 }
 0x30b   : > { %v2842_v30 = vadd.s32 127, %v2841_v5  ;;  %v2932_v62 = vshll.u32 %v2931_v19, 30  ;;  %v4782_v0 = vpop.eup %4781  ;;  %vm3112_vm0 = vcmp.lt.s32.totalorder %v10405_v13, 4  ;;  %v1513_v55 = vxor.u32 2147483648, %v4780_v50 }
 0x30c   : > { %v2981_v15 = vor.u32 8388608, %v2980_v4  ;;  %vm3005_vm13 = vcmp.lt.s32.totalorder %v10322_v61, 1  ;;  %vm3006_vm2 = vcmp.lt.s32.totalorder %v10322_v61, 2  ;;  %v1510_v1 = vxor.u32 2147483648, %v4782_v0 }
 0x30d   : > { %v2840_v3 = vor.u32 %v2839_v38, %v2838_v26  ;;  %v2843_v63 = vshll.u32 %v2842_v30, 23  ;;  %v8177_v45 = vsub.s32 %v2929_v23, %v2932_v62  ;;  %vm2871_vm14 = vcmp.lt.s32.totalorder %v10390_v24, 0 }
 0x30e   : > { %v1514_v7 = vsel %vm1512_vm1, %v1513_v55, %v4782_v0  ;;  %vm3007_vm10 = vcmp.lt.s32.totalorder %v10322_v61, 3  ;;  %v3009_v20 = vsel %vm3005_vm13, %v2989_v11, %v2992_v29  ;;  %v3010_v2 = vsel %vm3008_vm9, %v2998_v57, 2102212464 }
 0x30f   : > { %v1511_v22 = vsel %vm1509_vm6, %v4780_v50, %v1510_v1  ;;  %v2844_v4 = vor.u32 4788187, %v2843_v63  ;;  %v2935_v23 = vsub.s32 0, %v8177_v45  ;;  %v3017_v27 = vsel %vm3005_vm13, %v2995_v41, %v2998_v57 }
 0x310   : > { %v1515_v52 = vsel %vm1508_vm15, %v1511_v22, %v1514_v7  ;;  %v3013_v9 = vsel %vm3005_vm13, %v2992_v29, %v2995_v41  ;;  %v3015_v36 = vsel %vm3007_vm10, %v2998_v57, %v7510_v47  ;;  %v3019_v31 = vsel %vm3007_vm10, %v7203_v46, %v7517_v42 }
 0x311   : > { %v1516_v8 = vsel %vm1505_vm12, nan, %v1515_v52  ;;  %v2845_v12 = vand.u32 2147483647, %v2844_v4  ;;  %v2847_v5 = vcvt.s32.f32 %v2840_v3  ;;  %v4462_v14 = vmin.u32 %v2935_v23, %v8177_v45 }
 0x312   : > { %v4116_v11 = vmul.f32 %v7898_v37, %v1516_v8  ;;  %v3011_v29 = vsel %vm3007_vm10, %v2995_v41, %v3010_v2  ;;  %v3020_v47 = vsel %vm3006_vm2, %v3017_v27, %v3019_v31  ;;  %v3021_v57 = vshll.u32 %v2981_v15, 8  ;;  %v10406_v37 = vld [vmem:[#allocation151_spill] sm:$0xff] }
 0x313   : > { %v2848_v50 = vmul.f32 %v2847_v5, %v2845_v12  ;;  %v2937_v26 = vclz %v4462_v14  ;;  %v2955_v46 = vsub.s32 4, %v2931_v19  ;;  %v3016_v42 = vsel %vm3006_vm2, %v3013_v9, %v3015_v36 }
 0x314   : > { %v4148_v54 = vadd.f32 %v4116_v11, %v8139_v49  ;;  %v8214_v38 = vmul.u32.u64.low %v3021_v57, %v3020_v47  ;;  %v8215_v30 = vmul.u32.u64.high %v3021_v57, %v3020_v47, %v8214_v38  ;;  %v3077_v62 = vand.u32 2147483647, %v10406_v37 }
 0x315   : > { %v3118_v41 = vsel %vm3112_vm0, %v8126_v35, 920167782  ;;  %v2849_v0 = vxor.u32 2147483648, %v2848_v50  ;;  %v4463_v55 = vadd.s32 4294967294, %v2937_v26  ;;  %v3012_v15 = vsel %vm3006_vm2, %v3009_v20, %v3011_v29 }
 0x316   : > { %v3122_v49 = vsel %vm3112_vm0, %v3108_v39, 1326507024  ;;  %4180 = vst [vmem:[%s6723_s15 + $0x38] sm:$0xff] %v4148_v54  ;;  %v2925_v1 = vadd.s32 %v8102_v40, %v8093_v58  ;;  %v8231_v3 = vmul.u32.u64.low %v3021_v57, %v3016_v42  ;;  %v8232_v63 = vmul.u32.u64.high %v3021_v57, %v3016_v42, %v8231_v3 }
 0x317   : > { %v2850_v7 = vsel %vm2767_vm8, %v2849_v0, %v2848_v50  ;;  %v8237_v2 = vand.u32 3, %v2858_v32  ;;  %vm8241_vm9 = vcmp.le.f32.partialorder %v2869_v21, 0.7853982  ;;  %vm4464_vm3 = vcmp.lt.s32.totalorder %v4463_v55, 0 }
 0x318   : > { %v8247_v44 = vsel %vm2871_vm14, %v2955_v46, %v2931_v19  ;;  %v2853_v51 = vsel %vm8146_vm7, %v10383_v33, %v2850_v7  ;;  %v2940_v58 = vsel %vm4464_vm3, 0, %v4463_v55  ;;  %v3028_v40 = vmul.u32 %v3021_v57, %v3012_v15 }
 0x319   : > { %v3084_v39 = vand.u32 8388607, %v3077_v62  ;;  %4783 = vcosq.f32 %v2853_v51  ;;  %v2941_v32 = vsub.s32 32, %v2940_v58  ;;  %v2945_v21 = vsub.s32 4294967266, %v2940_v58 }
 0x31a   : > { %vm3030_vm8 = vc.u32 %v8215_v30, %v8231_v3  ;;  %4785 = vsinq.f32 %v2853_v51  ;;  %v2942_v20 = vshll.u32 %v8177_v45, %v2940_v58  ;;  %v3031_v19 = vadd.s32 1, %v8232_v63 }
 0x31b   : > { %v3094_v60 = vshll.u32 %v10213_v25, %v7105_v53  ;;  %v2943_v22 = vshrl.u32 %v2925_v1, %v2941_v32  ;;  %v2946_v4 = vadd.s32 127, %v2945_v21  ;;  %v3095_v23 = vshrl.u32 %v10215_v18, %v7417_v48 }
 0x31c   : > { %v3097_v27 = vshll.u32 %v10215_v18, %v7105_v53  ;;  %v3032_v52 = vsel %vm3030_vm8, %v3031_v19, %v8232_v63  ;;  %v3098_v9 = vshrl.u32 %v10216_v10, %v7417_v48  ;;  %v3100_v45 = vshll.u32 %v10216_v10, %v7105_v53 }
 0x31d   : > { %v3101_v36 = vshrl.u32 %v10080_v17, %v7417_v48  ;;  %vm2864_vm11 = vcmp.eq.s32.totalorder %v8237_v2, 2  ;;  %v2944_v31 = vor.u32 %v2943_v22, %v2942_v20  ;;  %v2947_v8 = vshll.u32 %v2946_v4, 23 }
 0x31e   : > { %v3033_v12 = vadd.s32 %v3032_v52, %v3028_v40  ;;  %v3096_v5 = vor.u32 %v3095_v23, %v3094_v60  ;;  %vm2861_vm4 = vcmp.eq.s32.totalorder %v8237_v2, 0  ;;  %v3085_v14 = vor.u32 8388608, %v3084_v39 }
 0x31f   : > { %v3093_v11 = vshrl.u32 %v10213_v25, %v7417_v48  ;;  %v3099_v29 = vor.u32 %v3098_v9, %v3097_v27  ;;  %v3102_v47 = vor.u32 %v3101_v36, %v3100_v45  ;;  %vm2975_vm1 = vcmp.lt.s32.totalorder %v10398_v34, 0 }
 0x320   : > { %v2948_v53 = vor.u32 4788187, %v2947_v8  ;;  %v3034_v57 = vadd.s32 536870912, %v3033_v12  ;;  %vm3109_vm7 = vcmp.lt.s32.totalorder %v10405_v13, 1  ;;  %vm3111_vm6 = vcmp.lt.s32.totalorder %v10405_v13, 3 }
 0x321   : > { %vm2857_vm15 = vweird.f32 %v10383_v33  ;;  %v2958_v50 = vsel %vm8241_vm9, 0, %v8247_v44  ;;  %vm3110_vm5 = vcmp.lt.s32.totalorder %v10405_v13, 2  ;;  %v3117_v26 = vsel %vm3109_vm7, %v3096_v5, %v3099_v29 }
 0x322   : > { %v3119_v48 = vsel %vm3111_vm6, %v3102_v47, %v3118_v41  ;;  %v2949_v46 = vand.u32 2147483647, %v2948_v53  ;;  %v2951_v42 = vcvt.s32.f32 %v2944_v31  ;;  %v3035_v54 = vshrl.u32 %v3034_v57, 30 }
 0x323   : > { %v3113_v38 = vsel %vm3109_vm7, %v3093_v11, %v3096_v5  ;;  %v3114_v0 = vsel %vm3112_vm0, %v3102_v47, 2102212464  ;;  %v3121_v55 = vsel %vm3109_vm7, %v3099_v29, %v3102_v47  ;;  %v3123_v15 = vsel %vm3111_vm6, %v8126_v35, %v3122_v49  ;;  %v4784_v63 = vpop.eup %4783 }
 0x324   : > { %v3125_v1 = vshll.u32 %v3085_v14, 8  ;;  %v2952_v7 = vmul.f32 %v2951_v42, %v2949_v46  ;;  %v3036_v44 = vshll.u32 %v3035_v54, 30  ;;  %v3120_v51 = vsel %vm3110_vm5, %v3117_v26, %v3119_v48  ;;  %v4786_v58 = vpop.eup %4785  ;;  %v10412_v48 = vld [vmem:[#allocation36_spill] sm:$0xff] }
 0x325   : > { %v3124_v41 = vsel %vm3110_vm5, %v3121_v55, %v3123_v15  ;;  %v2865_v40 = vxor.u32 2147483648, %v4784_v63  ;;  %v3059_v39 = vsub.s32 4, %v3035_v54  ;;  %v2862_v20 = vxor.u32 2147483648, %v4786_v58 }
 0x326   : > { %v8294_v32 = vmul.u32.u64.low %v3125_v1, %v3124_v41  ;;  %v8295_v21 = vmul.u32.u64.high %v3125_v1, %v3124_v41, %v8294_v32  ;;  %v2953_v19 = vxor.u32 2147483648, %v2952_v7  ;;  %v8297_v60 = vsub.s32 %v3033_v12, %v3036_v44  ;;  %v8320_v12 = vpop.permute.xlu1 %4098 }
 0x327   : > { %v3115_v35 = vsel %vm3111_vm6, %v3099_v29, %v3114_v0  ;;  %v2866_v49 = vsel %vm2864_vm11, %v2865_v40, %v4786_v58  ;;  %v2962_v22 = vadd.s32 3, %v2958_v50  ;;  %vm2860_vm12 = vcmp.lt.s32.totalorder %v8237_v2, 2  ;;  %v10411_v50 = vld [vmem:[#allocation166_spill] sm:$0xff] }
 0x328   : > { %v8303_v4 = vmul.u32.u64.low %v3125_v1, %v3120_v51  ;;  %v8304_v23 = vmul.u32.u64.high %v3125_v1, %v3120_v51, %v8303_v4  ;;  %v2863_v27 = vsel %vm2861_vm4, %v4784_v63, %v2862_v20  ;;  %v2954_v52 = vsel %vm2871_vm14, %v2953_v19, %v2952_v7  ;;  %v10413_v0 = vld [vmem:[#allocation66_spill] sm:$0xff]  ;;  %v10414_v63 = vld [vmem:[#allocation61_spill] sm:$0xff] }
 0x329   : > { %v3039_v9 = vsub.s32 0, %v8297_v60  ;;  %v2867_v45 = vsel %vm2860_vm12, %v2863_v27, %v2866_v49  ;;  %v2957_v36 = vsel %vm8241_vm9, %v10390_v24, %v2954_v52  ;;  %v3060_v31 = vsel %vm2975_vm1, %v3059_v39, %v3035_v54 }
 0x32a   : > { %v3116_v8 = vsel %vm3110_vm5, %v3113_v38, %v3115_v35  ;;  %v2868_v2 = vsel %vm2857_vm15, nan, %v2867_v45  ;;  %4787 = vcosq.f32 %v2957_v36  ;;  %vm3134_vm0 = vc.u32 %v8295_v21, %v8303_v4 }
 0x32b   : > { %v4466_v5 = vmin.u32 %v3039_v9, %v8297_v60  ;;  %4789 = vsinq.f32 %v2957_v36  ;;  %v8327_v61 = vand.u32 3, %v2962_v22  ;;  %v3135_v14 = vadd.s32 1, %v8304_v23  ;;  %v10415_v36 = vld [vmem:[#allocation75_spill] sm:$0xff] }
 0x32c   : > { %v4129_v13 = vmul.f32 %v8320_v12, %v2868_v2  ;;  %v8332_v11 = vadd.s32 4294967169, %v7916_v43  ;;  %vm8336_vm13 = vcmp.le.f32.partialorder %v2973_v59, 0.7853982  ;;  %v3132_v47 = vmul.u32 %v3125_v1, %v3116_v8 }
 0x32d   : > { %v3041_v29 = vclz %v4466_v5  ;;  %v3062_v53 = vsel %vm8336_vm13, 0, %v3060_v31  ;;  %v3136_v57 = vsel %vm3134_vm0, %v3135_v14, %v8304_v23  ;;  %v2349_v46 = vand.u32 2147483647, %v10412_v48 }
 0x32e   : > { %v4161_v26 = vadd.f32 %v4129_v13, %v10411_v50  ;;  %v8346_v43 = vadd.s32 1, %v7920_v56  ;;  %v8349_v42 = vadd.s32 1, %v7930_v16  ;;  %v3137_v54 = vadd.s32 %v3136_v57, %v3132_v47 }
 0x32f   : > { %v4467_v59 = vadd.s32 4294967294, %v3041_v29  ;;  %vm2965_vm2 = vcmp.eq.s32.totalorder %v8327_v61, 0  ;;  %vm2968_vm14 = vcmp.eq.s32.totalorder %v8327_v61, 2  ;;  %v2356_v38 = vand.u32 8388607, %v2349_v46 }
 0x330   : > { %4193 = vst [vmem:[%s6723_s15 + $0xa0] sm:$0xff] %v4161_v26  ;;  %v2367_v55 = vshrl.u32 %v10215_v18, %v10413_v0  ;;  %vm2964_vm10 = vcmp.lt.s32.totalorder %v8327_v61, 2  ;;  %v3029_v56 = vadd.s32 %v8231_v3, %v8215_v30  ;;  %v8361_v16 = vadd.s32 3, %v3062_v53 }
 0x331   : > { %vm4468_vm9 = vcmp.lt.s32.totalorder %v4467_v59, 0  ;;  %v3138_v15 = vadd.s32 536870912, %v3137_v54  ;;  %vm2961_vm3 = vweird.f32 %v10390_v24  ;;  %v2366_v7 = vshll.u32 %v10213_v25, %v10414_v63 }
 0x332   : > { %v3044_v1 = vsel %vm4468_vm9, 0, %v4467_v59  ;;  %v2370_v44 = vshrl.u32 %v10216_v10, %v10413_v0  ;;  %v2373_v51 = vshrl.u32 %v10080_v17, %v10413_v0  ;;  %v2365_v30 = vshrl.u32 %v10213_v25, %v10413_v0  ;;  %v10417_v59 = vld [vmem:[#allocation84_spill] sm:$0xff] }
 0x333   : > { %v3045_v41 = vsub.s32 32, %v3044_v1  ;;  %v3049_v58 = vsub.s32 4294967266, %v3044_v1  ;;  %v3139_v40 = vshrl.u32 %v3138_v15, 30  ;;  %vm3608_vm8 = vcmp.gt.s32.totalorder %v8346_v43, 0 }
 0x334   : > { %v2357_v3 = vor.u32 8388608, %v2356_v38  ;;  %v2368_v39 = vor.u32 %v2367_v55, %v2366_v7  ;;  %v2369_v32 = vshll.u32 %v10215_v18, %v10414_v63  ;;  %v2372_v20 = vshll.u32 %v10216_v10, %v10414_v63  ;;  %v4788_v19 = vpop.eup %4787  ;;  %v10419_v63 = vld [vmem:[#allocation79_spill] sm:$0xff] }
 0x335   : > { %v3046_v35 = vshll.u32 %v8297_v60, %v3044_v1  ;;  %v3047_v49 = vshrl.u32 %v3029_v56, %v3045_v41  ;;  %v3050_v22 = vadd.s32 127, %v3049_v58  ;;  %v3140_v23 = vshll.u32 %v3139_v40, 30  ;;  %v4790_v27 = vpop.eup %4789  ;;  %v10418_v1 = vld [vmem:[#allocation85_spill] sm:$0xff] }
 0x336   : > { %vm3079_vm11 = vcmp.lt.s32.totalorder %v10406_v37, 0  ;;  %v2969_v52 = vxor.u32 2147483648, %v4788_v19  ;;  %v2371_v9 = vor.u32 %v2370_v44, %v2369_v32  ;;  %v2374_v45 = vor.u32 %v2373_v51, %v2372_v20 }
 0x337   : > { %vm2381_vm4 = vcmp.lt.s32.totalorder %v10415_v36, 1  ;;  %v2966_v31 = vxor.u32 2147483648, %v4790_v27  ;;  %v3048_v8 = vor.u32 %v3047_v49, %v3046_v35  ;;  %v3051_v2 = vshll.u32 %v3050_v22, 23 }
 0x338   : > { %v8380_v5 = vsub.s32 %v3137_v54, %v3140_v23  ;;  %v2970_v14 = vsel %vm2968_vm14, %v2969_v52, %v4790_v27  ;;  %v3163_v60 = vsub.s32 4, %v3139_v40  ;;  %vm2382_vm7 = vcmp.lt.s32.totalorder %v10415_v36, 2 }
 0x339   : > { %vm2383_vm6 = vcmp.lt.s32.totalorder %v10415_v36, 3  ;;  %v2967_v13 = vsel %vm2965_vm2, %v4788_v19, %v2966_v31  ;;  %v3052_v29 = vor.u32 4788187, %v3051_v2  ;;  %v2385_v53 = vsel %vm2381_vm4, %v2365_v30, %v2368_v39  ;;  %v10420_v30 = vld [vmem:[#allocation25_spill] sm:$0xff] }
 0x33a   : > { %v3143_v47 = vsub.s32 0, %v8380_v5  ;;  %v2971_v57 = vsel %vm2964_vm10, %v2967_v13, %v2970_v14  ;;  %vm10416_vm15 = vcmp.lt.s32.totalorder %v10415_v36, 4  ;;  %v2389_v26 = vsel %vm2381_vm4, %v2368_v39, %v2371_v9 }
 0x33b   : > { %v2386_v50 = vsel %vm10416_vm15, %v2374_v45, 2102212464  ;;  %v2391_v54 = vsel %vm2383_vm6, %v2374_v45, %v10417_v59  ;;  %v2972_v38 = vsel %vm2961_vm3, nan, %v2971_v57  ;;  %v3053_v0 = vand.u32 2147483647, %v3052_v29 }
 0x33c   : > { %v3055_v55 = vcvt.s32.f32 %v3048_v8  ;;  %v4470_v56 = vmin.u32 %v3143_v47, %v8380_v5  ;;  %v4130_v61 = vmul.f32 %v8320_v12, %v2972_v38  ;;  %v2393_v15 = vsel %vm2381_vm4, %v2371_v9, %v2374_v45  ;;  %v10423_v45 = vld [vmem:[#allocation37_spill] sm:$0xff]  ;;  %v10424_v47 = vld [vmem:[#allocation72_spill] sm:$0xff] }
 0x33d   : > { %v2395_v7 = vsel %vm2383_vm6, %v10419_v63, %v10418_v1  ;;  %v2397_v44 = vshll.u32 %v2357_v3, 8  ;;  %v2392_v24 = vsel %vm2382_vm7, %v2389_v26, %v2391_v54  ;;  %v2387_v32 = vsel %vm2383_vm6, %v2371_v9, %v2386_v50  ;;  %v10425_v50 = vld [vmem:[#allocation68_spill] sm:$0xff] }
 0x33e   : > { %v3056_v51 = vmul.f32 %v3055_v55, %v3053_v0  ;;  %v3145_v41 = vclz %v4470_v56  ;;  %v2396_v58 = vsel %vm2382_vm7, %v2393_v15, %v2395_v7  ;;  %v4162_v39 = vadd.f32 %v4130_v61, %v10420_v30 }
 0x33f   : > { %v8417_v20 = vmul.u32.u64.low %v2397_v44, %v2396_v58  ;;  %v8418_v19 = vmul.u32.u64.high %v2397_v44, %v2396_v58, %v8417_v20  ;;  %v8423_v3 = vsel %vm3608_vm8, %v8346_v43, 0  ;;  %v3164_v22 = vsel %vm3079_vm11, %v3163_v60, %v3139_v40 }
 0x340   : > { %v3057_v35 = vxor.u32 2147483648, %v3056_v51  ;;  %v4471_v49 = vadd.s32 4294967294, %v3145_v41  ;;  %vm8429_vm5 = vcmp.le.f32.partialorder %v3077_v62, 0.7853982  ;;  %v3133_v27 = vadd.s32 %v8303_v4, %v8295_v21  ;;  %4194 = vst [vmem:[%s6723_s15 + $0xa8] sm:$0xff] %v4162_v39  ;;  %v10428_v20 = vld [vmem:[#allocation87_spill] sm:$0xff] }
 0x341   : > { %v8436_v52 = vmul.u32.u64.low %v2397_v44, %v2392_v24  ;;  %v8437_v9 = vmul.u32.u64.high %v2397_v44, %v2392_v24, %v8436_v52  ;;  %v2388_v40 = vsel %vm2382_vm7, %v2385_v53, %v2387_v32  ;;  %v2453_v62 = vand.u32 2147483647, %v10423_v45  ;;  %v10426_v24 = vld [vmem:[#allocation80_spill] sm:$0xff]  ;;  %v10427_v32 = vld [vmem:[#allocation95_spill] sm:$0xff] }
 0x342   : > { %v3058_v43 = vsel %vm2975_vm1, %v3057_v35, %v3056_v51  ;;  %vm4472_vm12 = vcmp.lt.s32.totalorder %v4471_v49, 0  ;;  %v8449_v21 = vand.u32 3, %v8361_v16  ;;  %v3166_v8 = vsel %vm8429_vm5, 0, %v3164_v22  ;;  %v10429_v22 = vld [vmem:[#allocation92_spill] sm:$0xff] }
 0x343   : > { %v3061_v31 = vsel %vm8336_vm13, %v10398_v34, %v3058_v43  ;;  %v3148_v4 = vsel %vm4472_vm12, 0, %v4471_v49  ;;  %vm2406_vm1 = vc.u32 %v8418_v19, %v8436_v52  ;;  %v2404_v60 = vmul.u32 %v2397_v44, %v2388_v40 }
 0x344   : > { %4791 = vcosq.f32 %v3061_v31  ;;  %v3149_v2 = vsub.s32 32, %v3148_v4  ;;  %v3153_v14 = vsub.s32 4294967266, %v3148_v4  ;;  %v3150_v36 = vshll.u32 %v8380_v5, %v3148_v4 }
 0x345   : > { %4793 = vsinq.f32 %v3061_v31  ;;  %v2407_v33 = vadd.s32 1, %v8437_v9  ;;  %v2460_v16 = vand.u32 8388607, %v2453_v62  ;;  %v2471_v53 = vshrl.u32 %v10215_v18, %v10424_v47 }
 0x346   : > { %v3151_v13 = vshrl.u32 %v3133_v27, %v3149_v2  ;;  %v3154_v29 = vadd.s32 127, %v3153_v14  ;;  %v2470_v26 = vshll.u32 %v10213_v25, %v10425_v50  ;;  %v2473_v59 = vshll.u32 %v10215_v18, %v10425_v50 }
 0x347   : > { %v2408_v57 = vsel %vm2406_vm1, %v2407_v33, %v8437_v9  ;;  %v2474_v5 = vshrl.u32 %v10216_v10, %v10424_v47  ;;  %vm3072_vm0 = vcmp.eq.s32.totalorder %v8449_v21, 2  ;;  %vm2351_vm13 = vcmp.lt.s32.totalorder %v10412_v48, 0 }
 0x348   : > { %v3152_v54 = vor.u32 %v3151_v13, %v3150_v36  ;;  %v3155_v38 = vshll.u32 %v3154_v29, 23  ;;  %v2409_v0 = vadd.s32 %v2408_v57, %v2404_v60  ;;  %vm3069_vm2 = vcmp.eq.s32.totalorder %v8449_v21, 0 }
 0x349   : > { %v2472_v55 = vor.u32 %v2471_v53, %v2470_v26  ;;  %v2475_v56 = vor.u32 %v2474_v5, %v2473_v59  ;;  %v2476_v61 = vshll.u32 %v10216_v10, %v10425_v50  ;;  %v2477_v15 = vshrl.u32 %v10080_v17, %v10424_v47 }
 0x34a   : > { %vm3068_vm14 = vcmp.lt.s32.totalorder %v8449_v21, 2  ;;  %v3156_v1 = vor.u32 4788187, %v3155_v38  ;;  %v3170_v63 = vadd.s32 3, %v3166_v8  ;;  %v2410_v7 = vadd.s32 536870912, %v2409_v0 }
 0x34b   : > { %v2469_v44 = vshrl.u32 %v10213_v25, %v10424_v47  ;;  %vm3065_vm10 = vweird.f32 %v10398_v34  ;;  %v2461_v51 = vor.u32 8388608, %v2460_v16  ;;  %v2478_v41 = vor.u32 %v2477_v15, %v2476_v61 }
 0x34c   : > { %vm2485_vm9 = vcmp.lt.s32.totalorder %v10426_v24, 1  ;;  %vm2487_vm3 = vcmp.lt.s32.totalorder %v10426_v24, 3  ;;  %v3157_v58 = vand.u32 2147483647, %v3156_v1  ;;  %v3159_v30 = vcvt.s32.f32 %v3152_v54  ;;  %v10446_v1 = vld [vmem:[#allocation76_spill] sm:$0xff] }
 0x34d   : > { %v2411_v39 = vshrl.u32 %v2410_v7, 30  ;;  %v2499_v35 = vsel %vm2487_vm3, %v10428_v20, %v10427_v32  ;;  %vm3712_vm8 = vcmp.gt.s32.totalorder %v8349_v42, 0  ;;  %vm2486_vm4 = vcmp.lt.s32.totalorder %v10426_v24, 2 }
 0x34e   : > { %v2493_v49 = vsel %vm2485_vm9, %v2472_v55, %v2475_v56  ;;  %v2495_v27 = vsel %vm2487_vm3, %v2478_v41, %v10429_v22  ;;  %v2497_v9 = vsel %vm2485_vm9, %v2475_v56, %v2478_v41  ;;  %v4792_v43 = vpop.eup %4791  ;;  %v3160_v40 = vmul.f32 %v3159_v30, %v3157_v58  ;;  %v10433_v58 = vld [vmem:[#allocation26_spill] sm:$0xff] }
 0x34f   : > { %v2412_v31 = vshll.u32 %v2411_v39, 30  ;;  %v2435_v4 = vsub.s32 4, %v2411_v39  ;;  %vm10430_vm7 = vcmp.lt.s32.totalorder %v10426_v24, 4  ;;  %v4794_v2 = vpop.eup %4793  ;;  %v3073_v14 = vxor.u32 2147483648, %v4792_v43  ;;  %v10434_v24 = vld [vmem:[#allocation38_spill] sm:$0xff] }
 0x350   : > { %v2490_v8 = vsel %vm10430_vm7, %v2478_v41, 2102212464  ;;  %v2489_v36 = vsel %vm2485_vm9, %v2469_v44, %v2472_v55  ;;  %v2500_v60 = vsel %vm2486_vm4, %v2497_v9, %v2499_v35  ;;  %v2501_v33 = vshll.u32 %v2461_v51, 8 }
 0x351   : > { %v3070_v13 = vxor.u32 2147483648, %v4794_v2  ;;  %v3161_v29 = vxor.u32 2147483648, %v3160_v40  ;;  %v8500_v16 = vsub.s32 %v2409_v0, %v2412_v31  ;;  %v2496_v47 = vsel %vm2486_vm4, %v2493_v49, %v2495_v27 }
 0x352   : > { %v3074_v53 = vsel %vm3072_vm0, %v3073_v14, %v4794_v2  ;;  %v2491_v57 = vsel %vm2487_vm3, %v2475_v56, %v2490_v8  ;;  %v8508_v50 = vmul.u32.u64.low %v2501_v33, %v2500_v60  ;;  %v8509_v26 = vmul.u32.u64.high %v2501_v33, %v2500_v60, %v8508_v50  ;;  %v10436_v2 = vld [vmem:[#allocation71_spill] sm:$0xff] }
 0x353   : > { %v3071_v59 = vsel %vm3069_vm2, %v4792_v43, %v3070_v13  ;;  %v3162_v5 = vsel %vm3079_vm11, %v3161_v29, %v3160_v40  ;;  %v2415_v54 = vsub.s32 0, %v8500_v16  ;;  %v2436_v38 = vsel %vm2351_vm13, %v2435_v4, %v2411_v39 }
 0x354   : > { %v3075_v0 = vsel %vm3068_vm14, %v3071_v59, %v3074_v53  ;;  %v3165_v55 = vsel %vm8429_vm5, %v10406_v37, %v3162_v5  ;;  %v8523_v56 = vmul.u32.u64.low %v2501_v33, %v2496_v47  ;;  %v8524_v61 = vmul.u32.u64.high %v2501_v33, %v2496_v47, %v8523_v56 }
 0x355   : > { %v3076_v15 = vsel %vm3065_vm10, nan, %v3075_v0  ;;  %4795 = vcosq.f32 %v3165_v55  ;;  %vm8531_vm11 = vcmp.le.f32.partialorder %v2349_v46, 0.7853982  ;;  %v4442_v21 = vmin.u32 %v2415_v54, %v8500_v16 }
 0x356   : > { %4797 = vsinq.f32 %v3165_v55  ;;  %v8536_v7 = vand.u32 3, %v3170_v63  ;;  %v4131_v23 = vmul.f32 %v8320_v12, %v3076_v15  ;;  %v2492_v44 = vsel %vm2486_vm4, %v2489_v36, %v2491_v57 }
 0x357   : > { %v8542_v34 = vadd.s32 1, %v8135_v6  ;;  %v8545_v51 = vadd.s32 1, %v8332_v11  ;;  %v2417_v46 = vclz %v4442_v21  ;;  %v2438_v41 = vsel %vm8531_vm11, 0, %v2436_v38 }
 0x358   : > { %v4163_v30 = vadd.f32 %v4131_v23, %v10433_v58  ;;  %vm2510_vm6 = vc.u32 %v8509_v26, %v8523_v56  ;;  %v2511_v63 = vadd.s32 1, %v8524_v61  ;;  %v2557_v39 = vand.u32 2147483647, %v10434_v24  ;;  %v10437_v23 = vld [vmem:[#allocation86_spill] sm:$0xff] }
 0x359   : > { %v8555_v32 = vshrl.u32 %v8423_v3, 5  ;;  %v8560_v6 = vsel %vm3712_vm8, %v8349_v42, 0  ;;  %v4443_v11 = vadd.s32 4294967294, %v2417_v46  ;;  %v2508_v20 = vmul.u32 %v2501_v33, %v2492_v44  ;;  %v10435_v42 = vld [vmem:[#allocation81_spill] sm:$0xff] }
 0x35a   : > { %vm3173_vm15 = vcmp.eq.s32.totalorder %v8536_v7, 0  ;;  %vm3176_vm5 = vcmp.eq.s32.totalorder %v8536_v7, 2  ;;  %4195 = vst [vmem:[%s6723_s15 + $0xb0] sm:$0xff] %v4163_v30  ;;  %v2405_v35 = vadd.s32 %v8436_v52, %v8418_v19  ;;  %v2512_v49 = vsel %vm2510_vm6, %v2511_v63, %v8524_v61 }
 0x35b   : > { %vm3172_vm12 = vcmp.lt.s32.totalorder %v8536_v7, 2  ;;  %vm4444_vm1 = vcmp.lt.s32.totalorder %v4443_v11, 0  ;;  %v8569_v22 = vadd.s32 3, %v2438_v41  ;;  %v2513_v27 = vadd.s32 %v2512_v49, %v2508_v20  ;;  %v10439_v20 = vld [vmem:[#allocation96_spill] sm:$0xff] }
 0x35c   : > { %v2575_v9 = vshrl.u32 %v10215_v18, %v10435_v42  ;;  %vm3169_vm0 = vweird.f32 %v10406_v37  ;;  %v2420_v43 = vsel %vm4444_vm1, 0, %v4443_v11  ;;  %v2564_v40 = vand.u32 8388607, %v2557_v39 }
 0x35d   : > { %v2578_v19 = vshrl.u32 %v10216_v10, %v10435_v42  ;;  %v2581_v52 = vshrl.u32 %v10080_v17, %v10435_v42  ;;  %v2421_v31 = vsub.s32 32, %v2420_v43  ;;  %v2425_v4 = vsub.s32 4294967266, %v2420_v43 }
 0x35e   : > { %v2514_v8 = vadd.s32 536870912, %v2513_v27  ;;  %v2580_v14 = vshll.u32 %v10216_v10, %v10436_v2  ;;  %v2422_v36 = vshll.u32 %v8500_v16, %v2420_v43  ;;  %v2573_v60 = vshrl.u32 %v10213_v25, %v10435_v42 }
 0x35f   : > { %v2574_v33 = vshll.u32 %v10213_v25, %v10436_v2  ;;  %v2577_v13 = vshll.u32 %v10215_v18, %v10436_v2  ;;  %v4796_v29 = vpop.eup %4795  ;;  %v2423_v47 = vshrl.u32 %v2405_v35, %v2421_v31  ;;  %v2426_v53 = vadd.s32 127, %v2425_v4 }
 0x360   : > { %v2515_v57 = vshrl.u32 %v2514_v8, 30  ;;  %v2582_v50 = vor.u32 %v2581_v52, %v2580_v14  ;;  %v4798_v59 = vpop.eup %4797  ;;  %v3177_v5 = vxor.u32 2147483648, %v4796_v29  ;;  %v2565_v54 = vor.u32 8388608, %v2564_v40  ;;  %v10441_v52 = vld [vmem:[#allocation88_spill] sm:$0xff] }
 0x361   : > { %v2576_v38 = vor.u32 %v2575_v9, %v2574_v33  ;;  %v2579_v0 = vor.u32 %v2578_v19, %v2577_v13  ;;  %v3174_v16 = vxor.u32 2147483648, %v4798_v59  ;;  %v2424_v55 = vor.u32 %v2423_v47, %v2422_v36  ;;  %v10440_v19 = vld [vmem:[#allocation97_spill] sm:$0xff]  ;;  %v10443_v33 = vld [vmem:[#allocation39_spill] sm:$0xff] }
 0x362   : > { %v2427_v61 = vshll.u32 %v2426_v53, 23  ;;  %v2516_v15 = vshll.u32 %v2515_v57, 30  ;;  %v3178_v21 = vsel %vm3176_vm5, %v3177_v5, %v4798_v59  ;;  %vm2589_vm2 = vcmp.lt.s32.totalorder %v10437_v23, 1 }
 0x363   : > { %vm2590_vm14 = vcmp.lt.s32.totalorder %v10437_v23, 2  ;;  %vm2591_vm10 = vcmp.lt.s32.totalorder %v10437_v23, 3  ;;  %vm2455_vm9 = vcmp.lt.s32.totalorder %v10423_v45, 0  ;;  %v3175_v44 = vsel %vm3173_vm15, %v4796_v29, %v3174_v16 }
 0x364   : > { %v2428_v46 = vor.u32 4788187, %v2427_v61  ;;  %v8597_v41 = vsub.s32 %v2513_v27, %v2516_v15  ;;  %vm10438_vm3 = vcmp.lt.s32.totalorder %v10437_v23, 4  ;;  %v3179_v30 = vsel %vm3172_vm12, %v3175_v44, %v3178_v21 }
 0x365   : > { %v2594_v58 = vsel %vm10438_vm3, %v2582_v50, 2102212464  ;;  %v2593_v63 = vsel %vm2589_vm2, %v2573_v60, %v2576_v38  ;;  %v2597_v11 = vsel %vm2589_vm2, %v2576_v38, %v2579_v0  ;;  %v2599_v35 = vsel %vm2591_vm10, %v2582_v50, %v10439_v20 }
 0x366   : > { %v3180_v49 = vsel %vm3169_vm0, nan, %v3179_v30  ;;  %v2429_v27 = vand.u32 2147483647, %v2428_v46  ;;  %v2431_v42 = vcvt.s32.f32 %v2424_v55  ;;  %v2519_v9 = vsub.s32 0, %v8597_v41  ;;  %v10447_v30 = vld [vmem:[#allocation83_spill] sm:$0xff] }
 0x367   : > { %v4132_v7 = vmul.f32 %v8320_v12, %v3180_v49  ;;  %v2595_v43 = vsel %vm2591_vm10, %v2579_v0, %v2594_v58  ;;  %v2601_v40 = vsel %vm2589_vm2, %v2579_v0, %v2582_v50  ;;  %v2603_v31 = vsel %vm2591_vm10, %v10441_v52, %v10440_v19  ;;  %v10442_v12 = vld [vmem:[#allocation27_spill] sm:$0xff] }
 0x368   : > { %v2432_v37 = vmul.f32 %v2431_v42, %v2429_v27  ;;  %v4446_v4 = vmin.u32 %v2519_v9, %v8597_v41  ;;  %v2604_v8 = vsel %vm2590_vm14, %v2601_v40, %v2603_v31  ;;  %v2605_v2 = vshll.u32 %v2565_v54, 8 }
 0x369   : > { %v4164_v14 = vadd.f32 %v4132_v7, %v10442_v12  ;;  %v2539_v36 = vsub.s32 4, %v2515_v57  ;;  %v2600_v60 = vsel %vm2590_vm14, %v2597_v11, %v2599_v35  ;;  %v2661_v13 = vand.u32 2147483647, %v10443_v33  ;;  %v10450_v12 = vld [vmem:[#allocation89_spill] sm:$0xff] }
 0x36a   : > { %v2433_v29 = vxor.u32 2147483648, %v2432_v37  ;;  %v2521_v47 = vclz %v4446_v4  ;;  %v8629_v53 = vmul.u32.u64.low %v2605_v2, %v2604_v8  ;;  %v8630_v50 = vmul.u32.u64.high %v2605_v2, %v2604_v8, %v8629_v53 }
 0x36b   : > { %v8633_v59 = vand.u32 31, %v8423_v3  ;;  %v8636_v5 = vshrl.u32 %v8560_v6, 5  ;;  %v8639_v54 = vand.u32 31, %v8560_v6  ;;  %4196 = vst [vmem:[%s6723_s15 + $0xb8] sm:$0xff] %v4164_v14  ;;  %v2596_v38 = vsel %vm2590_vm14, %v2593_v63, %v2595_v43 }
 0x36c   : > { %v2434_v0 = vsel %vm2351_vm13, %v2433_v29, %v2432_v37  ;;  %vm8648_vm8 = vcmp.le.f32.partialorder %v2453_v62, 0.7853982  ;;  %v4447_v3 = vadd.s32 4294967294, %v2521_v47  ;;  %v8660_v15 = vand.u32 3, %v8569_v22 }
 0x36d   : > { %v8652_v55 = vmul.u32.u64.low %v2605_v2, %v2600_v60  ;;  %v8653_v61 = vmul.u32.u64.high %v2605_v2, %v2600_v60, %v8652_v55  ;;  %v2437_v6 = vsel %vm8531_vm11, %v10412_v48, %v2434_v0  ;;  %v2509_v21 = vadd.s32 %v8523_v56, %v8509_v26  ;;  %v10452_v0 = vld [vmem:[#allocation98_spill] sm:$0xff] }
 0x36e   : > { %v8666_v62 = vsel %vm2455_vm9, %v2539_v36, %v2515_v57  ;;  %4799 = vcosq.f32 %v2437_v6  ;;  %vm4448_vm13 = vcmp.lt.s32.totalorder %v4447_v3, 0  ;;  %v2612_v23 = vmul.u32 %v2605_v2, %v2596_v38 }
 0x36f   : > { %v2668_v44 = vand.u32 8388607, %v2661_v13  ;;  %4801 = vsinq.f32 %v2437_v6  ;;  %v2524_v46 = vsel %vm4448_vm13, 0, %v4447_v3  ;;  %vm2614_vm4 = vc.u32 %v8630_v50, %v8652_v55  ;;  %v10454_v6 = vld [vmem:[#allocation91_spill] sm:$0xff] }
 0x370   : > { %v2678_v22 = vshll.u32 %v10213_v25, %v10446_v1  ;;  %v2525_v58 = vsub.s32 32, %v2524_v46  ;;  %v2526_v26 = vshll.u32 %v8597_v41, %v2524_v46  ;;  %v2529_v56 = vsub.s32 4294967266, %v2524_v46 }
 0x371   : > { %v2615_v57 = vadd.s32 1, %v8653_v61  ;;  %v2679_v63 = vshrl.u32 %v10215_v18, %v10447_v30  ;;  %v2681_v11 = vshll.u32 %v10215_v18, %v10446_v1  ;;  %v2682_v20 = vshrl.u32 %v10216_v10, %v10447_v30 }
 0x372   : > { %v2684_v35 = vshll.u32 %v10216_v10, %v10446_v1  ;;  %vm2559_vm7 = vcmp.lt.s32.totalorder %v10434_v24, 0  ;;  %v2527_v49 = vshrl.u32 %v2509_v21, %v2525_v58  ;;  %v2530_v27 = vadd.s32 127, %v2529_v56 }
 0x373   : > { %v2616_v41 = vsel %vm2614_vm4, %v2615_v57, %v8653_v61  ;;  %v2685_v42 = vshrl.u32 %v10080_v17, %v10447_v30  ;;  %vm2445_vm11 = vcmp.eq.s32.totalorder %v8660_v15, 0  ;;  %vm2448_vm6 = vcmp.eq.s32.totalorder %v8660_v15, 2  ;;  %v10453_v61 = vld [vmem:[#allocation99_spill] sm:$0xff] }
 0x374   : > { %v2617_v9 = vadd.s32 %v2616_v41, %v2612_v23  ;;  %v2680_v7 = vor.u32 %v2679_v63, %v2678_v22  ;;  %v2683_v43 = vor.u32 %v2682_v20, %v2681_v11  ;;  %vm2444_vm15 = vcmp.lt.s32.totalorder %v8660_v15, 2  ;;  %v10455_v15 = vld [vmem:[#allocation17_spill] sm:$0xff] }
 0x375   : > { %v2528_v40 = vor.u32 %v2527_v49, %v2526_v26  ;;  %v2531_v19 = vshll.u32 %v2530_v27, 23  ;;  %vm8693_vm5 = vcmp.le.f32.partialorder %v2557_v39, 0.7853982  ;;  %v2669_v31 = vor.u32 8388608, %v2668_v44 }
 0x376   : > { %v2686_v37 = vor.u32 %v2685_v42, %v2684_v35  ;;  %vm2441_vm12 = vweird.f32 %v10412_v48  ;;  %v2542_v4 = vsel %vm8648_vm8, 0, %v8666_v62  ;;  %v2618_v8 = vadd.s32 536870912, %v2617_v9  ;;  %v8734_v35 = vpop.permute.xlu0 %4094 }
 0x377   : > { %v2677_v2 = vshrl.u32 %v10213_v25, %v10447_v30  ;;  %vm2693_vm1 = vcmp.lt.s32.totalorder %v10450_v12, 1  ;;  %v2532_v14 = vor.u32 4788187, %v2531_v19  ;;  %vm2694_vm0 = vcmp.lt.s32.totalorder %v10450_v12, 2 }
 0x378   : > { %vm2695_vm2 = vcmp.lt.s32.totalorder %v10450_v12, 3  ;;  %v2701_v39 = vsel %vm2693_vm1, %v2680_v7, %v2683_v43  ;;  %vm3816_vm14 = vcmp.gt.s32.totalorder %v8542_v34, 0  ;;  %v2535_v36 = vcvt.s32.f32 %v2528_v40  ;;  %v4800_v53 = vpop.eup %4799 }
 0x379   : > { %v2619_v60 = vshrl.u32 %v2618_v8, 30  ;;  %vm10451_vm10 = vcmp.lt.s32.totalorder %v10450_v12, 4  ;;  %v2705_v47 = vsel %vm2693_vm1, %v2683_v43, %v2686_v37  ;;  %vm3920_vm3 = vcmp.gt.s32.totalorder %v8545_v51, 0  ;;  %v4802_v23 = vpop.eup %4801 }
 0x37a   : > { %v2698_v29 = vsel %vm10451_vm10, %v2686_v37, 2102212464  ;;  %v2533_v38 = vand.u32 2147483647, %v2532_v14  ;;  %v2703_v3 = vsel %vm2695_vm2, %v2686_v37, %v10452_v0  ;;  %v2707_v21 = vsel %vm2695_vm2, %v10454_v6, %v10453_v61 }
 0x37b   : > { %v2709_v62 = vshll.u32 %v2669_v31, 8  ;;  %v2449_v44 = vxor.u32 2147483648, %v4800_v53  ;;  %v2620_v46 = vshll.u32 %v2619_v60, 30  ;;  %v2643_v1 = vsub.s32 4, %v2619_v60 }
 0x37c   : > { %v2708_v22 = vsel %vm2694_vm0, %v2705_v47, %v2707_v21  ;;  %v2446_v58 = vxor.u32 2147483648, %v4802_v23  ;;  %v2536_v26 = vmul.f32 %v2535_v36, %v2533_v38  ;;  %v2704_v20 = vsel %vm2694_vm0, %v2701_v39, %v2703_v3 }
 0x37d   : > { %v8723_v56 = vmul.u32.u64.low %v2709_v62, %v2708_v22  ;;  %v8724_v57 = vmul.u32.u64.high %v2709_v62, %v2708_v22, %v8723_v56  ;;  %v2450_v30 = vsel %vm2448_vm6, %v2449_v44, %v4802_v23  ;;  %v8728_v63 = vsub.s32 %v2617_v9, %v2620_v46  ;;  %v10457_v23 = vld [vmem:[#allocation18_spill] sm:$0xff] }
 0x37e   : > { %v2644_v11 = vsel %vm2559_vm7, %v2643_v1, %v2619_v60  ;;  %v2447_v49 = vsel %vm2445_vm11, %v4800_v53, %v2446_v58  ;;  %v2537_v27 = vxor.u32 2147483648, %v2536_v26  ;;  %v2546_v41 = vadd.s32 3, %v2542_v4 }
 0x37f   : > { %v2697_v42 = vsel %vm2693_vm1, %v2677_v2, %v2680_v7  ;;  %v2451_v9 = vsel %vm2444_vm15, %v2447_v49, %v2450_v30  ;;  %v2623_v40 = vsub.s32 0, %v8728_v63  ;;  %v2646_v19 = vsel %vm8693_vm5, 0, %v2644_v11  ;;  %v10456_v7 = vld [vmem:[#allocation73_spill] sm:$0xff] }
 0x380   : > { %v2699_v31 = vsel %vm2695_vm2, %v2683_v43, %v2698_v29  ;;  %v2452_v37 = vsel %vm2441_vm12, nan, %v2451_v9  ;;  %v2538_v4 = vsel %vm2455_vm9, %v2537_v27, %v2536_v26  ;;  %v4061_v2 = vmul.f32 %v10456_v7, %v10455_v15 }
 0x381   : > { %v8751_v8 = vmul.u32.u64.low %v2709_v62, %v2704_v20  ;;  %v8752_v14 = vmul.u32.u64.high %v2709_v62, %v2704_v20, %v8751_v8  ;;  %v2541_v39 = vsel %vm8648_vm8, %v10423_v45, %v2538_v4  ;;  %v4450_v36 = vmin.u32 %v2623_v40, %v8728_v63 }
 0x382   : > { %v4125_v43 = vmul.f32 %v8734_v35, %v2452_v37  ;;  %4803 = vcosq.f32 %v2541_v39  ;;  %v8762_v48 = vand.u32 3, %v2546_v41  ;;  %v2700_v60 = vsel %vm2694_vm0, %v2697_v42, %v2699_v31 }
 0x383   : > { %v3597_v29 = vand.u32 2147483647, %v10280_v28  ;;  %4805 = vsinq.f32 %v2541_v39  ;;  %v2625_v47 = vclz %v4450_v36  ;;  %v2650_v53 = vadd.s32 3, %v2646_v19 }
 0x384   : > { %vm2718_vm9 = vc.u32 %v8724_v57, %v8751_v8  ;;  %v3612_v16 = vsub.s32 32, %v8633_v59  ;;  %v8773_v38 = vsel %vm3816_vm14, %v8542_v34, 0  ;;  %v2719_v0 = vadd.s32 1, %v8752_v14 }
 0x385   : > { %v4157_v12 = vadd.f32 %v4125_v43, %v4061_v2  ;;  %v8777_v3 = vsub.s32 32, %v8639_v54  ;;  %v8782_v61 = vsel %vm3920_vm3, %v8545_v51, 0  ;;  %v4451_v6 = vadd.s32 4294967294, %v2625_v47 }
 0x386   : > { %v2716_v21 = vmul.u32 %v2709_v62, %v2700_v60  ;;  %v8786_v44 = vmul.f32 %v10456_v7, %v10457_v23  ;;  %vm2552_vm8 = vcmp.eq.s32.totalorder %v8762_v48, 2  ;;  %v2720_v34 = vsel %vm2718_vm9, %v2719_v0, %v8752_v14 }
 0x387   : > { %4189 = vst [vmem:[%s6723_s15 + $0x80] sm:$0xff] %v4157_v12  ;;  %v8793_v46 = vand.u32 8388607, %v3597_v29  ;;  %vm2549_vm13 = vcmp.eq.s32.totalorder %v8762_v48, 0  ;;  %v2613_v51 = vadd.s32 %v8652_v55, %v8630_v50  ;;  %vm4452_vm4 = vcmp.lt.s32.totalorder %v4451_v6, 0 }
 0x388   : > { %v8798_v62 = vand.u32 3, %v2650_v53  ;;  %v2721_v1 = vadd.s32 %v2720_v34, %v2716_v21  ;;  %vm2548_vm11 = vcmp.lt.s32.totalorder %v8762_v48, 2  ;;  %v2628_v22 = vsel %vm4452_vm4, 0, %v4451_v6 }
 0x389   : > { %v8802_v58 = vshrl.u32 %v10213_v25, %v3612_v16  ;;  %v3614_v26 = vshll.u32 %v10213_v25, %v8633_v59  ;;  %v3615_v56 = vshrl.u32 %v10215_v18, %v3612_v16  ;;  %vm2545_vm6 = vweird.f32 %v10423_v45 }
 0x38a   : > { %v2629_v30 = vsub.s32 32, %v2628_v22  ;;  %v2633_v11 = vsub.s32 4294967266, %v2628_v22  ;;  %v2722_v50 = vadd.s32 536870912, %v2721_v1  ;;  %v3617_v55 = vshll.u32 %v10215_v18, %v8633_v59 }
 0x38b   : > { %v2630_v20 = vshll.u32 %v8728_v63, %v2628_v22  ;;  %v3605_v49 = vor.u32 8388608, %v8793_v46  ;;  %v3618_v27 = vshrl.u32 %v10216_v10, %v3612_v16  ;;  %v3621_v41 = vshrl.u32 %v10080_v17, %v3612_v16 }
 0x38c   : > { %v2631_v42 = vshrl.u32 %v2613_v51, %v2629_v30  ;;  %v2634_v9 = vadd.s32 127, %v2633_v11  ;;  %v2723_v40 = vshrl.u32 %v2722_v50, 30  ;;  %v10458_v19 = vmov 920167782   ;;  %v4804_v37 = vpop.eup %4803 }
 0x38d   : > { %v3624_v31 = vshrl.u32 %v10458_v19, %v3612_v16  ;;  %v3616_v4 = vor.u32 %v3615_v56, %v3614_v26  ;;  %v3620_v14 = vshll.u32 %v10216_v10, %v8633_v59  ;;  %v3623_v15 = vshll.u32 %v10080_v17, %v8633_v59  ;;  %v4806_v39 = vpop.eup %4805 }
 0x38e   : > { %v10459_v63 = vmov 1326507024   ;;  %vm2663_vm15 = vcmp.lt.s32.totalorder %v10443_v33, 0  ;;  %v2553_v36 = vxor.u32 2147483648, %v4804_v37  ;;  %v2632_v43 = vor.u32 %v2631_v42, %v2630_v20 }
 0x38f   : > { %v3627_v2 = vshrl.u32 %v10459_v63, %v3612_v16  ;;  %v2635_v60 = vshll.u32 %v2634_v9, 23  ;;  %v2724_v47 = vshll.u32 %v2723_v40, 30  ;;  %v2550_v53 = vxor.u32 2147483648, %v4806_v39 }
 0x390   : > { %v3619_v0 = vor.u32 %v3618_v27, %v3617_v55  ;;  %v3622_v12 = vor.u32 %v3621_v41, %v3620_v14  ;;  %v3626_v6 = vshll.u32 %v10458_v19, %v8633_v59  ;;  %v2554_v21 = vsel %vm2552_vm8, %v2553_v36, %v4806_v39 }
 0x391   : > { %v2636_v23 = vor.u32 4788187, %v2635_v60  ;;  %v8825_v34 = vsub.s32 %v2721_v1, %v2724_v47  ;;  %v3625_v16 = vor.u32 %v3624_v31, %v3623_v15  ;;  %v2551_v46 = vsel %vm2549_vm13, %v4804_v37, %v2550_v53 }
 0x392   : > { %v3628_v51 = vor.u32 %v3627_v2, %v3626_v6  ;;  %vm3629_vm12 = vcmp.lt.s32.totalorder %v8555_v32, 1  ;;  %vm3630_vm1 = vcmp.lt.s32.totalorder %v8555_v32, 2  ;;  %v2555_v22 = vsel %vm2548_vm11, %v2551_v46, %v2554_v21 }
 0x393   : > { %v2637_v26 = vand.u32 2147483647, %v2636_v23  ;;  %v2639_v59 = vcvt.s32.f32 %v2632_v43  ;;  %v2727_v56 = vsub.s32 0, %v8825_v34  ;;  %v2556_v1 = vsel %vm2545_vm6, nan, %v2555_v22 }
 0x394   : > { %vm8838_vm0 = vcmp.le.f32.partialorder %v2661_v13, 0.7853982  ;;  %v2747_v11 = vsub.s32 4, %v2723_v40  ;;  %vm3631_vm2 = vcmp.lt.s32.totalorder %v8555_v32, 3  ;;  %vm3632_vm14 = vcmp.lt.s32.totalorder %v8555_v32, 4 }
 0x395   : > { %v2640_v48 = vmul.f32 %v2639_v59, %v2637_v26  ;;  %v4454_v50 = vmin.u32 %v2727_v56, %v8825_v34  ;;  %v4126_v55 = vmul.f32 %v8734_v35, %v2556_v1  ;;  %v3637_v45 = vsel %vm3629_vm12, %v3616_v4, %v3619_v0 }
 0x396   : > { %v3634_v20 = vsel %vm3632_vm14, %v3622_v12, 2102212464  ;;  %v3638_v27 = vsel %vm3632_vm14, %v3625_v16, 920167782  ;;  %v3641_v13 = vsel %vm3629_vm12, %v3619_v0, %v3622_v12  ;;  %v3642_v41 = vsel %vm3632_vm14, %v3628_v51, 1326507024 }
 0x397   : > { %v2641_v42 = vxor.u32 2147483648, %v2640_v48  ;;  %v2729_v9 = vclz %v4454_v50  ;;  %v4158_v31 = vadd.f32 %v4126_v55, %v8786_v44  ;;  %v3639_v37 = vsel %vm3631_vm2, %v3622_v12, %v3638_v27  ;;  %v10463_v51 = vld [vmem:[#allocation19_spill] sm:$0xff] }
 0x398   : > { %v2717_v14 = vadd.s32 %v8751_v8, %v8724_v57  ;;  %v2748_v15 = vsel %vm2663_vm15, %v2747_v11, %v2723_v40  ;;  %v3633_v2 = vsel %vm3629_vm12, %v8802_v58, %v3616_v4  ;;  %v3640_v39 = vsel %vm3630_vm1, %v3637_v45, %v3639_v37  ;;  %v10462_v40 = vld [vmem:[#allocation41_spill] sm:$0xff] }
 0x399   : > { %v2642_v36 = vsel %vm2559_vm7, %v2641_v42, %v2640_v48  ;;  %v4455_v44 = vadd.s32 4294967294, %v2729_v9  ;;  %4190 = vst [vmem:[%s6723_s15 + $0x88] sm:$0xff] %v4158_v31  ;;  %v3643_v43 = vsel %vm3631_vm2, %v3625_v16, %v3642_v41  ;;  %v3645_v60 = vshll.u32 %v3605_v49, 8 }
 0x39a   : > { %v2645_v57 = vsel %vm8693_vm5, %v10434_v24, %v2642_v36  ;;  %v3635_v8 = vsel %vm3631_vm2, %v3619_v0, %v3634_v20  ;;  %v3644_v58 = vsel %vm3630_vm1, %v3641_v13, %v3643_v43  ;;  %v3701_v4 = vand.u32 2147483647, %v10462_v40 }
 0x39b   : > { %4807 = vcosq.f32 %v2645_v57  ;;  %vm4456_vm7 = vcmp.lt.s32.totalorder %v4455_v44, 0  ;;  %v8875_v47 = vmul.u32.u64.low %v3645_v60, %v3644_v58  ;;  %v8876_v53 = vmul.u32.u64.high %v3645_v60, %v3644_v58, %v8875_v47 }
 0x39c   : > { %4809 = vsinq.f32 %v2645_v57  ;;  %v2732_v12 = vsel %vm4456_vm7, 0, %v4455_v44  ;;  %v8878_v49 = vmul.u32.u64.low %v3645_v60, %v3640_v39  ;;  %v8879_v6 = vmul.u32.u64.high %v3645_v60, %v3640_v39, %v8878_v49 }
 0x39d   : > { %v2733_v52 = vsub.s32 32, %v2732_v12  ;;  %v2737_v21 = vsub.s32 4294967266, %v2732_v12  ;;  %v2750_v0 = vsel %vm8838_vm0, 0, %v2748_v15  ;;  %v3636_v23 = vsel %vm3630_vm1, %v3633_v2, %v3635_v8 }
 0x39e   : > { %v8887_v16 = vshrl.u32 %v8773_v38, 5  ;;  %v8890_v46 = vand.u32 31, %v8773_v38  ;;  %v8894_v22 = vmul.f32 %v10456_v7, %v10463_v51  ;;  %v2734_v26 = vshll.u32 %v8825_v34, %v2732_v12 }
 0x39f   : > { %vm2656_vm5 = vcmp.eq.s32.totalorder %v8798_v62, 2  ;;  %v2735_v59 = vshrl.u32 %v2717_v14, %v2733_v52  ;;  %v2738_v56 = vadd.s32 127, %v2737_v21  ;;  %vm3654_vm10 = vc.u32 %v8876_v53, %v8878_v49 }
 0x3a0   : > { %v8902_v32 = vand.u32 8388607, %v3701_v4  ;;  %vm2653_vm3 = vcmp.eq.s32.totalorder %v8798_v62, 0  ;;  %v8905_v38 = vadd.s32 3, %v2750_v0  ;;  %v3652_v1 = vmul.u32 %v3645_v60, %v3636_v23 }
 0x3a1   : > { %v3655_v11 = vadd.s32 1, %v8879_v6  ;;  %v3719_v34 = vshrl.u32 %v10215_v18, %v8777_v3  ;;  %vm2652_vm9 = vcmp.lt.s32.totalorder %v8798_v62, 2  ;;  %v2736_v48 = vor.u32 %v2735_v59, %v2734_v26 }
 0x3a2   : > { %v2739_v50 = vshll.u32 %v2738_v56, 23  ;;  %v3717_v55 = vshrl.u32 %v10213_v25, %v8777_v3  ;;  %v3722_v45 = vshrl.u32 %v10216_v10, %v8777_v3  ;;  %vm2649_vm8 = vweird.f32 %v10434_v24 }
 0x3a3   : > { %v3656_v20 = vsel %vm3654_vm10, %v3655_v11, %v8879_v6  ;;  %v3718_v27 = vshll.u32 %v10213_v25, %v8639_v54  ;;  %v3721_v13 = vshll.u32 %v10215_v18, %v8639_v54  ;;  %v3725_v41 = vshrl.u32 %v10080_v17, %v8777_v3 }
 0x3a4   : > { %v2740_v42 = vor.u32 4788187, %v2739_v50  ;;  %v3657_v9 = vadd.s32 %v3656_v20, %v3652_v1  ;;  %v3709_v31 = vor.u32 8388608, %v8902_v32  ;;  %v3724_v37 = vshll.u32 %v10216_v10, %v8639_v54 }
 0x3a5   : > { %v2743_v14 = vcvt.s32.f32 %v2736_v48  ;;  %vm3599_vm13 = vcmp.lt.s32.totalorder %v10280_v28, 0  ;;  %v3720_v15 = vor.u32 %v3719_v34, %v3718_v27  ;;  %v3723_v2 = vor.u32 %v3722_v45, %v3721_v13  ;;  %v4808_v36 = vpop.eup %4807 }
 0x3a6   : > { %v3728_v39 = vshrl.u32 %v10458_v19, %v8777_v3  ;;  %v2741_v44 = vand.u32 2147483647, %v2740_v42  ;;  %v3658_v43 = vadd.s32 536870912, %v3657_v9  ;;  %v3726_v60 = vor.u32 %v3725_v41, %v3724_v37  ;;  %v4810_v8 = vpop.eup %4809 }
 0x3a7   : > { %v3727_v57 = vshll.u32 %v10080_v17, %v8639_v54  ;;  %v2657_v58 = vxor.u32 2147483648, %v4808_v36  ;;  %v3730_v47 = vshll.u32 %v10458_v19, %v8639_v54  ;;  %v3731_v12 = vshrl.u32 %v10459_v63, %v8777_v3 }
 0x3a8   : > { %vm3733_vm4 = vcmp.lt.s32.totalorder %v8636_v5, 1  ;;  %v2654_v6 = vxor.u32 2147483648, %v4810_v8  ;;  %v2744_v52 = vmul.f32 %v2743_v14, %v2741_v44  ;;  %v3659_v21 = vshrl.u32 %v3658_v43, 30 }
 0x3a9   : > { %v3729_v0 = vor.u32 %v3728_v39, %v3727_v57  ;;  %v2658_v23 = vsel %vm2656_vm5, %v2657_v58, %v4810_v8  ;;  %vm3734_vm11 = vcmp.lt.s32.totalorder %v8636_v5, 2  ;;  %vm3735_vm6 = vcmp.lt.s32.totalorder %v8636_v5, 3 }
 0x3aa   : > { %vm3736_vm12 = vcmp.lt.s32.totalorder %v8636_v5, 4  ;;  %v2655_v54 = vsel %vm2653_vm3, %v4808_v36, %v2654_v6  ;;  %v2745_v51 = vxor.u32 2147483648, %v2744_v52  ;;  %v3660_v3 = vshll.u32 %v3659_v21, 30 }
 0x3ab   : > { %v3683_v26 = vsub.s32 4, %v3659_v21  ;;  %v2659_v59 = vsel %vm2652_vm9, %v2655_v54, %v2658_v23  ;;  %v3732_v56 = vor.u32 %v3731_v12, %v3730_v47  ;;  %v3737_v32 = vsel %vm3733_vm4, %v3717_v55, %v3720_v15 }
 0x3ac   : > { %v3738_v1 = vsel %vm3736_vm12, %v3726_v60, 2102212464  ;;  %v2660_v11 = vsel %vm2649_vm8, nan, %v2659_v59  ;;  %v2746_v34 = vsel %vm2663_vm15, %v2745_v51, %v2744_v52  ;;  %v8953_v48 = vsub.s32 %v3657_v9, %v3660_v3 }
 0x3ad   : > { %v3742_v50 = vsel %vm3736_vm12, %v3729_v0, 920167782  ;;  %v2749_v62 = vsel %vm8838_vm0, %v10443_v33, %v2746_v34  ;;  %v4127_v55 = vmul.f32 %v8734_v35, %v2660_v11  ;;  %v3741_v45 = vsel %vm3733_vm4, %v3720_v15, %v3723_v2 }
 0x3ae   : > { %v3745_v24 = vsel %vm3733_vm4, %v3723_v2, %v3726_v60  ;;  %4811 = vcosq.f32 %v2749_v62  ;;  %v3663_v20 = vsub.s32 0, %v8953_v48  ;;  %v3684_v27 = vsel %vm3599_vm13, %v3683_v26, %v3659_v21 }
 0x3af   : > { %v3739_v13 = vsel %vm3735_vm6, %v3723_v2, %v3738_v1  ;;  %4813 = vsinq.f32 %v2749_v62  ;;  %v4159_v30 = vadd.f32 %v4127_v55, %v8894_v22  ;;  %v3743_v41 = vsel %vm3735_vm6, %v3726_v60, %v3742_v50  ;;  %v10466_v60 = vld [vmem:[#allocation42_spill] sm:$0xff] }
 0x3b0   : > { %v3746_v42 = vsel %vm3736_vm12, %v3732_v56, 1326507024  ;;  %v2755_v9 = vand.u32 3, %v8905_v38  ;;  %v4490_v37 = vmin.u32 %v3663_v20, %v8953_v48  ;;  %v3744_v14 = vsel %vm3734_vm11, %v3741_v45, %v3743_v41 }
 0x3b1   : > { %v3747_v15 = vsel %vm3735_vm6, %v3729_v0, %v3746_v42  ;;  %v8982_v2 = vsub.s32 32, %v8890_v46  ;;  %4191 = vst [vmem:[%s6723_s15 + $0x90] sm:$0xff] %v4159_v30  ;;  %vm8987_vm15 = vcmp.le.f32.partialorder %v3597_v29, 0.7853982  ;;  %v3749_v39 = vshll.u32 %v3709_v31, 8  ;;  %v10467_v31 = vld [vmem:[#allocation20_spill] sm:$0xff] }
 0x3b2   : > { %v3748_v38 = vsel %vm3734_vm11, %v3745_v24, %v3747_v15  ;;  %v3665_v36 = vclz %v4490_v37  ;;  %v3686_v44 = vsel %vm8987_vm15, 0, %v3684_v27  ;;  %v3740_v43 = vsel %vm3734_vm11, %v3737_v32, %v3739_v13 }
 0x3b3   : > { %v3805_v57 = vand.u32 2147483647, %v10466_v60  ;;  %v8998_v8 = vmul.u32.u64.low %v3749_v39, %v3748_v38  ;;  %v8999_v58 = vmul.u32.u64.high %v3749_v39, %v3748_v38, %v8998_v8  ;;  %v9006_v12 = vand.u32 31, %v8782_v61 }
 0x3b4   : > { %v9001_v29 = vmul.u32.u64.low %v3749_v39, %v3744_v14  ;;  %v9002_v47 = vmul.u32.u64.high %v3749_v39, %v3744_v14, %v9001_v29  ;;  %v4064_v6 = vmul.f32 %v10456_v7, %v10467_v31  ;;  %vm2756_vm1 = vcmp.lt.s32.totalorder %v2755_v9, 2 }
 0x3b5   : > { %v4491_v52 = vadd.s32 4294967294, %v3665_v36  ;;  %vm2753_vm0 = vweird.f32 %v10443_v33  ;;  %vm2757_vm2 = vcmp.eq.s32.totalorder %v2755_v9, 0  ;;  %vm2760_vm14 = vcmp.eq.s32.totalorder %v2755_v9, 2 }
 0x3b6   : > { %v3653_v5 = vadd.s32 %v8878_v49, %v8876_v53  ;;  %v9013_v21 = vadd.s32 3, %v3686_v44  ;;  %v3756_v0 = vmul.u32 %v3749_v39, %v3740_v43  ;;  %v9017_v23 = vand.u32 8388607, %v3805_v57 }
 0x3b7   : > { %vm4492_vm7 = vcmp.lt.s32.totalorder %v4491_v52, 0  ;;  %v3821_v7 = vshrl.u32 %v10213_v25, %v8982_v2  ;;  %vm3758_vm5 = vc.u32 %v8999_v58, %v9001_v29  ;;  %v3759_v51 = vadd.s32 1, %v9002_v47 }
 0x3b8   : > { %v3668_v54 = vsel %vm4492_vm7, 0, %v4491_v52  ;;  %v3822_v53 = vshll.u32 %v10213_v25, %v8890_v46  ;;  %v4812_v49 = vpop.eup %4811  ;;  %v3823_v59 = vshrl.u32 %v10215_v18, %v8982_v2  ;;  %v3825_v56 = vshll.u32 %v10215_v18, %v8890_v46 }
 0x3b9   : > { %v3669_v3 = vsub.s32 32, %v3668_v54  ;;  %v3673_v26 = vsub.s32 4294967266, %v3668_v54  ;;  %v4814_v32 = vpop.eup %4813  ;;  %v2761_v1 = vxor.u32 2147483648, %v4812_v49  ;;  %v3670_v11 = vshll.u32 %v8953_v48, %v3668_v54 }
 0x3ba   : > { %v3760_v34 = vsel %vm3758_vm5, %v3759_v51, %v9002_v47  ;;  %v3826_v50 = vshrl.u32 %v10216_v10, %v8982_v2  ;;  %v2758_v62 = vxor.u32 2147483648, %v4814_v32  ;;  %vm3703_vm10 = vcmp.lt.s32.totalorder %v10462_v40, 0 }
 0x3bb   : > { %v3671_v55 = vshrl.u32 %v3653_v5, %v3669_v3  ;;  %v3674_v45 = vadd.s32 127, %v3673_v26  ;;  %v3761_v24 = vadd.s32 %v3760_v34, %v3756_v0  ;;  %v2762_v20 = vsel %vm2760_vm14, %v2761_v1, %v4814_v32 }
 0x3bc   : > { %v3828_v27 = vshll.u32 %v10216_v10, %v8890_v46  ;;  %v3829_v13 = vshrl.u32 %v10080_v17, %v8982_v2  ;;  %v3832_v48 = vshrl.u32 %v10458_v19, %v8982_v2  ;;  %v2759_v30 = vsel %vm2757_vm2, %v4812_v49, %v2758_v62 }
 0x3bd   : > { %v3672_v41 = vor.u32 %v3671_v55, %v3670_v11  ;;  %v3675_v42 = vshll.u32 %v3674_v45, 23  ;;  %v3762_v37 = vadd.s32 536870912, %v3761_v24  ;;  %v2763_v14 = vsel %vm2756_vm1, %v2759_v30, %v2762_v20  ;;  %v10476_v30 = vld [vmem:[#allocation28_spill] sm:$0xff] }
 0x3be   : > { %v3824_v15 = vor.u32 %v3823_v59, %v3822_v53  ;;  %v3827_v38 = vor.u32 %v3826_v50, %v3825_v56  ;;  %v3831_v39 = vshll.u32 %v10080_v17, %v8890_v46  ;;  %v2764_v36 = vsel %vm2753_vm0, nan, %v2763_v14  ;;  %v10468_v53 = vld [vmem:[#allocation116_spill] sm:$0xff] }
 0x3bf   : > { %v3676_v44 = vor.u32 4788187, %v3675_v42  ;;  %v3763_v43 = vshrl.u32 %v3762_v37, 30  ;;  %v3830_v8 = vor.u32 %v3829_v13, %v3828_v27  ;;  %v4128_v47 = vmul.f32 %v8734_v35, %v2764_v36 }
 0x3c0   : > { %v3833_v31 = vor.u32 %v3832_v48, %v3831_v39  ;;  %v3834_v52 = vshll.u32 %v10458_v19, %v8890_v46  ;;  %v3835_v9 = vshrl.u32 %v10459_v63, %v8982_v2  ;;  %v3679_v0 = vcvt.s32.f32 %v3672_v41  ;;  %v10471_v39 = vld [vmem:[#allocation113_spill] sm:$0xff] }
 0x3c1   : > { %v3677_v5 = vand.u32 2147483647, %v3676_v44  ;;  %v3764_v54 = vshll.u32 %v3763_v43, 30  ;;  %v3787_v51 = vsub.s32 4, %v3763_v43  ;;  %vm3504_vm3 = vcmp.gt.s32.totalorder %v10468_v53, 0  ;;  %v10472_v44 = vld [vmem:[#allocation111_spill] sm:$0xff] }
 0x3c2   : > { %v4160_v33 = vadd.f32 %v4128_v47, %v4064_v6  ;;  %v3813_v49 = vor.u32 8388608, %v9017_v23  ;;  %v3836_v3 = vor.u32 %v3835_v9, %v3834_v52  ;;  %vm3840_vm9 = vcmp.lt.s32.totalorder %v8887_v16, 4  ;;  %v10474_v47 = vld [vmem:[#allocation115_spill] sm:$0xff] }
 0x3c3   : > { %v3680_v35 = vmul.f32 %v3679_v0, %v3677_v5  ;;  %v9056_v26 = vsub.s32 %v3761_v24, %v3764_v54  ;;  %vm3837_vm8 = vcmp.lt.s32.totalorder %v8887_v16, 1  ;;  %v3842_v46 = vsel %vm3840_vm9, %v3830_v8, 2102212464 }
 0x3c4   : > { %4192 = vst [vmem:[%s6723_s15 + $0x98] sm:$0xff] %v4160_v33  ;;  %vm3838_vm4 = vcmp.lt.s32.totalorder %v8887_v16, 2  ;;  %vm3839_vm11 = vcmp.lt.s32.totalorder %v8887_v16, 3  ;;  %v3845_v2 = vsel %vm3837_vm8, %v3824_v15, %v3827_v38  ;;  %v3846_v6 = vsel %vm3840_vm9, %v3833_v31, 920167782 }
 0x3c5   : > { %v3681_v23 = vxor.u32 2147483648, %v3680_v35  ;;  %v3767_v59 = vsub.s32 0, %v9056_v26  ;;  %v3788_v56 = vsel %vm3703_vm10, %v3787_v51, %v3763_v43  ;;  %v3841_v32 = vsel %vm3837_vm8, %v3821_v7, %v3824_v15 }
 0x3c6   : > { %v3843_v1 = vsel %vm3839_vm11, %v3827_v38, %v3842_v46  ;;  %v3847_v11 = vsel %vm3839_vm11, %v3830_v8, %v3846_v6  ;;  %v3850_v34 = vsel %vm3840_vm9, %v3836_v3, 1326507024  ;;  %v3853_v50 = vshll.u32 %v3813_v49, 8  ;;  %v10475_v49 = vld [vmem:[#allocation94_spill] sm:$0xff] }
 0x3c7   : > { %v3682_v62 = vsel %vm3599_vm13, %v3681_v23, %v3680_v35  ;;  %v4494_v55 = vmin.u32 %v3767_v59, %v9056_v26  ;;  %v3848_v45 = vsel %vm3838_vm4, %v3845_v2, %v3847_v11  ;;  %v3849_v7 = vsel %vm3837_vm8, %v3827_v38, %v3830_v8 }
 0x3c8   : > { %v3685_v24 = vsel %vm8987_vm15, %v10280_v28, %v3682_v62  ;;  %v3851_v20 = vsel %vm3839_vm11, %v3833_v31, %v3850_v34  ;;  %v9091_v27 = vmul.u32.u64.low %v3853_v50, %v3848_v45  ;;  %v9092_v13 = vmul.u32.u64.high %v3853_v50, %v3848_v45, %v9091_v27 }
 0x3c9   : > { %v3924_v48 = vsub.s32 32, %v9006_v12  ;;  %4815 = vcosq.f32 %v3685_v24  ;;  %vm9098_vm13 = vcmp.le.f32.partialorder %v3701_v4, 0.7853982  ;;  %v3769_v41 = vclz %v4494_v55 }
 0x3ca   : > { %4817 = vsinq.f32 %v3685_v24  ;;  %v9103_v22 = vand.u32 3, %v9013_v21  ;;  %v3790_v42 = vsel %vm9098_vm13, 0, %v3788_v56  ;;  %v3852_v37 = vsel %vm3838_vm4, %v3849_v7, %v3851_v20  ;;  %v10473_v21 = vld [vmem:[#allocation114_spill] sm:$0xff] }
 0x3cb   : > { %v4495_v14 = vadd.s32 4294967294, %v3769_v41  ;;  %v3844_v15 = vsel %vm3838_vm4, %v3841_v32, %v3843_v1  ;;  %v9111_v38 = vmul.u32.u64.low %v3853_v50, %v3852_v37  ;;  %v9112_v4 = vmul.u32.u64.high %v3853_v50, %v3852_v37, %v9111_v38 }
 0x3cc   : > { %v9115_v36 = vsub.s32 32, %v10471_v39  ;;  %v9118_v43 = vshrl.u32 %v10472_v44, 5  ;;  %v9121_v8 = vsub.s32 32, %v10473_v21  ;;  %v9124_v31 = vand.u32 31, %v10474_v47 }
 0x3cd   : > { %v9129_v16 = vsel %vm3504_vm3, %v10468_v53, 0  ;;  %v9132_v52 = vshrl.u32 %v8782_v61, 5  ;;  %vm4496_vm6 = vcmp.lt.s32.totalorder %v4495_v14, 0  ;;  %v3863_v9 = vadd.s32 1, %v9092_v13 }
 0x3ce   : > { %vm3693_vm12 = vcmp.eq.s32.totalorder %v9103_v22, 0  ;;  %vm3696_vm15 = vcmp.eq.s32.totalorder %v9103_v22, 2  ;;  %v3757_v5 = vadd.s32 %v9001_v29, %v8999_v58  ;;  %v3772_v0 = vsel %vm4496_vm6, 0, %v4495_v14 }
 0x3cf   : > { %v9139_v54 = vadd.s32 3, %v3790_v42  ;;  %v3860_v51 = vmul.u32 %v3853_v50, %v3844_v15  ;;  %v3773_v33 = vsub.s32 32, %v3772_v0  ;;  %v3777_v53 = vsub.s32 4294967266, %v3772_v0 }
 0x3d0   : > { %v3909_v3 = vand.u32 2147483647, %v10475_v49  ;;  %v3925_v61 = vshrl.u32 %v10213_v25, %v3924_v48  ;;  %vm3862_vm1 = vc.u32 %v9112_v4, %v9091_v27  ;;  %v3926_v35 = vshll.u32 %v10213_v25, %v9006_v12 }
 0x3d1   : > { %v3927_v46 = vshrl.u32 %v10215_v18, %v3924_v48  ;;  %v3930_v58 = vshrl.u32 %v10216_v10, %v3924_v48  ;;  %vm3692_vm0 = vcmp.lt.s32.totalorder %v9103_v22, 2  ;;  %v3774_v29 = vshll.u32 %v9056_v26, %v3772_v0 }
 0x3d2   : > { %v3775_v2 = vshrl.u32 %v3757_v5, %v3773_v33  ;;  %v3778_v6 = vadd.s32 127, %v3777_v53  ;;  %v3864_v23 = vsel %vm3862_vm1, %v3863_v9, %v9092_v13  ;;  %v3929_v56 = vshll.u32 %v10215_v18, %v9006_v12 }
 0x3d3   : > { %v3865_v59 = vadd.s32 %v3864_v23, %v3860_v51  ;;  %v3933_v32 = vshrl.u32 %v10080_v17, %v3924_v48  ;;  %v3936_v1 = vshrl.u32 %v10458_v19, %v3924_v48  ;;  %v4816_v11 = vpop.eup %4815  ;;  %v3916_v62 = vand.u32 8388607, %v3909_v3 }
 0x3d4   : > { %v3776_v34 = vor.u32 %v3775_v2, %v3774_v29  ;;  %v3779_v50 = vshll.u32 %v3778_v6, 23  ;;  %v3932_v26 = vshll.u32 %v10216_v10, %v9006_v12  ;;  %v4818_v55 = vpop.eup %4817  ;;  %vm3689_vm2 = vweird.f32 %v10280_v28 }
 0x3d5   : > { %v3697_v45 = vxor.u32 2147483648, %v4816_v11  ;;  %v3866_v7 = vadd.s32 536870912, %v3865_v59  ;;  %v3935_v24 = vshll.u32 %v10080_v17, %v9006_v12  ;;  %v3939_v20 = vshrl.u32 %v10459_v63, %v3924_v48 }
 0x3d6   : > { %v3694_v13 = vxor.u32 2147483648, %v4818_v55  ;;  %v3780_v41 = vor.u32 4788187, %v3779_v50  ;;  %v3928_v42 = vor.u32 %v3927_v46, %v3926_v35  ;;  %v3931_v37 = vor.u32 %v3930_v58, %v3929_v56 }
 0x3d7   : > { %v3867_v14 = vshrl.u32 %v3866_v7, 30  ;;  %v3934_v15 = vor.u32 %v3933_v32, %v3932_v26  ;;  %v3937_v38 = vor.u32 %v3936_v1, %v3935_v24  ;;  %v3938_v44 = vshll.u32 %v10458_v19, %v9006_v12 }
 0x3d8   : > { %v3695_v9 = vsel %vm3693_vm12, %v4816_v11, %v3694_v13  ;;  %v3698_v5 = vsel %vm3696_vm15, %v3697_v45, %v4818_v55  ;;  %v3781_v0 = vand.u32 2147483647, %v3780_v41  ;;  %v3783_v51 = vcvt.s32.f32 %v3776_v34  ;;  %v10477_v13 = vld [vmem:[#allocation90_spill] sm:$0xff] }
 0x3d9   : > { %v3868_v33 = vshll.u32 %v3867_v14, 30  ;;  %v3917_v48 = vor.u32 8388608, %v3916_v62  ;;  %v3940_v53 = vor.u32 %v3939_v20, %v3938_v44  ;;  %vm3941_vm14 = vcmp.lt.s32.totalorder %v9132_v52, 1 }
 0x3da   : > { %v3784_v35 = vmul.f32 %v3783_v51, %v3781_v0  ;;  %vm3942_vm7 = vcmp.lt.s32.totalorder %v9132_v52, 2  ;;  %vm3944_vm5 = vcmp.lt.s32.totalorder %v9132_v52, 4  ;;  %v3949_v12 = vsel %vm3941_vm14, %v3928_v42, %v3931_v37  ;;  %v10479_v0 = vld [vmem:[#allocation30_spill] sm:$0xff] }
 0x3db   : > { %v3699_v46 = vsel %vm3692_vm0, %v3695_v9, %v3698_v5  ;;  %v9177_v58 = vsub.s32 %v3865_v59, %v3868_v33  ;;  %vm3943_vm3 = vcmp.lt.s32.totalorder %v9132_v52, 3  ;;  %v3950_v29 = vsel %vm3944_vm5, %v3937_v38, 920167782 }
 0x3dc   : > { %v3785_v2 = vxor.u32 2147483648, %v3784_v35  ;;  %v3891_v6 = vsub.s32 4, %v3867_v14  ;;  %v3946_v23 = vsel %vm3944_vm5, %v3934_v15, 2102212464  ;;  %v3951_v56 = vsel %vm3943_vm3, %v3934_v15, %v3950_v29 }
 0x3dd   : > { %v3871_v32 = vsub.s32 0, %v9177_v58  ;;  %v3945_v22 = vsel %vm3941_vm14, %v3925_v61, %v3928_v42  ;;  %v3952_v59 = vsel %vm3942_vm7, %v3949_v12, %v3951_v56  ;;  %v3953_v1 = vsel %vm3941_vm14, %v3931_v37, %v3934_v15 }
 0x3de   : > { %v3700_v11 = vsel %vm3689_vm2, nan, %v3699_v46  ;;  %v3786_v34 = vsel %vm3703_vm10, %v3785_v2, %v3784_v35  ;;  %v3954_v50 = vsel %vm3944_vm5, %v3940_v53, 1326507024  ;;  %v3957_v62 = vshll.u32 %v3917_v48, 8 }
 0x3df   : > { %v3789_v61 = vsel %vm9098_vm13, %v10462_v40, %v3786_v34  ;;  %v4498_v26 = vmin.u32 %v3871_v32, %v9177_v58  ;;  %v3947_v55 = vsel %vm3943_vm3, %v3931_v37, %v3946_v23  ;;  %v3955_v28 = vsel %vm3943_vm3, %v3937_v38, %v3954_v50  ;;  %v10478_v37 = vld [vmem:[#allocation29_spill] sm:$0xff]  ;;  %v9222_v38 = vpop.permute.xlu1 %4106 }
 0x3e0   : > { %4819 = vcosq.f32 %v3789_v61  ;;  %v3956_v45 = vsel %vm3942_vm7, %v3953_v1, %v3955_v28  ;;  %v9209_v7 = vmul.u32.u64.low %v3957_v62, %v3952_v59  ;;  %v9210_v24 = vmul.u32.u64.high %v3957_v62, %v3952_v59, %v9209_v7 }
 0x3e1   : > { %v9214_v20 = vsub.s32 32, %v9124_v31  ;;  %v4073_v41 = vmul.f32 %v10477_v13, %v10476_v30  ;;  %4821 = vsinq.f32 %v3789_v61  ;;  %v3873_v42 = vclz %v4498_v26 }
 0x3e2   : > { %v9220_v15 = vmul.f32 %v10477_v13, %v10478_v37  ;;  %v3948_v44 = vsel %vm3942_vm7, %v3945_v22, %v3947_v55  ;;  %v9226_v9 = vmul.u32.u64.low %v3957_v62, %v3956_v45  ;;  %v9227_v5 = vmul.u32.u64.high %v3957_v62, %v3956_v45, %v9226_v9 }
 0x3e3   : > { %v9231_v51 = vmul.f32 %v10477_v13, %v10479_v0  ;;  %vm3807_vm10 = vcmp.lt.s32.totalorder %v10466_v60, 0  ;;  %v4499_v33 = vadd.s32 4294967294, %v3873_v42  ;;  %v4137_v48 = vmul.f32 %v9222_v38, %v3700_v11 }
 0x3e4   : > { %v3795_v53 = vand.u32 3, %v9139_v54  ;;  %vm9238_vm9 = vcmp.le.f32.partialorder %v3805_v57, 0.7853982  ;;  %v3892_v52 = vsel %vm3807_vm10, %v3891_v6, %v3867_v14  ;;  %v3967_v12 = vadd.s32 1, %v9210_v24  ;;  %v10482_v57 = vld [vmem:[#allocation45_spill] sm:$0xff] }
 0x3e5   : > { %v3861_v46 = vadd.s32 %v9091_v27, %v9112_v4  ;;  %vm4500_vm8 = vcmp.lt.s32.totalorder %v4499_v33, 0  ;;  %v3964_v29 = vmul.u32 %v3957_v62, %v3948_v44  ;;  %v4169_v2 = vadd.f32 %v4137_v48, %v4073_v41 }
 0x3e6   : > { %v3876_v23 = vsel %vm4500_vm8, 0, %v4499_v33  ;;  %vm3966_vm4 = vc.u32 %v9227_v5, %v9209_v7  ;;  %v3181_v54 = vand.u32 2147483647, %v10482_v57  ;;  %v3199_v56 = vshrl.u32 %v10215_v18, %v9115_v36 }
 0x3e7   : > { %vm3793_vm11 = vweird.f32 %v10462_v40  ;;  %v3877_v14 = vsub.s32 32, %v3876_v23  ;;  %v3881_v6 = vsub.s32 4294967266, %v3876_v23  ;;  %v3894_v32 = vsel %vm9238_vm9, 0, %v3892_v52  ;;  %4201 = vst [vmem:[%s6723_s15 + $0xe0] sm:$0xff] %v4169_v2 }
 0x3e8   : > { %v3968_v27 = vsel %vm3966_vm4, %v3967_v12, %v9210_v24  ;;  %vm3796_vm13 = vcmp.lt.s32.totalorder %v3795_v53, 2  ;;  %vm3797_vm6 = vcmp.eq.s32.totalorder %v3795_v53, 0  ;;  %v3198_v22 = vshll.u32 %v10213_v25, %v10471_v39 }
 0x3e9   : > { %v3969_v4 = vadd.s32 %v3968_v27, %v3964_v29  ;;  %vm3800_vm12 = vcmp.eq.s32.totalorder %v3795_v53, 2  ;;  %v3878_v59 = vshll.u32 %v9177_v58, %v3876_v23  ;;  %v3879_v1 = vshrl.u32 %v3861_v46, %v3877_v14 }
 0x3ea   : > { %v3882_v11 = vadd.s32 127, %v3881_v6  ;;  %v4820_v34 = vpop.eup %4819  ;;  %v9260_v50 = vadd.s32 3, %v3894_v32  ;;  %v3188_v61 = vand.u32 8388607, %v3181_v54  ;;  %v9264_v26 = vor.u32 %v3199_v56, %v3198_v22 }
 0x3eb   : > { %v3970_v62 = vadd.s32 536870912, %v3969_v4  ;;  %v4822_v55 = vpop.eup %4821  ;;  %v3801_v28 = vxor.u32 2147483648, %v4820_v34  ;;  %v3880_v45 = vor.u32 %v3879_v1, %v3878_v59  ;;  %v3201_v30 = vshll.u32 %v10215_v18, %v10471_v39 }
 0x3ec   : > { %v3883_v24 = vshll.u32 %v3882_v11, 23  ;;  %v3798_v41 = vxor.u32 2147483648, %v4822_v55  ;;  %v3202_v42 = vshrl.u32 %v10216_v10, %v9115_v36  ;;  %v3208_v37 = vshrl.u32 %v10458_v19, %v9115_v36 }
 0x3ed   : > { %v3971_v58 = vshrl.u32 %v3970_v62, 30  ;;  %v3802_v44 = vsel %vm3800_vm12, %v3801_v28, %v4822_v55  ;;  %v3205_v0 = vshrl.u32 %v10080_v17, %v9115_v36  ;;  %v3211_v33 = vshrl.u32 %v10459_v63, %v9115_v36 }
 0x3ee   : > { %v3884_v9 = vor.u32 4788187, %v3883_v24  ;;  %v3799_v48 = vsel %vm3797_vm6, %v4820_v34, %v3798_v41  ;;  %vm3911_vm15 = vcmp.lt.s32.totalorder %v10475_v49, 0  ;;  %v3204_v12 = vshll.u32 %v10216_v10, %v10471_v39 }
 0x3ef   : > { %v3972_v52 = vshll.u32 %v3971_v58, 30  ;;  %v3207_v46 = vshll.u32 %v10080_v17, %v10471_v39  ;;  %v3803_v29 = vsel %vm3796_vm13, %v3799_v48, %v3802_v44  ;;  %v3887_v23 = vcvt.s32.f32 %v3880_v45 }
 0x3f0   : > { %v3885_v2 = vand.u32 2147483647, %v3884_v9  ;;  %v3210_v56 = vshll.u32 %v10458_v19, %v10471_v39  ;;  %v3804_v14 = vsel %vm3793_vm11, nan, %v3803_v29  ;;  %v3203_v32 = vor.u32 %v3202_v42, %v3201_v30 }
 0x3f1   : > { %v9288_v6 = vsub.s32 %v3969_v4, %v3972_v52  ;;  %v3209_v27 = vor.u32 %v3208_v37, %v3207_v46  ;;  %v4138_v59 = vmul.f32 %v9222_v38, %v3804_v14  ;;  %v3206_v1 = vor.u32 %v3205_v0, %v3204_v12  ;;  %v10483_v4 = vld [vmem:[#allocation106_spill] sm:$0xff] }
 0x3f2   : > { %v3888_v22 = vmul.f32 %v3887_v23, %v3885_v2  ;;  %v3212_v11 = vor.u32 %v3211_v33, %v3210_v56  ;;  %v3995_v34 = vsub.s32 4, %v3971_v58  ;;  %v3189_v62 = vor.u32 8388608, %v3188_v61 }
 0x3f3   : > { %v3975_v53 = vsub.s32 0, %v9288_v6  ;;  %v3197_v39 = vshrl.u32 %v10213_v25, %v9115_v36  ;;  %v4170_v40 = vadd.f32 %v4138_v59, %v9220_v15  ;;  %vm3213_vm1 = vcmp.lt.s32.totalorder %v10483_v4, 1 }
 0x3f4   : > { %v3889_v55 = vxor.u32 2147483648, %v3888_v22  ;;  %vm3216_vm0 = vcmp.lt.s32.totalorder %v10483_v4, 4  ;;  %vm3215_vm2 = vcmp.lt.s32.totalorder %v10483_v4, 3  ;;  %v3221_v45 = vsel %vm3213_vm1, %v9264_v26, %v3203_v32 }
 0x3f5   : > { %v4502_v28 = vmin.u32 %v3975_v53, %v9288_v6  ;;  %v3222_v24 = vsel %vm3216_vm0, %v3209_v27, 920167782  ;;  %4202 = vst [vmem:[%s6723_s15 + $0xe8] sm:$0xff] %v4170_v40  ;;  %v3225_v15 = vsel %vm3213_vm1, %v3203_v32, %v3206_v1  ;;  %v3226_v30 = vsel %vm3216_vm0, %v3212_v11, 1326507024 }
 0x3f6   : > { %v3890_v61 = vsel %vm3807_vm10, %v3889_v55, %v3888_v22  ;;  %v3223_v36 = vsel %vm3215_vm2, %v3206_v1, %v3222_v24  ;;  %vm3214_vm14 = vcmp.lt.s32.totalorder %v10483_v4, 2  ;;  %v3218_v37 = vsel %vm3216_vm0, %v3206_v1, 2102212464  ;;  %v10486_v22 = vld [vmem:[#allocation46_spill] sm:$0xff] }
 0x3f7   : > { %v3893_v41 = vsel %vm9238_vm9, %v10466_v60, %v3890_v61  ;;  %v3977_v42 = vclz %v4502_v28  ;;  %v3996_v44 = vsel %vm3911_vm15, %v3995_v34, %v3971_v58  ;;  %v3224_v9 = vsel %vm3214_vm14, %v3221_v45, %v3223_v36 }
 0x3f8   : > { %4823 = vcosq.f32 %v3893_v41  ;;  %v3227_v0 = vsel %vm3215_vm2, %v3209_v27, %v3226_v30  ;;  %v3229_v48 = vshll.u32 %v3189_v62, 8  ;;  %v3899_v52 = vand.u32 3, %v9260_v50 }
 0x3f9   : > { %4825 = vsinq.f32 %v3893_v41  ;;  %v4503_v33 = vadd.s32 4294967294, %v3977_v42  ;;  %v3228_v35 = vsel %vm3214_vm14, %v3225_v15, %v3227_v0  ;;  %vm9324_vm7 = vcmp.le.f32.partialorder %v3909_v3, 0.7853982 }
 0x3fa   : > { %v3217_v58 = vsel %vm3213_vm1, %v3197_v39, %v9264_v26  ;;  %v3219_v46 = vsel %vm3215_vm2, %v3203_v32, %v3218_v37  ;;  %v3998_v29 = vsel %vm9324_vm7, 0, %v3996_v44  ;;  %v3965_v3 = vadd.s32 %v9209_v7, %v9227_v5 }
 0x3fb   : > { %vm4504_vm5 = vcmp.lt.s32.totalorder %v4503_v33, 0  ;;  %v9335_v2 = vmul.u32.u64.low %v3229_v48, %v3228_v35  ;;  %v9336_v23 = vmul.u32.u64.high %v3229_v48, %v3228_v35, %v9335_v2  ;;  %v3220_v32 = vsel %vm3214_vm14, %v3217_v58, %v3219_v46 }
 0x3fc   : > { %v3980_v50 = vsel %vm4504_vm5, 0, %v4503_v33  ;;  %v9340_v56 = vmul.u32.u64.low %v3229_v48, %v3224_v9  ;;  %v9341_v14 = vmul.u32.u64.high %v3229_v48, %v3224_v9, %v9340_v56  ;;  %v3285_v59 = vand.u32 2147483647, %v10486_v22 }
 0x3fd   : > { %v3981_v27 = vsub.s32 32, %v3980_v50  ;;  %v3985_v26 = vsub.s32 4294967266, %v3980_v50  ;;  %vm3900_vm3 = vcmp.lt.s32.totalorder %v3899_v52, 2  ;;  %vm3901_vm10 = vcmp.eq.s32.totalorder %v3899_v52, 0 }
 0x3fe   : > { %vm3904_vm9 = vcmp.eq.s32.totalorder %v3899_v52, 2  ;;  %v9347_v1 = vadd.s32 3, %v3998_v29  ;;  %v3303_v7 = vshrl.u32 %v10215_v18, %v9121_v8  ;;  %vm3897_vm8 = vweird.f32 %v10466_v60 }
 0x3ff   : > { %v3982_v5 = vshll.u32 %v9288_v6, %v3980_v50  ;;  %v3983_v11 = vshrl.u32 %v3965_v3, %v3981_v27  ;;  %v3986_v53 = vadd.s32 127, %v3985_v26  ;;  %vm3238_vm4 = vc.u32 %v9336_v23, %v9340_v56 }
 0x400   : > { %v3236_v34 = vmul.u32 %v3229_v48, %v3220_v32  ;;  %v3239_v62 = vadd.s32 1, %v9341_v14  ;;  %v3301_v39 = vshrl.u32 %v10213_v25, %v9121_v8  ;;  %v3302_v55 = vshll.u32 %v10213_v25, %v10473_v21 }
 0x401   : > { %v3984_v40 = vor.u32 %v3983_v11, %v3982_v5  ;;  %v3987_v4 = vshll.u32 %v3986_v53, 23  ;;  %v3292_v28 = vand.u32 8388607, %v3285_v59  ;;  %v3305_v6 = vshll.u32 %v10215_v18, %v10473_v21 }
 0x402   : > { %v4824_v45 = vpop.eup %4823  ;;  %v3240_v24 = vsel %vm3238_vm4, %v3239_v62, %v9341_v14  ;;  %v3304_v61 = vor.u32 %v3303_v7, %v3302_v55  ;;  %v3306_v36 = vshrl.u32 %v10216_v10, %v9121_v8  ;;  %v3312_v15 = vshrl.u32 %v10458_v19, %v9121_v8 }
 0x403   : > { %v4826_v30 = vpop.eup %4825  ;;  %v3905_v41 = vxor.u32 2147483648, %v4824_v45  ;;  %v3988_v42 = vor.u32 4788187, %v3987_v4  ;;  %v3241_v37 = vadd.s32 %v3240_v24, %v3236_v34  ;;  %v3309_v44 = vshrl.u32 %v10080_v17, %v9121_v8 }
 0x404   : > { %v3902_v9 = vxor.u32 2147483648, %v4826_v30  ;;  %v3311_v0 = vshll.u32 %v10080_v17, %v10473_v21  ;;  %v3314_v33 = vshll.u32 %v10458_v19, %v10473_v21  ;;  %v3315_v35 = vshrl.u32 %v10459_v63, %v9121_v8 }
 0x405   : > { %v3906_v48 = vsel %vm3904_vm9, %v3905_v41, %v4826_v30  ;;  %v3989_v58 = vand.u32 2147483647, %v3988_v42  ;;  %v3991_v46 = vcvt.s32.f32 %v3984_v40  ;;  %v3242_v29 = vadd.s32 536870912, %v3241_v37 }
 0x406   : > { %v3903_v2 = vsel %vm3901_vm10, %v4824_v45, %v3902_v9  ;;  %v3307_v3 = vor.u32 %v3306_v36, %v3305_v6  ;;  %v3308_v50 = vshll.u32 %v10216_v10, %v10473_v21  ;;  %v3313_v14 = vor.u32 %v3312_v15, %v3311_v0 }
 0x407   : > { %v3907_v27 = vsel %vm3900_vm3, %v3903_v2, %v3906_v48  ;;  %v3992_v26 = vmul.f32 %v3991_v46, %v3989_v58  ;;  %v3243_v32 = vshrl.u32 %v3242_v29, 30  ;;  %v3316_v7 = vor.u32 %v3315_v35, %v3314_v33  ;;  %v10487_v48 = vld [vmem:[#allocation31_spill] sm:$0xff]  ;;  %v10490_v2 = vld [vmem:[#allocation48_spill] sm:$0xff] }
 0x408   : > { %v3908_v8 = vsel %vm3897_vm8, nan, %v3907_v27  ;;  %v3293_v5 = vor.u32 8388608, %v3292_v28  ;;  %v3310_v11 = vor.u32 %v3309_v44, %v3308_v50  ;;  %vm3317_vm11 = vcmp.lt.s32.totalorder %v9118_v43, 1 }
 0x409   : > { %v3993_v53 = vxor.u32 2147483648, %v3992_v26  ;;  %v4139_v34 = vmul.f32 %v9222_v38, %v3908_v8  ;;  %v3244_v62 = vshll.u32 %v3243_v32, 30  ;;  %vm3320_vm13 = vcmp.lt.s32.totalorder %v9118_v43, 4 }
 0x40a   : > { %vm3318_vm6 = vcmp.lt.s32.totalorder %v9118_v43, 2  ;;  %vm3319_vm12 = vcmp.lt.s32.totalorder %v9118_v43, 3  ;;  %v3325_v21 = vsel %vm3317_vm11, %v3304_v61, %v3307_v3  ;;  %v3326_v60 = vsel %vm3320_vm13, %v3313_v14, 920167782 }
 0x40b   : > { %v3994_v52 = vsel %vm3911_vm15, %v3993_v53, %v3992_v26  ;;  %v4171_v55 = vadd.f32 %v4139_v34, %v9231_v51  ;;  %v9394_v40 = vsub.s32 %v3241_v37, %v3244_v62  ;;  %v3330_v4 = vsel %vm3320_vm13, %v3316_v7, 1326507024 }
 0x40c   : > { %v3997_v28 = vsel %vm9324_vm7, %v10475_v49, %v3994_v52  ;;  %v3322_v6 = vsel %vm3320_vm13, %v3310_v11, 2102212464  ;;  %v3327_v45 = vsel %vm3319_vm12, %v3310_v11, %v3326_v60  ;;  %v3329_v24 = vsel %vm3317_vm11, %v3307_v3, %v3310_v11 }
 0x40d   : > { %4827 = vcosq.f32 %v3997_v28  ;;  %v9404_v36 = vand.u32 3, %v9347_v1  ;;  %4203 = vst [vmem:[%s6723_s15 + $0xf0] sm:$0xff] %v4171_v55  ;;  %v3247_v51 = vsub.s32 0, %v9394_v40  ;;  %v3328_v15 = vsel %vm3318_vm6, %v3325_v21, %v3327_v45 }
 0x40e   : > { %4829 = vsinq.f32 %v3997_v28  ;;  %v3321_v12 = vsel %vm3317_vm11, %v3301_v39, %v3304_v61  ;;  %v3331_v30 = vsel %vm3319_vm12, %v3313_v14, %v3330_v4  ;;  %v3333_v41 = vshll.u32 %v3293_v5, 8 }
 0x40f   : > { %v4474_v42 = vmin.u32 %v3247_v51, %v9394_v40  ;;  %v3267_v37 = vsub.s32 4, %v3243_v32  ;;  %v3323_v1 = vsel %vm3319_vm12, %v3307_v3, %v3322_v6  ;;  %v3332_v44 = vsel %vm3318_vm6, %v3329_v24, %v3331_v30 }
 0x410   : > { %v9419_v9 = vmul.u32.u64.low %v3333_v41, %v3332_v44  ;;  %v9420_v0 = vmul.u32.u64.high %v3333_v41, %v3332_v44, %v9419_v9  ;;  %v9422_v33 = vmul.u32.u64.low %v3333_v41, %v3328_v15  ;;  %v9423_v35 = vmul.u32.u64.high %v3333_v41, %v3328_v15, %v9422_v33 }
 0x411   : > { %v9427_v39 = vshrl.u32 %v10474_v47, 5  ;;  %v9430_v61 = vand.u32 31, %v9129_v16  ;;  %v9434_v58 = vmul.f32 %v10477_v13, %v10487_v48  ;;  %v3249_v46 = vclz %v4474_v42 }
 0x412   : > { %vm9438_vm15 = vcmp.le.f32.partialorder %v3181_v54, 0.7853982  ;;  %vm3183_vm1 = vcmp.lt.s32.totalorder %v10482_v57, 0  ;;  %v3324_v47 = vsel %vm3318_vm6, %v3321_v12, %v3323_v1  ;;  %v3389_v3 = vand.u32 2147483647, %v10490_v2 }
 0x413   : > { %vm4004_vm0 = vcmp.lt.s32.totalorder %v9404_v36, 2  ;;  %v4475_v50 = vadd.s32 4294967294, %v3249_v46  ;;  %v3268_v13 = vsel %vm3183_vm1, %v3267_v37, %v3243_v32  ;;  %v3407_v14 = vshrl.u32 %v10215_v18, %v9214_v20 }
 0x414   : > { %vm4001_vm2 = vweird.f32 %v10475_v49  ;;  %vm4005_vm14 = vcmp.eq.s32.totalorder %v9404_v36, 0  ;;  %vm4008_vm7 = vcmp.eq.s32.totalorder %v9404_v36, 2  ;;  %vm3342_vm5 = vc.u32 %v9420_v0, %v9422_v33 }
 0x415   : > { %v3343_v43 = vadd.s32 1, %v9423_v35  ;;  %v3237_v54 = vadd.s32 %v9340_v56, %v9336_v23  ;;  %vm4476_vm3 = vcmp.lt.s32.totalorder %v4475_v50, 0  ;;  %v3340_v27 = vmul.u32 %v3333_v41, %v3324_v47 }
 0x416   : > { %v3406_v26 = vshll.u32 %v10213_v25, %v9124_v31  ;;  %v3252_v32 = vsel %vm4476_vm3, 0, %v4475_v50  ;;  %v3270_v7 = vsel %vm9438_vm15, 0, %v3268_v13  ;;  %v9466_v5 = vand.u32 8388607, %v3389_v3 }
 0x417   : > { %v3344_v8 = vsel %vm3342_vm5, %v3343_v43, %v9423_v35  ;;  %v4828_v11 = vpop.eup %4827  ;;  %v3253_v53 = vsub.s32 32, %v3252_v32  ;;  %v3257_v34 = vsub.s32 4294967266, %v3252_v32  ;;  %v3254_v60 = vshll.u32 %v9394_v40, %v3252_v32 }
 0x418   : > { %v3345_v62 = vadd.s32 %v3344_v8, %v3340_v27  ;;  %v9468_v23 = vor.u32 %v3407_v14, %v3406_v26  ;;  %v4830_v56 = vpop.eup %4829  ;;  %v4009_v21 = vxor.u32 2147483648, %v4828_v11  ;;  %v3409_v52 = vshll.u32 %v10215_v18, %v9124_v31 }
 0x419   : > { %v3410_v55 = vshrl.u32 %v10216_v10, %v9214_v20  ;;  %v4006_v4 = vxor.u32 2147483648, %v4830_v56  ;;  %v3255_v28 = vshrl.u32 %v3237_v54, %v3253_v53  ;;  %v3258_v6 = vadd.s32 127, %v3257_v34 }
 0x41a   : > { %v3346_v45 = vadd.s32 536870912, %v3345_v62  ;;  %v4010_v24 = vsel %vm4008_vm7, %v4009_v21, %v4830_v56  ;;  %v3413_v51 = vshrl.u32 %v10080_v17, %v9214_v20  ;;  %v3416_v15 = vshrl.u32 %v10458_v19, %v9214_v20 }
 0x41b   : > { %v3419_v40 = vshrl.u32 %v10459_v63, %v9214_v20  ;;  %v4007_v12 = vsel %vm4005_vm14, %v4828_v11, %v4006_v4  ;;  %v3256_v30 = vor.u32 %v3255_v28, %v3254_v60  ;;  %v3259_v41 = vshll.u32 %v3258_v6, 23 }
 0x41c   : > { %v3347_v42 = vshrl.u32 %v3346_v45, 30  ;;  %v4011_v37 = vsel %vm4004_vm0, %v4007_v12, %v4010_v24  ;;  %v3411_v1 = vor.u32 %v3410_v55, %v3409_v52  ;;  %v3412_v44 = vshll.u32 %v10216_v10, %v9124_v31 }
 0x41d   : > { %v3415_v9 = vshll.u32 %v10080_v17, %v9124_v31  ;;  %v4012_v35 = vsel %vm4001_vm2, nan, %v4011_v37  ;;  %v3260_v48 = vor.u32 4788187, %v3259_v41  ;;  %v3418_v47 = vshll.u32 %v10458_v19, %v9124_v31 }
 0x41e   : > { %v3348_v46 = vshll.u32 %v3347_v42, 30  ;;  %v4140_v50 = vmul.f32 %v9222_v38, %v4012_v35  ;;  %v3274_v13 = vadd.s32 3, %v3270_v7  ;;  %v3414_v36 = vor.u32 %v3413_v51, %v3412_v44 }
 0x41f   : > { %v3417_v14 = vor.u32 %v3416_v15, %v3415_v9  ;;  %v3261_v43 = vand.u32 2147483647, %v3260_v48  ;;  %v3263_v54 = vcvt.s32.f32 %v3256_v30  ;;  %vm3287_vm10 = vcmp.lt.s32.totalorder %v10486_v22, 0 }
 0x420   : > { %v9497_v27 = vsub.s32 %v3345_v62, %v3348_v46  ;;  %v3420_v26 = vor.u32 %v3419_v40, %v3418_v47  ;;  %v4172_v49 = vadd.f32 %v4140_v50, %v9434_v58  ;;  %v3397_v32 = vor.u32 8388608, %v9466_v5  ;;  %v10493_v46 = vld [vmem:[#allocation49_spill] sm:$0xff] }
 0x421   : > { %vm3421_vm9 = vcmp.lt.s32.totalorder %v9427_v39, 1  ;;  %vm3422_vm8 = vcmp.lt.s32.totalorder %v9427_v39, 2  ;;  %v3264_v31 = vmul.f32 %v3263_v54, %v3261_v43  ;;  %vm3424_vm4 = vcmp.lt.s32.totalorder %v9427_v39, 4 }
 0x422   : > { %v3351_v38 = vsub.s32 0, %v9497_v27  ;;  %v3429_v7 = vsel %vm3421_vm9, %v9468_v23, %v3411_v1  ;;  %4204 = vst [vmem:[%s6723_s15 + $0xf8] sm:$0xff] %v4172_v49  ;;  %vm3423_vm11 = vcmp.lt.s32.totalorder %v9427_v39, 3  ;;  %v3426_v8 = vsel %vm3424_vm4, %v3414_v36, 2102212464 }
 0x423   : > { %v3430_v58 = vsel %vm3424_vm4, %v3417_v14, 920167782  ;;  %v3433_v5 = vsel %vm3421_vm9, %v3411_v1, %v3414_v36  ;;  %v3265_v11 = vxor.u32 2147483648, %v3264_v31  ;;  %v3434_v62 = vsel %vm3424_vm4, %v3420_v26, 1326507024 }
 0x424   : > { %v4478_v53 = vmin.u32 %v3351_v38, %v9497_v27  ;;  %v3431_v34 = vsel %vm3423_vm11, %v3414_v36, %v3430_v58  ;;  %v3371_v56 = vsub.s32 4, %v3347_v42  ;;  %v3405_v21 = vshrl.u32 %v10213_v25, %v9214_v20 }
 0x425   : > { %v3432_v60 = vsel %vm3422_vm8, %v3429_v7, %v3431_v34  ;;  %v3435_v52 = vsel %vm3423_vm11, %v3417_v14, %v3434_v62  ;;  %v3266_v55 = vsel %vm3183_vm1, %v3265_v11, %v3264_v31  ;;  %v3437_v6 = vshll.u32 %v3397_v32, 8 }
 0x426   : > { %v3353_v4 = vclz %v4478_v53  ;;  %v3436_v28 = vsel %vm3422_vm8, %v3433_v5, %v3435_v52  ;;  %v3269_v45 = vsel %vm9438_vm15, %v10482_v57, %v3266_v55  ;;  %v9528_v24 = vand.u32 3, %v3274_v13 }
 0x427   : > { %v3425_v20 = vsel %vm3421_vm9, %v3405_v21, %v9468_v23  ;;  %v3427_v51 = vsel %vm3423_vm11, %v3411_v1, %v3426_v8  ;;  %4831 = vcosq.f32 %v3269_v45  ;;  %v9540_v30 = vsel %vm3287_vm10, %v3371_v56, %v3347_v42 }
 0x428   : > { %v4479_v15 = vadd.s32 4294967294, %v3353_v4  ;;  %v9535_v40 = vmul.u32.u64.low %v3437_v6, %v3436_v28  ;;  %v9536_v12 = vmul.u32.u64.high %v3437_v6, %v3436_v28, %v9535_v40  ;;  %4833 = vsinq.f32 %v3269_v45 }
 0x429   : > { %v9542_v29 = vmul.u32.u64.low %v3437_v6, %v3432_v60  ;;  %v9543_v41 = vmul.u32.u64.high %v3437_v6, %v3432_v60, %v9542_v29  ;;  %v3508_v37 = vsub.s32 32, %v9430_v61  ;;  %v3428_v23 = vsel %vm3422_vm8, %v3425_v20, %v3427_v51 }
 0x42a   : > { %vm4480_vm13 = vcmp.lt.s32.totalorder %v4479_v15, 0  ;;  %v9550_v1 = vshrl.u32 %v9129_v16, 5  ;;  %vm9554_vm6 = vcmp.le.f32.partialorder %v3285_v59, 0.7853982  ;;  %vm3280_vm12 = vcmp.eq.s32.totalorder %v9528_v24, 2 }
 0x42b   : > { %v3356_v42 = vsel %vm4480_vm13, 0, %v4479_v15  ;;  %v3341_v9 = vadd.s32 %v9422_v33, %v9420_v0  ;;  %v3374_v39 = vsel %vm9554_vm6, 0, %v9540_v30  ;;  %vm3277_vm15 = vcmp.eq.s32.totalorder %v9528_v24, 0 }
 0x42c   : > { %v3357_v35 = vsub.s32 32, %v3356_v42  ;;  %v3361_v48 = vsub.s32 4294967266, %v3356_v42  ;;  %v3444_v16 = vmul.u32 %v3437_v6, %v3428_v23  ;;  %vm3446_vm1 = vc.u32 %v9536_v12, %v9542_v29 }
 0x42d   : > { %v3447_v59 = vadd.s32 1, %v9543_v41  ;;  %v3493_v47 = vand.u32 2147483647, %v10493_v46  ;;  %vm3276_vm0 = vcmp.lt.s32.totalorder %v9528_v24, 2  ;;  %v3358_v0 = vshll.u32 %v9497_v27, %v3356_v42 }
 0x42e   : > { %v3359_v33 = vshrl.u32 %v3341_v9, %v3357_v35  ;;  %v3362_v50 = vadd.s32 127, %v3361_v48  ;;  %v3511_v13 = vshrl.u32 %v10215_v18, %v3508_v37  ;;  %v3509_v14 = vshrl.u32 %v10213_v25, %v3508_v37 }
 0x42f   : > { %v3448_v36 = vsel %vm3446_vm1, %v3447_v59, %v9543_v41  ;;  %v3510_v43 = vshll.u32 %v10213_v25, %v9430_v61  ;;  %v3514_v54 = vshrl.u32 %v10216_v10, %v3508_v37  ;;  %v3513_v31 = vshll.u32 %v10215_v18, %v9430_v61 }
 0x430   : > { %v3360_v26 = vor.u32 %v3359_v33, %v3358_v0  ;;  %v3363_v49 = vshll.u32 %v3362_v50, 23  ;;  %v3449_v32 = vadd.s32 %v3448_v36, %v3444_v16  ;;  %vm3273_vm2 = vweird.f32 %v10482_v57  ;;  %v9625_v36 = vpop.permute.xlu0 %4102 }
 0x431   : > { %v3500_v27 = vand.u32 8388607, %v3493_v47  ;;  %v3517_v38 = vshrl.u32 %v10080_v17, %v3508_v37  ;;  %v3519_v7 = vshll.u32 %v10080_v17, %v9430_v61  ;;  %v3520_v25 = vshrl.u32 %v10458_v19, %v3508_v37  ;;  %v4832_v8 = vpop.eup %4831 }
 0x432   : > { %v3364_v58 = vor.u32 4788187, %v3363_v49  ;;  %v3450_v5 = vadd.s32 536870912, %v3449_v32  ;;  %v3512_v11 = vor.u32 %v3511_v13, %v3510_v43  ;;  %v3516_v53 = vshll.u32 %v10216_v10, %v9430_v61  ;;  %v4834_v18 = vpop.eup %4833 }
 0x433   : > { %v3281_v34 = vxor.u32 2147483648, %v4832_v8  ;;  %v3515_v62 = vor.u32 %v3514_v54, %v3513_v31  ;;  %v3521_v56 = vor.u32 %v3520_v25, %v3519_v7  ;;  %v3523_v21 = vshrl.u32 %v10459_v63, %v3508_v37 }
 0x434   : > { %v3278_v60 = vxor.u32 2147483648, %v4834_v18  ;;  %v3365_v52 = vand.u32 2147483647, %v3364_v58  ;;  %v3367_v55 = vcvt.s32.f32 %v3360_v26  ;;  %v9589_v4 = vshrl.u32 %v3450_v5, 30 }
 0x435   : > { %v3282_v17 = vsel %vm3280_vm12, %v3281_v34, %v4834_v18  ;;  %v3501_v28 = vor.u32 8388608, %v3500_v27  ;;  %v3518_v6 = vor.u32 %v3517_v38, %v3516_v53  ;;  %v3522_v45 = vshll.u32 %v10458_v19, %v9430_v61  ;;  %v10494_v27 = vld [vmem:[#allocation21_spill] sm:$0xff]  ;;  %v10495_v38 = vld [vmem:[#allocation103_spill] sm:$0xff] }
 0x436   : > { %v3279_v10 = vsel %vm3277_vm15, %v4832_v8, %v3278_v60  ;;  %v3368_v20 = vmul.f32 %v3367_v55, %v3365_v52  ;;  %v3452_v51 = vshll.u32 %v9589_v4, 30  ;;  %vm3528_vm14 = vcmp.lt.s32.totalorder %v9550_v1, 4 }
 0x437   : > { %v3283_v63 = vsel %vm3276_vm0, %v3279_v10, %v3282_v17  ;;  %v3524_v15 = vor.u32 %v3523_v21, %v3522_v45  ;;  %vm3525_vm7 = vcmp.lt.s32.totalorder %v9550_v1, 1  ;;  %v3534_v40 = vsel %vm3528_vm14, %v3521_v56, 920167782 }
 0x438   : > { %v3369_v41 = vxor.u32 2147483648, %v3368_v20  ;;  %v3453_v37 = vsub.s32 %v3449_v32, %v3452_v51  ;;  %vm3527_vm5 = vcmp.lt.s32.totalorder %v9550_v1, 3  ;;  %v3533_v19 = vsel %vm3525_vm7, %v3512_v11, %v3515_v62 }
 0x439   : > { %vm3526_vm3 = vcmp.lt.s32.totalorder %v9550_v1, 2  ;;  %v3529_v61 = vsel %vm3525_vm7, %v3509_v14, %v3512_v11  ;;  %v3530_v23 = vsel %vm3528_vm14, %v3518_v6, 2102212464  ;;  %v3535_v24 = vsel %vm3527_vm5, %v3518_v6, %v3534_v40 }
 0x43a   : > { %v3284_v42 = vsel %vm3273_vm2, nan, %v3283_v63  ;;  %v3370_v9 = vsel %vm3287_vm10, %v3369_v41, %v3368_v20  ;;  %v3455_v35 = vsub.s32 0, %v3453_v37  ;;  %v3537_v48 = vsel %vm3525_vm7, %v3515_v62, %v3518_v6 }
 0x43b   : > { %v3373_v16 = vsel %vm9554_vm6, %v10486_v22, %v3370_v9  ;;  %v3536_v59 = vsel %vm3526_vm3, %v3533_v19, %v3535_v24  ;;  %v3538_v0 = vsel %vm3528_vm14, %v3524_v15, 1326507024  ;;  %v3541_v33 = vshll.u32 %v3501_v28, 8  ;;  %v10496_v19 = vld [vmem:[#allocation22_spill] sm:$0xff] }
 0x43c   : > { %4835 = vcosq.f32 %v3373_v16  ;;  %v4482_v50 = vmin.u32 %v3455_v35, %v3453_v37  ;;  %v3531_v57 = vsel %vm3527_vm5, %v3515_v62, %v3530_v23  ;;  %v3539_v13 = vsel %vm3527_vm5, %v3521_v56, %v3538_v0 }
 0x43d   : > { %4837 = vsinq.f32 %v3373_v16  ;;  %v3540_v14 = vsel %vm3526_vm3, %v3537_v48, %v3539_v13  ;;  %v9629_v43 = vmul.u32.u64.low %v3541_v33, %v3536_v59  ;;  %v9630_v54 = vmul.u32.u64.high %v3541_v33, %v3536_v59, %v9629_v43 }
 0x43e   : > { %v3457_v26 = vclz %v4482_v50  ;;  %v3378_v49 = vadd.s32 3, %v3374_v39  ;;  %v9637_v32 = vmul.u32.u64.low %v3541_v33, %v3540_v14  ;;  %v9638_v31 = vmul.u32.u64.high %v3541_v33, %v3540_v14, %v9637_v32 }
 0x43f   : > { %v4069_v7 = vmul.f32 %v10495_v38, %v10494_v27  ;;  %v3532_v8 = vsel %vm3526_vm3, %v3529_v61, %v3531_v57  ;;  %v4133_v58 = vmul.f32 %v9625_v36, %v3284_v42  ;;  %v3551_v5 = vadd.s32 1, %v9630_v54 }
 0x440   : > { %v4483_v25 = vadd.s32 4294967294, %v3457_v26  ;;  %v3379_v11 = vand.u32 3, %v3378_v49  ;;  %v3548_v39 = vmul.u32 %v3541_v33, %v3532_v8  ;;  %vm3550_vm9 = vc.u32 %v9638_v31, %v9629_v43 }
 0x441   : > { %v4165_v44 = vadd.f32 %v4133_v58, %v4069_v7  ;;  %v3445_v53 = vadd.s32 %v9542_v29, %v9536_v12  ;;  %v3552_v1 = vsel %vm3550_vm9, %v3551_v5, %v9630_v54  ;;  %vm3377_vm13 = vweird.f32 %v10486_v22 }
 0x442   : > { %vm4484_vm10 = vcmp.lt.s32.totalorder %v4483_v25, 0  ;;  %v3553_v62 = vadd.s32 %v3552_v1, %v3548_v39  ;;  %vm3384_vm8 = vcmp.eq.s32.totalorder %v3379_v11, 2  ;;  %vm3381_vm4 = vcmp.eq.s32.totalorder %v3379_v11, 0 }
 0x443   : > { %v3460_v30 = vsel %vm4484_vm10, 0, %v4483_v25  ;;  %4197 = vst [vmem:[%s6723_s15 + $0xc0] sm:$0xff] %v4165_v44  ;;  %vm3380_vm11 = vcmp.lt.s32.totalorder %v3379_v11, 2  ;;  %v4070_v61 = vmul.f32 %v10495_v38, %v10496_v19  ;;  %v3475_v9 = vsub.s32 4, %v9589_v4 }
 0x444   : > { %v3461_v18 = vsub.s32 32, %v3460_v30  ;;  %v3465_v34 = vsub.s32 4294967266, %v3460_v30  ;;  %v3462_v21 = vshll.u32 %v3453_v37, %v3460_v30  ;;  %v3554_v28 = vadd.s32 536870912, %v3553_v62 }
 0x445   : > { %vm3391_vm6 = vcmp.lt.s32.totalorder %v10490_v2, 0  ;;  %vm3390_vm12 = vcmp.le.f32.partialorder %v3389_v3, 0.7853982  ;;  %v3549_v26 = vadd.s32 %v9629_v43, %v9638_v31  ;;  %vm3481_vm14 = vweird.f32 %v10490_v2 }
 0x446   : > { %v4836_v56 = vpop.eup %4835  ;;  %v3463_v60 = vshrl.u32 %v3445_v53, %v3461_v18  ;;  %v3466_v52 = vadd.s32 127, %v3465_v34  ;;  %v9652_v12 = vshrl.u32 %v3554_v28, 30  ;;  %v3476_v0 = vsel %vm3391_vm6, %v3475_v9, %v9589_v4  ;;  %v4239_v9 = vld [vmem:[%s6723_s15 + $0x30] sm:$0xff] (%p5051_p10) }
 0x447   : > { %v4838_v55 = vpop.eup %4837  ;;  %v3385_v17 = vxor.u32 2147483648, %v4836_v56  ;;  %v3478_v57 = vsel %vm3390_vm12, 0, %v3476_v0  ;;  %vm3495_vm7 = vcmp.lt.s32.totalorder %v10493_v46, 0  ;;  %vm3494_vm5 = vcmp.le.f32.partialorder %v3493_v47, 0.7853982  ;;  %4240 = vst [vmem:[%s9693_s22 + $0x50] sm:$0xff] (%p5051_p10), %v4239_v9 }
 0x448   : > { %v3382_v6 = vxor.u32 2147483648, %v4838_v55  ;;  %v3464_v45 = vor.u32 %v3463_v60, %v3462_v21  ;;  %v3467_v10 = vshll.u32 %v3466_v52, 23  ;;  %v3556_v15 = vshll.u32 %v9652_v12, 30  ;;  %v4251_v0 = vld [vmem:[%s6723_s15 + $0x60] sm:$0xff] (%p5051_p10) }
 0x449   : > { %v3386_v20 = vsel %vm3384_vm8, %v3385_v17, %v4838_v55  ;;  %v3482_v14 = vadd.s32 3, %v3478_v57  ;;  %v3579_v1 = vsub.s32 4, %v9652_v12  ;;  %vm3585_vm8 = vweird.f32 %v10493_v46  ;;  %4252 = vst [vmem:[%s9693_s22 + $0xc0] sm:$0xff] (%p5051_p10), %v4251_v0  ;;  %v4257_v57 = vld [vmem:[%s6723_s15 + $0x78] sm:$0xff] (%p5051_p10) }
 0x44a   : > { %v3383_v29 = vsel %vm3381_vm4, %v4836_v56, %v3382_v6  ;;  %v3468_v51 = vor.u32 4788187, %v3467_v10  ;;  %v3471_v37 = vcvt.s32.f32 %v3464_v45  ;;  %v3557_v23 = vsub.s32 %v3553_v62, %v3556_v15  ;;  %v10497_v56 = vld [vmem:[#allocation23_spill] sm:$0xff]  ;;  %4258 = vst [vmem:[%s9693_s22 + $0xd8] sm:$0xff] (%p5051_p10), %v4257_v57 }
 0x44b   : > { %v3387_v63 = vsel %vm3380_vm11, %v3383_v29, %v3386_v20  ;;  %v3483_v25 = vand.u32 3, %v3482_v14  ;;  %v4071_v21 = vmul.f32 %v10495_v38, %v10497_v56  ;;  %v3580_v17 = vsel %vm3495_vm7, %v3579_v1, %v9652_v12  ;;  %v4261_v14 = vld [vmem:[%s6723_s15 + $0x88] sm:$0xff] (%p5051_p10) }
 0x44c   : > { %v3388_v40 = vsel %vm3377_vm13, nan, %v3387_v63  ;;  %v3469_v41 = vand.u32 2147483647, %v3468_v51  ;;  %v3559_v35 = vsub.s32 0, %v3557_v23  ;;  %v3582_v6 = vsel %vm3494_vm5, 0, %v3580_v17  ;;  %4262 = vst [vmem:[%s9693_s22 + $0x108] sm:$0xff] (%p5051_p10), %v4261_v14 }
 0x44d   : > { %v4134_v24 = vmul.f32 %v9625_v36, %v3388_v40  ;;  %vm3488_vm1 = vcmp.eq.s32.totalorder %v3483_v25, 2  ;;  %vm3485_vm0 = vcmp.eq.s32.totalorder %v3483_v25, 0  ;;  %vm3484_vm2 = vcmp.lt.s32.totalorder %v3483_v25, 2 }
 0x44e   : > { %v3472_v42 = vmul.f32 %v3471_v37, %v3469_v41  ;;  %v4486_v22 = vmin.u32 %v3559_v35, %v3557_v23  ;;  %v3586_v45 = vadd.s32 3, %v3582_v6  ;;  %v10498_v41 = vld [vmem:[#allocation24_spill] sm:$0xff] }
 0x44f   : > { %v4166_v48 = vadd.f32 %v4134_v24, %v4070_v61  ;;  %v4072_v37 = vmul.f32 %v10495_v38, %v10498_v41  ;;  %v4229_v38 = vld [vmem:[%s6723_s15 + $0x8] sm:$0xff] (%p5051_p10)  ;;  %v4235_v24 = vld [vmem:[%s6723_s15 + $0x20] sm:$0xff] (%p5051_p10)  ;;  %v4241_v35 = vld [vmem:[%s6723_s15 + $0x38] sm:$0xff] (%p5051_p10) }
 0x450   : > { %v3473_v16 = vxor.u32 2147483648, %v3472_v42  ;;  %v3561_v50 = vclz %v4486_v22  ;;  %v3587_v10 = vand.u32 3, %v3586_v45  ;;  %4230 = vst [vmem:[%s9693_s22 + $0x8] sm:$0xff] (%p5051_p10), %v4229_v38  ;;  %4236 = vst [vmem:[%s9693_s22 + $0x40] sm:$0xff] (%p5051_p10), %v4235_v24  ;;  %v4247_v22 = vld [vmem:[%s6723_s15 + $0x50] sm:$0xff] (%p5051_p10) }
 0x451   : > { %4198 = vst [vmem:[%s6723_s15 + $0xc8] sm:$0xff] %v4166_v48  ;;  %v4243_v48 = vld [vmem:[%s6723_s15 + $0x40] sm:$0xff] (%p5051_p10)  ;;  %4242 = vst [vmem:[%s9693_s22 + $0x58] sm:$0xff] (%p5051_p10), %v4241_v35 }
 0x452   : > { %v3474_v59 = vsel %vm3391_vm6, %v3473_v16, %v3472_v42  ;;  %v4487_v13 = vadd.s32 4294967294, %v3561_v50  ;;  %vm3592_vm3 = vcmp.eq.s32.totalorder %v3587_v10, 2  ;;  %vm3589_vm10 = vcmp.eq.s32.totalorder %v3587_v10, 0  ;;  %v4237_v42 = vld [vmem:[%s6723_s15 + $0x28] sm:$0xff] (%p5051_p10)  ;;  %4244 = vst [vmem:[%s9693_s22 + $0x80] sm:$0xff] (%p5051_p10), %v4243_v48  ;;  %4248 = vst [vmem:[%s9693_s22 + $0x90] sm:$0xff] (%p5051_p10), %v4247_v22 }
 0x453   : > { %v3477_v33 = vsel %vm3390_vm12, %v10490_v2, %v3474_v59  ;;  %vm3588_vm9 = vcmp.lt.s32.totalorder %v3587_v10, 2  ;;  %4238 = vst [vmem:[%s9693_s22 + $0x48] sm:$0xff] (%p5051_p10), %v4237_v42  ;;  %v4245_v16 = vld [vmem:[%s6723_s15 + $0x48] sm:$0xff] (%p5051_p10)  ;;  %v4249_v59 = vld [vmem:[%s6723_s15 + $0x58] sm:$0xff] (%p5051_p10)  ;;  %v4255_v50 = vld [vmem:[%s6723_s15 + $0x70] sm:$0xff] (%p5051_p10) }
 0x454   : > { %4839 = vcosq.f32 %v3477_v33  ;;  %vm4488_vm15 = vcmp.lt.s32.totalorder %v4487_v13, 0  ;;  %4246 = vst [vmem:[%s9693_s22 + $0x88] sm:$0xff] (%p5051_p10), %v4245_v16  ;;  %4250 = vst [vmem:[%s9693_s22 + $0x98] sm:$0xff] (%p5051_p10), %v4249_v59 }
 0x455   : > { %4841 = vsinq.f32 %v3477_v33  ;;  %v3564_v54 = vsel %vm4488_vm15, 0, %v4487_v13  ;;  %v4253_v33 = vld [vmem:[%s6723_s15 + $0x68] sm:$0xff] (%p5051_p10)  ;;  %4256 = vst [vmem:[%s9693_s22 + $0xd0] sm:$0xff] (%p5051_p10), %v4255_v50  ;;  %v4259_v13 = vld [vmem:[%s6723_s15 + $0x80] sm:$0xff] (%p5051_p10) }
 0x456   : > { %v3565_v49 = vsub.s32 32, %v3564_v54  ;;  %v3569_v32 = vsub.s32 4294967266, %v3564_v54  ;;  %v3566_v27 = vshll.u32 %v3557_v23, %v3564_v54  ;;  %v4231_v23 = vld [vmem:[%s6723_s15 + $0x10] sm:$0xff] (%p5051_p10)  ;;  %4254 = vst [vmem:[%s9693_s22 + $0xc8] sm:$0xff] (%p5051_p10), %v4253_v33  ;;  %4260 = vst [vmem:[%s9693_s22 + $0x100] sm:$0xff] (%p5051_p10), %v4259_v13 }
 0x457   : > { %4232 = vst [vmem:[%s9693_s22 + $0x10] sm:$0xff] (%p5051_p10), %v4231_v23  ;;  %v4263_v54 = vld [vmem:[%s6723_s15 + $0x90] sm:$0xff] (%p5051_p10) }
 0x458   : > { %v3567_v3 = vshrl.u32 %v3549_v26, %v3565_v49  ;;  %v3570_v7 = vadd.s32 127, %v3569_v32  ;;  %v4265_v26 = vld [vmem:[%s6723_s15 + $0x98] sm:$0xff] (%p5051_p10)  ;;  %v4267_v49 = vld [vmem:[%s6723_s15 + $0xa0] sm:$0xff] (%p5051_p10)  ;;  %4264 = vst [vmem:[%s9693_s22 + $0x110] sm:$0xff] (%p5051_p10), %v4263_v54  ;;  %v4269_v32 = vld [vmem:[%s6723_s15 + $0xa8] sm:$0xff] (%p5051_p10) }
 0x459   : > { %4266 = vst [vmem:[%s9693_s22 + $0x118] sm:$0xff] (%p5051_p10), %v4265_v26  ;;  %4268 = vst [vmem:[%s9693_s22 + $0x140] sm:$0xff] (%p5051_p10), %v4267_v49  ;;  %v4277_v25 = vld [vmem:[%s6723_s15 + $0xc8] sm:$0xff] (%p5051_p10) }
 0x45a   : > { %v3568_v4 = vor.u32 %v3567_v3, %v3566_v27  ;;  %v3571_v8 = vshll.u32 %v3570_v7, 23  ;;  %v4271_v27 = vld [vmem:[%s6723_s15 + $0xb0] sm:$0xff] (%p5051_p10)  ;;  %v4273_v3 = vld [vmem:[%s6723_s15 + $0xb8] sm:$0xff] (%p5051_p10)  ;;  %4270 = vst [vmem:[%s9693_s22 + $0x148] sm:$0xff] (%p5051_p10), %v4269_v32  ;;  %v4275_v7 = vld [vmem:[%s6723_s15 + $0xc0] sm:$0xff] (%p5051_p10) }
 0x45b   : > { %4272 = vst [vmem:[%s9693_s22 + $0x150] sm:$0xff] (%p5051_p10), %v4271_v27  ;;  %4274 = vst [vmem:[%s9693_s22 + $0x158] sm:$0xff] (%p5051_p10), %v4273_v3 }
 0x45c   : > { %v3572_v11 = vor.u32 4788187, %v3571_v8  ;;  %v3575_v18 = vcvt.s32.f32 %v3568_v4  ;;  %4276 = vst [vmem:[%s9693_s22 + $0x180] sm:$0xff] (%p5051_p10), %v4275_v7  ;;  %4278 = vst [vmem:[%s9693_s22 + $0x188] sm:$0xff] (%p5051_p10), %v4277_v25 }
 0x45e   : > { %v4840_v58 = vpop.eup %4839  ;;  %v3573_v53 = vand.u32 2147483647, %v3572_v11  ;;  %v4289_v11 = vld [vmem:[%s6723_s15 + $0xf8] sm:$0xff] (%p5051_p10) }
 0x45f   : > { %v4842_v5 = vpop.eup %4841  ;;  %v3489_v44 = vxor.u32 2147483648, %v4840_v58  ;;  %4290 = vst [vmem:[%s9693_s22 + $0x1d8] sm:$0xff] (%p5051_p10), %v4289_v11 }
 0x460   : > { %v3486_v30 = vxor.u32 2147483648, %v4842_v5  ;;  %v3576_v34 = vmul.f32 %v3575_v18, %v3573_v53 }
 0x461   : > { %v3490_v39 = vsel %vm3488_vm1, %v3489_v44, %v4842_v5  ;;  %v4285_v5 = vld [vmem:[%s6723_s15 + $0xe8] sm:$0xff] (%p5051_p10)  ;;  %v4287_v44 = vld [vmem:[%s6723_s15 + $0xf0] sm:$0xff] (%p5051_p10) }
 0x462   : > { %v3487_v43 = vsel %vm3485_vm0, %v4840_v58, %v3486_v30  ;;  %v3577_v60 = vxor.u32 2147483648, %v3576_v34  ;;  %v4283_v58 = vld [vmem:[%s6723_s15 + $0xe0] sm:$0xff] (%p5051_p10)  ;;  %4286 = vst [vmem:[%s9693_s22 + $0x1c8] sm:$0xff] (%p5051_p10), %v4285_v5  ;;  %4288 = vst [vmem:[%s9693_s22 + $0x1d0] sm:$0xff] (%p5051_p10), %v4287_v44 }
 0x463   : > { %v3491_v31 = vsel %vm3484_vm2, %v3487_v43, %v3490_v39  ;;  %4284 = vst [vmem:[%s9693_s22 + $0x1c0] sm:$0xff] (%p5051_p10), %v4283_v58 }
 0x464   : > { %v3492_v62 = vsel %vm3481_vm14, nan, %v3491_v31  ;;  %v3578_v55 = vsel %vm3495_vm7, %v3577_v60, %v3576_v34 }
 0x465   : > { %v4135_v52 = vmul.f32 %v9625_v36, %v3492_v62  ;;  %v3581_v28 = vsel %vm3494_vm5, %v10493_v46, %v3578_v55  ;;  %v4227_v46 = vld [vmem:[%s6723_s15] sm:$0xff] (%p5051_p10) }
 0x466   : > { %4843 = vcosq.f32 %v3581_v28  ;;  %4228 = vst [vmem:[%s9693_s22] sm:$0xff] (%p5051_p10), %v4227_v46 }
 0x467   : > { %v4167_v2 = vadd.f32 %v4135_v52, %v4071_v21  ;;  %4845 = vsinq.f32 %v3581_v28 }
 0x469   : > { %4199 = vst [vmem:[%s6723_s15 + $0xd0] sm:$0xff] %v4167_v2 }
 0x470   : > { %v4844_v20 = vpop.eup %4843  ;;  %v4279_v4 = vld [vmem:[%s6723_s15 + $0xd0] sm:$0xff] (%p5051_p10) }
 0x471   : > { %v4846_v29 = vpop.eup %4845  ;;  %v3593_v51 = vxor.u32 2147483648, %v4844_v20  ;;  %4280 = vst [vmem:[%s9693_s22 + $0x190] sm:$0xff] (%p5051_p10), %v4279_v4 }
 0x472   : > { %v3590_v63 = vxor.u32 2147483648, %v4846_v29 }
 0x473   : > { %v3594_v47 = vsel %vm3592_vm3, %v3593_v51, %v4846_v29 }
 0x474   : > { %v3591_v15 = vsel %vm3589_vm10, %v4844_v20, %v3590_v63 }
 0x475   : > { %v3595_v12 = vsel %vm3588_vm9, %v3591_v15, %v3594_v47  ;;  %4211 = sbr.rel (!%p5051_p10) target bundleno = 1156 (0x484), region = 40 }
 0x476   : > { %v3596_v40 = vsel %vm3585_vm8, nan, %v3595_v12 }
 0x477   : > { %v4136_v19 = vmul.f32 %v9625_v36, %v3596_v40  ;;  %v4233_v36 = vld [vmem:[%s6723_s15 + $0x18] sm:$0xff] (%p5051_p10) }
 0x478   : > { %4234 = vst [vmem:[%s9693_s22 + $0x18] sm:$0xff] (%p5051_p10), %v4233_v36 }
 0x479   : > { %v4168_v61 = vadd.f32 %v4136_v19, %v4072_v37 }
 0x47b   : > { %4200 = vst [vmem:[%s6723_s15 + $0xd8] sm:$0xff] %v4168_v61 }
 0x482   : > { %v4281_v8 = vld [vmem:[%s6723_s15 + $0xd8] sm:$0xff] }
 0x483   : > { %4282 = vst [vmem:[%s9693_s22 + $0x198] sm:$0xff] %v4281_v8 }
 0x484 PF: > { %p13_p10 = scmp.ge.s32.totalorder %s5022_s19, 4   ;;  %s10499_s9 = smov %s4935_s10 }
 0x485   : > { %s10500_s10 = smov %s4939_s11  ;;  %s10501_s11 = smov %s5047_s6 }
 0x486   : > { %s10502_s12 = smov %s5022_s19  ;;  %15 = sbr.rel (!%p13_p10) target bundleno = 4 (0x4), region = 95 }
 0x48d   :  { %4306 = vsyncpa [#allocation3], 1 }
 0x48e   :  { %4308 = vsyncpa [#allocation3 + $0x1], 1 }
 0x48f   :  { %4309 = vsyncpa [#allocation5], 1 }

</bundles_post_ra>
